<compile_context>
chip_gen: v5e
topology: v5e:2x2
jax: 0.10.0
libtpu: 0.0.40
codegen_flags: <defaults>
</compile_context>

<pallas_src>
import jax
import jax.numpy as jnp
from jax.experimental import pallas as pl
from jax.experimental.pallas import tpu as pltpu


def _make_se_scale_kernel(native_mul):
    def se_scale_kernel(x_ref, w_ref, b_ref, y_ref, o_ref):
        # x_ref: (Cin, 1)   full (tiny) conv input, replicated across grid steps
        # w_ref: (TC, Cin)  this step's slice of the 1x1 conv weight (f32)
        # b_ref: (TC, 1)    this step's slice of the bias (f32)
        # y_ref: (TC, HW)   this step's slice of the feature map (native dtype)
        # o_ref: (TC, HW)   output slice (native dtype), HBM-aliased with y
        s = jnp.dot(w_ref[...], x_ref[...],
                    preferred_element_type=jnp.float32)        # (TC, 1) matvec
        gate = jax.nn.sigmoid(s + b_ref[...])                  # f32 gate, EUP
        if native_mul:
            # bf16 on v6e/v7x: cast only the (TC, 1) gate, multiply in native
            # dtype (no upcast pass over the big tile, half the vreg pressure).
            o_ref[...] = gate.astype(o_ref.dtype) * y_ref[...]
        else:
            # f32 inputs, or bf16 on v5e (no bf16 VALU): multiply in f32.
            o_ref[...] = (gate * y_ref[...].astype(jnp.float32)
                          ).astype(o_ref.dtype)
    return se_scale_kernel


def _device_kind():
    try:
        return jax.devices()[0].device_kind.lower()
    except Exception:
        return ""


def _pick_cout_tile(cout, n_steps):
    tc = cout // n_steps
    if cout % n_steps == 0 and tc % 8 == 0:
        return tc
    return cout  # fallback: single step


def se_scale(x297, x294, weight, bias):
    """x297: (1, Cin, 1, 1), x294: (1, Cout, H, W),
    weight: (Cout, Cin, 1, 1), bias: (Cout,).  Returns (1, Cout, H, W)."""
    n, cin, _, _ = x297.shape
    nb, cout, h, w = x294.shape
    assert n == 1 and nb == 1, "module only sees batch=1"
    hw = h * w

    # Tiny conv operands: promote to f32 (gate math stays in f32).
    x_vec = x297.reshape(cin, 1).astype(jnp.float32)           # (Cin, 1)
    w_mat = weight.reshape(cout, cin).astype(jnp.float32)      # (Cout, Cin)
    b_vec = bias.reshape(cout, 1).astype(jnp.float32)          # (Cout, 1)
    # Big feature map: keep native dtype (no extra HBM traffic / XLA pass).
    y_map = x294.reshape(cout, hw)                             # (Cout, HW)
    out_dtype = x294.dtype

    dk = _device_kind()
    two_tensorcores = "v7" in dk                               # v7x: 2 TCs/chip
    if two_tensorcores and hasattr(pltpu, "CORE_PARALLEL"):
        # 4 tiles -> 2 pipelined steps per core, Cout axis sharded across TCs.
        n_steps = 4
        semantics = (pltpu.CORE_PARALLEL,)
    else:
        # Single TC: 2 steps keeps per-step overhead below per-step DMA time.
        n_steps = 2
        semantics = ("arbitrary",)

    tc = _pick_cout_tile(cout, n_steps)
    grid = (cout // tc,)

    # bf16 multiply stays native on v6e/v7x; v5e has no bf16 VALU -> f32 path.
    native_mul = (jnp.dtype(out_dtype) == jnp.dtype(jnp.bfloat16)
                  and "v5" not in dk)

    itemsize = jnp.dtype(out_dtype).itemsize
    cost = pl.CostEstimate(
        flops=2 * cout * cin + 2 * cout * hw,
        bytes_accessed=int(x_vec.size * 4 + w_mat.size * 4 + b_vec.size * 4
                           + 2 * cout * hw * itemsize),
        transcendentals=2 * cout,                              # exp + recip
    )

    out = pl.pallas_call(
        _make_se_scale_kernel(native_mul),
        out_shape=jax.ShapeDtypeStruct((cout, hw), out_dtype),
        grid=grid,
        in_specs=[
            pl.BlockSpec((cin, 1), lambda i: (0, 0)),      # full tiny input
            pl.BlockSpec((tc, cin), lambda i: (i, 0)),     # weight slice
            pl.BlockSpec((tc, 1), lambda i: (i, 0)),       # bias slice
            pl.BlockSpec((tc, hw), lambda i: (i, 0)),      # feature-map slice
        ],
        out_specs=pl.BlockSpec((tc, hw), lambda i: (i, 0)),
        input_output_aliases={3: 0},                       # donate feature map
        compiler_params=pltpu.CompilerParams(dimension_semantics=semantics),
        cost_estimate=cost,
    )(x_vec, w_mat, b_vec, y_map)

    return out.reshape(1, cout, h, w)


if __name__ == "__main__":
    key = jax.random.PRNGKey(0)
    k1, k2, k3, k4 = jax.random.split(key, 4)

    CIN, COUT, H, W = 44, 1056, 14, 14

    # Deterministic synthetic inputs / parameters (shapes from the module).
    x297 = jax.random.normal(k1, (1, CIN, 1, 1), dtype=jnp.float32)
    x294 = jax.random.normal(k2, (1, COUT, H, W), dtype=jnp.float32)
    weight = jax.random.normal(k3, (COUT, CIN, 1, 1), dtype=jnp.float32) * 0.05
    bias = jax.random.normal(k4, (COUT,), dtype=jnp.float32) * 0.05

    # Reference (1x1 conv == matvec) computed BEFORE the (aliased) kernel call.
    s_ref = (weight.reshape(COUT, CIN) @ x297.reshape(CIN, 1)) + bias.reshape(COUT, 1)
    ref = jax.nn.sigmoid(s_ref).reshape(1, COUT, 1, 1) * x294
    ref = jax.block_until_ready(ref)

    out = se_scale(x297, x294, weight, bias)
    jax.block_until_ready(out)

    assert out.shape == (1, COUT, H, W)
    assert out.dtype == x294.dtype
    assert jnp.allclose(out, ref, atol=1e-5, rtol=1e-5)

    print("KERNEL_OK")
</pallas_src>

<mosaic_0001>
module attributes {stable_mosaic.version = 11 : i64} {
  func.func @se_scale_kernel(%arg0: i32, %arg1: memref<44x1xf32, #tpu.memory_space<vmem>>, %arg2: memref<528x44xf32, #tpu.memory_space<vmem>>, %arg3: memref<528x1xf32, #tpu.memory_space<vmem>>, %arg4: memref<528x196xf32, #tpu.memory_space<vmem>>, %arg5: memref<528x196xf32, #tpu.memory_space<vmem>>) attributes {dimension_semantics = [#tpu.dimension_semantics<arbitrary>], iteration_bounds = array<i64: 2>, scalar_prefetch = 0 : i64, scratch_operands = 0 : i64, tpu.core_type = #tpu.core_type<tc>, window_params = [{pipeline_mode = #tpu.pipeline_mode<synchronous>, transform_indices = @transform_0, window_bounds = array<i64: 44, 1>}, {transform_indices = @transform_1, window_bounds = array<i64: 528, 44>}, {transform_indices = @transform_2, window_bounds = array<i64: 528, 1>}, {transform_indices = @transform_3, window_bounds = array<i64: 528, 196>}, {transform_indices = @transform_4, window_bounds = array<i64: 528, 196>}]} {
    %c0 = arith.constant 0 : index
    %c0_0 = arith.constant 0 : index
    %0 = vector.load %arg2[%c0, %c0_0] : memref<528x44xf32, #tpu.memory_space<vmem>>, vector<528x44xf32>
    %c0_1 = arith.constant 0 : index
    %c0_2 = arith.constant 0 : index
    %1 = vector.load %arg1[%c0_1, %c0_2] : memref<44x1xf32, #tpu.memory_space<vmem>>, vector<44x1xf32>
    %cst = arith.constant dense<0.000000e+00> : vector<528x1xf32>
    %2 = tpu.matmul %0, %1, %cst {dimension_numbers = #tpu.dot_dimension_numbers<[1], [0], [0], [1], [0, 0, 1, 1], [], []>} : vector<528x44xf32>, vector<44x1xf32>, vector<528x1xf32> -> vector<528x1xf32>
    %c0_3 = arith.constant 0 : index
    %c0_4 = arith.constant 0 : index
    %3 = vector.load %arg3[%c0_3, %c0_4] : memref<528x1xf32, #tpu.memory_space<vmem>>, vector<528x1xf32>
    %4 = arith.addf %2, %3 : vector<528x1xf32>
    %5 = arith.negf %4 : vector<528x1xf32>
    %6 = math.exp %5 : vector<528x1xf32>
    %cst_5 = arith.constant 1.000000e+00 : f32
    %7 = vector.broadcast %cst_5 : f32 to vector<528x1xf32>
    %8 = arith.addf %7, %6 : vector<528x1xf32>
    %9 = arith.divf %7, %8 : vector<528x1xf32>
    %c0_6 = arith.constant 0 : index
    %c0_7 = arith.constant 0 : index
    %10 = vector.load %arg4[%c0_6, %c0_7] : memref<528x196xf32, #tpu.memory_space<vmem>>, vector<528x196xf32>
    %11 = vector.broadcast %9 : vector<528x1xf32> to vector<528x196xf32>
    %12 = arith.mulf %11, %10 : vector<528x196xf32>
    %c0_8 = arith.constant 0 : index
    %c0_9 = arith.constant 0 : index
    %13 = vector.load %arg5[%c0_8, %c0_9] : memref<528x196xf32, #tpu.memory_space<vmem>>, vector<528x196xf32>
    tpu.vector_store %arg5[%c0_8, %c0_9], %12 {strides = array<i32>} : memref<528x196xf32, #tpu.memory_space<vmem>>, vector<528x196xf32>,
    return
  }
  func.func @transform_0(%arg0: i32) -> (i32, i32) {
    %c0_i32 = arith.constant 0 : i32
    %c0_i32_0 = arith.constant 0 : i32
    %c0_i32_1 = arith.constant 0 : i32
    return %c0_i32, %c0_i32_0 : i32, i32
  }
  func.func @transform_1(%arg0: i32) -> (i32, i32) {
    %c0_i32 = arith.constant 0 : i32
    %c0_i32_0 = arith.constant 0 : i32
    return %arg0, %c0_i32 : i32, i32
  }
  func.func @transform_2(%arg0: i32) -> (i32, i32) {
    %c0_i32 = arith.constant 0 : i32
    %c0_i32_0 = arith.constant 0 : i32
    return %arg0, %c0_i32 : i32, i32
  }
  func.func @transform_3(%arg0: i32) -> (i32, i32) {
    %c0_i32 = arith.constant 0 : i32
    %c0_i32_0 = arith.constant 0 : i32
    return %arg0, %c0_i32 : i32, i32
  }
  func.func @transform_4(%arg0: i32) -> (i32, i32) {
    %c0_i32 = arith.constant 0 : i32
    %c0_i32_0 = arith.constant 0 : i32
    return %arg0, %c0_i32 : i32, i32
  }
}

</mosaic_0001>

<bundles_post_ra>
// kernel: tpu_custom_call.1
= control target key start
LH: loop header
LB: loop body
LE: loop exit
PB: predicated region body
PF: predicated region fallthrough
CT: control target
= control target key end

     0   :  { %s3345_s15 = smov 0   ;;  %s6262_s0 = inlined_call_operand.vmem [shape: f32[44,1], index: 0, kind: input, shape index: {}]   ;;  %s6263_s1 = inlined_call_operand.vmem [shape: f32[1056,44], index: 1, kind: input, shape index: {}]   ;;  %s6264_s2 = inlined_call_operand.vmem [shape: f32[1056,1], index: 2, kind: input, shape index: {}]   ;;  %s6265_s3 = inlined_call_operand.vmem [shape: f32[1056,196], index: 3, kind: input, shape index: {}, may-alias: {3,4}]   ;;  %s6266_s4 = inlined_call_operand.vmem [shape: f32[1056,196], index: 4, kind: output, shape index: {}, may-alias: {3,4}]  }
   0x1 LB: > { %s2869_s16 = sadd.s32 4294967295, %s3317_s15   ;;  %p2873_p0 = scmp.ge.s32.totalorder %s3317_s15, 1  ;;  %s3317_s15 = sphi %s3345_s15, %s14_s15  }
   0x2   : > { %p186_p1 = scmp.lt.s32.totalorder %s3317_s15, 3 }
   0x4   : > { %p187_p2 = pnand %p2873_p0, %p186_p1 }
   0x6   : > { %190 = sbr.rel (%p187_p2) target bundleno = 654 (0x28e), region = 36 }
   0xb   : > { %v321_v0 = vld [vmem:[%s6262_s0 + $0x28] sm:$0xf]  ;;  %vm587_vm0 = vcmask 1043456   ;;  %v320_v1 = vld [vmem:[%s6262_s0 + $0x20] sm:$0xff]  ;;  %s224_s21 = smul.u32 66, %s2869_s16  ;;  %v319_v2 = vld [vmem:[%s6262_s0 + $0x18] sm:$0xff] }
   0xc   : > { %2880 = vmatpush.msk.msra.mxu0 %vm587_vm0, %v321_v0  ;;  %3017 = vmatpush.msk.msra.mxu1 %vm587_vm0, %v321_v0  ;;  %v318_v3 = vld [vmem:[%s6262_s0 + $0x10] sm:$0xff]  ;;  %v317_v4 = vld [vmem:[%s6262_s0 + $0x8] sm:$0xff]  ;;  %v316_v5 = vld [vmem:[%s6262_s0] sm:$0xff]  ;;  %vm388_vm1 = vcmask 359424  }
   0xd   : > { %3018 = vmatpush.msk.msra.mxu2 %vm587_vm0, %v321_v0  ;;  %3019 = vmatpush.msk.msra.mxu3 %vm587_vm0, %v321_v0  ;;  %p225_p3 = scmp.lt.s32.totalorder %s224_s21, 131 }
   0xe   : > { %602 = vmatpush.msra.mxu0 %v320_v1  ;;  %3020 = vmatpush.msra.mxu1 %v320_v1 }
   0xf   : > { %3021 = vmatpush.msra.mxu2 %v320_v1  ;;  %3022 = vmatpush.msra.mxu3 %v320_v1  ;;  %s6732_s21 = smov (!%p225_p3, %s224_s21), 131 }
  0x10   : > { %603 = vmatpush.msra.mxu0 %v319_v2  ;;  %3023 = vmatpush.msra.mxu1 %v319_v2  ;;  %s2874_s28 = sshll.u32 %s6732_s21, 3  ;;  %s3015_s11 = sshll.u32 %s6732_s21, 4 }
  0x11   : > { %3024 = vmatpush.msra.mxu2 %v319_v2  ;;  %3025 = vmatpush.msra.mxu3 %v319_v2  ;;  %s3376_s5 = scalar_lea.vmem %s6263_s1, %s2874_s28  ;;  %s3507_s10 = scalar_lea.vmem %s6264_s2, %s2874_s28 }
  0x12   : > { %604 = vmatpush.msra.mxu0 %v318_v3  ;;  %3026 = vmatpush.msra.mxu1 %v318_v3  ;;  %v250_v6 = vld [vmem:[%s3376_s5] sm:$0xff]  ;;  %v283_v8 = vld [vmem:[%s3376_s5 + $0x108] sm:$0xff]  ;;  %v300_v9 = vld [vmem:[%s3376_s5 + $0x190] sm:$0xff]  ;;  %s4802_s14 = scalar_lea.vmem %s6265_s3, %s3015_s11  ;;  %s5459_s18 = scalar_lea.vmem %s6266_s4, %s3015_s11 }
  0x13   : > { %3027 = vmatpush.msra.mxu2 %v318_v3  ;;  %3028 = vmatpush.msra.mxu3 %v318_v3  ;;  %v266_v7 = vld [vmem:[%s3376_s5 + $0x80] sm:$0xff]  ;;  %v251_v10 = vld [vmem:[%s3376_s5 + $0x8] sm:$0xff]  ;;  %v284_v12 = vld [vmem:[%s3376_s5 + $0x110] sm:$0xff] }
  0x14   : > { %605 = vmatpush.msra.mxu0 %v317_v4  ;;  %3029 = vmatpush.msra.mxu1 %v317_v4  ;;  %v267_v11 = vld [vmem:[%s3376_s5 + $0x88] sm:$0xff]  ;;  %v301_v13 = vld [vmem:[%s3376_s5 + $0x198] sm:$0xff]  ;;  %v252_v14 = vld [vmem:[%s3376_s5 + $0x10] sm:$0xff] }
  0x15   : > { %3030 = vmatpush.msra.mxu2 %v317_v4  ;;  %3031 = vmatpush.msra.mxu3 %v317_v4  ;;  %v268_v15 = vld [vmem:[%s3376_s5 + $0x90] sm:$0xff]  ;;  %v285_v16 = vld [vmem:[%s3376_s5 + $0x118] sm:$0xff]  ;;  %v302_v17 = vld [vmem:[%s3376_s5 + $0x1a0] sm:$0xff] }
  0x16   : > { %606 = vmatpush.msra.mxu0 %v316_v5  ;;  %3032 = vmatpush.msra.mxu1 %v316_v5  ;;  %v253_v18 = vld [vmem:[%s3376_s5 + $0x18] sm:$0xff]  ;;  %v303_v20 = vld [vmem:[%s3376_s5 + $0x1a8] sm:$0xff]  ;;  %v286_v21 = vld [vmem:[%s3376_s5 + $0x120] sm:$0xff] }
  0x17   : > { %3033 = vmatpush.msra.mxu2 %v316_v5  ;;  %3034 = vmatpush.msra.mxu3 %v316_v5  ;;  %v269_v19 = vld [vmem:[%s3376_s5 + $0x98] sm:$0xff]  ;;  %v254_v22 = vld [vmem:[%s3376_s5 + $0x20] sm:$0xff]  ;;  %v287_v24 = vld [vmem:[%s3376_s5 + $0x128] sm:$0xff] }
  0x18   : > { %2881 = vmatmul.msk.f32.vlgmr.msra.gmra.mxu0 %vm388_vm1, %v250_v6  ;;  %2897 = vmatmul.msk.f32.vlgmr.msra.gmra.mxu1 %vm388_vm1, %v266_v7  ;;  %v270_v23 = vld [vmem:[%s3376_s5 + $0xa0] sm:$0xff]  ;;  %v304_v25 = vld [vmem:[%s3376_s5 + $0x1b0] sm:$0xff]  ;;  %v255_v26 = vld [vmem:[%s3376_s5 + $0x28] sm:$0xff] }
  0x19   : > { %2914 = vmatmul.msk.f32.vlgmr.msra.gmra.mxu2 %vm388_vm1, %v283_v8  ;;  %2931 = vmatmul.msk.f32.vlgmr.msra.gmra.mxu3 %vm388_vm1, %v300_v9  ;;  %v271_v27 = vld [vmem:[%s3376_s5 + $0xa8] sm:$0xff]  ;;  %v305_v28 = vld [vmem:[%s3376_s5 + $0x1b8] sm:$0xff]  ;;  %v288_v29 = vld [vmem:[%s3376_s5 + $0x130] sm:$0xff] }
  0x1a   : > { %v256_v30 = vld [vmem:[%s3376_s5 + $0x30] sm:$0xff]  ;;  %v289_v32 = vld [vmem:[%s3376_s5 + $0x138] sm:$0xff]  ;;  %v306_v33 = vld [vmem:[%s3376_s5 + $0x1c0] sm:$0xff] }
  0x1b   : > { %v272_v31 = vld [vmem:[%s3376_s5 + $0xb0] sm:$0xff]  ;;  %v257_v34 = vld [vmem:[%s3376_s5 + $0x38] sm:$0xff]  ;;  %v290_v36 = vld [vmem:[%s3376_s5 + $0x140] sm:$0xff] }
  0x1c   : > { %v273_v35 = vld [vmem:[%s3376_s5 + $0xb8] sm:$0xff]  ;;  %v307_v37 = vld [vmem:[%s3376_s5 + $0x1c8] sm:$0xff]  ;;  %v258_v38 = vld [vmem:[%s3376_s5 + $0x40] sm:$0xff] }
  0x1d   : > { %v274_v39 = vld [vmem:[%s3376_s5 + $0xc0] sm:$0xff]  ;;  %v308_v40 = vld [vmem:[%s3376_s5 + $0x1d0] sm:$0xff]  ;;  %v291_v41 = vld [vmem:[%s3376_s5 + $0x148] sm:$0xff] }
  0x1e   : > { %v259_v42 = vld [vmem:[%s3376_s5 + $0x48] sm:$0xff]  ;;  %v292_v44 = vld [vmem:[%s3376_s5 + $0x150] sm:$0xff]  ;;  %v309_v45 = vld [vmem:[%s3376_s5 + $0x1d8] sm:$0xff] }
  0x1f   : > { %v275_v43 = vld [vmem:[%s3376_s5 + $0xc8] sm:$0xff]  ;;  %v260_v46 = vld [vmem:[%s3376_s5 + $0x50] sm:$0xff]  ;;  %v293_v48 = vld [vmem:[%s3376_s5 + $0x158] sm:$0xff] }
  0x20   : > { %2882 = vmatmul.msk.f32.gmra.mxu0 %vm388_vm1, %v251_v10  ;;  %2898 = vmatmul.msk.f32.gmra.mxu1 %vm388_vm1, %v267_v11  ;;  %v276_v47 = vld [vmem:[%s3376_s5 + $0xd0] sm:$0xff]  ;;  %v310_v49 = vld [vmem:[%s3376_s5 + $0x1e0] sm:$0xff]  ;;  %v261_v50 = vld [vmem:[%s3376_s5 + $0x58] sm:$0xff] }
  0x21   : > { %2915 = vmatmul.msk.f32.gmra.mxu2 %vm388_vm1, %v284_v12  ;;  %2932 = vmatmul.msk.f32.gmra.mxu3 %vm388_vm1, %v301_v13  ;;  %v277_v51 = vld [vmem:[%s3376_s5 + $0xd8] sm:$0xff]  ;;  %v294_v52 = vld [vmem:[%s3376_s5 + $0x160] sm:$0xff]  ;;  %v311_v53 = vld [vmem:[%s3376_s5 + $0x1e8] sm:$0xff]  ;;  %v3319_v12 = vmov 0  }
  0x22   : > { %v262_v54 = vld [vmem:[%s3376_s5 + $0x60] sm:$0xff]  ;;  %v295_v56 = vld [vmem:[%s3376_s5 + $0x168] sm:$0xff]  ;;  %v312_v57 = vld [vmem:[%s3376_s5 + $0x1f0] sm:$0xff]  ;;  %3045 = vset.pattern.permute.xlu1 %v3319_v12  ;;  %3044 = vset.pattern.permute.xlu0 %v3319_v12 }
  0x23   : > { %v278_v55 = vld [vmem:[%s3376_s5 + $0xe0] sm:$0xff]  ;;  %v263_v58 = vld [vmem:[%s3376_s5 + $0x68] sm:$0xff]  ;;  %v296_v60 = vld [vmem:[%s3376_s5 + $0x170] sm:$0xff]  ;;  %3046 = vset.pattern.permute.xlu2 %v3319_v12 }
  0x24   : > { %v279_v59 = vld [vmem:[%s3376_s5 + $0xe8] sm:$0xff]  ;;  %v264_v61 = vld [vmem:[%s3376_s5 + $0x70] sm:$0xff]  ;;  %v297_v63 = vld [vmem:[%s3376_s5 + $0x178] sm:$0xff] }
  0x25   : > { %v280_v62 = vld [vmem:[%s3376_s5 + $0xf0] sm:$0xff]  ;;  %v265_v0 = vld [vmem:[%s3376_s5 + $0x78] sm:$0xff]  ;;  %v298_v2 = vld [vmem:[%s3376_s5 + $0x180] sm:$0xff] }
  0x26   : > { %v281_v1 = vld [vmem:[%s3376_s5 + $0xf8] sm:$0xff]  ;;  %v322_v4 = vld [vmem:[%s3507_s10] sm:$0xff]  ;;  %v299_v10 = vld [vmem:[%s3376_s5 + $0x188] sm:$0xff] }
  0x27   : > { %v313_v3 = vld [vmem:[%s3376_s5 + $0x1f8] sm:$0xff]  ;;  %v338_v5 = vld [vmem:[%s3507_s10 + $0x80] sm:$0xff] }
  0x28   : > { %2883 = vmatmul.msk.f32.gmra.mxu0 %vm388_vm1, %v252_v14  ;;  %2899 = vmatmul.msk.f32.gmra.mxu1 %vm388_vm1, %v268_v15  ;;  %v314_v11 = vld [vmem:[%s3376_s5 + $0x200] sm:$0xff]  ;;  %v355_v15 = vld [vmem:[%s3507_s10 + $0x108] sm:$0xff] }
  0x29   : > { %2916 = vmatmul.msk.f32.gmra.mxu2 %vm388_vm1, %v285_v16  ;;  %2933 = vmatmul.msk.f32.gmra.mxu3 %vm388_vm1, %v302_v17  ;;  %v372_v16 = vld [vmem:[%s3507_s10 + $0x190] sm:$0xff]  ;;  %v323_v17 = vld [vmem:[%s3507_s10 + $0x8] sm:$0xff] }
  0x30   : > { %2884 = vmatmul.msk.f32.gmra.mxu0 %vm388_vm1, %v253_v18  ;;  %2900 = vmatmul.msk.f32.gmra.mxu1 %vm388_vm1, %v269_v19  ;;  %v339_v18 = vld [vmem:[%s3507_s10 + $0x88] sm:$0xff] }
  0x31   : > { %2934 = vmatmul.msk.f32.gmra.mxu3 %vm388_vm1, %v303_v20  ;;  %2917 = vmatmul.msk.f32.gmra.mxu2 %vm388_vm1, %v286_v21 }
  0x38   : > { %2885 = vmatmul.msk.f32.gmra.mxu0 %vm388_vm1, %v254_v22  ;;  %2901 = vmatmul.msk.f32.gmra.mxu1 %vm388_vm1, %v270_v23 }
  0x39   : > { %2918 = vmatmul.msk.f32.gmra.mxu2 %vm388_vm1, %v287_v24  ;;  %2935 = vmatmul.msk.f32.gmra.mxu3 %vm388_vm1, %v304_v25 }
  0x40   : > { %2886 = vmatmul.msk.f32.gmra.mxu0 %vm388_vm1, %v255_v26  ;;  %2902 = vmatmul.msk.f32.gmra.mxu1 %vm388_vm1, %v271_v27 }
  0x41   : > { %2936 = vmatmul.msk.f32.gmra.mxu3 %vm388_vm1, %v305_v28  ;;  %2919 = vmatmul.msk.f32.gmra.mxu2 %vm388_vm1, %v288_v29 }
  0x48   : > { %2887 = vmatmul.msk.f32.gmra.mxu0 %vm388_vm1, %v256_v30  ;;  %2903 = vmatmul.msk.f32.gmra.mxu1 %vm388_vm1, %v272_v31 }
  0x49   : > { %2920 = vmatmul.msk.f32.gmra.mxu2 %vm388_vm1, %v289_v32  ;;  %2937 = vmatmul.msk.f32.gmra.mxu3 %vm388_vm1, %v306_v33 }
  0x50   : > { %2888 = vmatmul.msk.f32.gmra.mxu0 %vm388_vm1, %v257_v34  ;;  %2904 = vmatmul.msk.f32.gmra.mxu1 %vm388_vm1, %v273_v35  ;;  %v356_v35 = vld [vmem:[%s3507_s10 + $0x110] sm:$0xff] }
  0x51   : > { %2921 = vmatmul.msk.f32.gmra.mxu2 %vm388_vm1, %v290_v36  ;;  %2938 = vmatmul.msk.f32.gmra.mxu3 %vm388_vm1, %v307_v37  ;;  %v373_v36 = vld [vmem:[%s3507_s10 + $0x198] sm:$0xff]  ;;  %v324_v37 = vld [vmem:[%s3507_s10 + $0x10] sm:$0xff] }
  0x58   : > { %2889 = vmatmul.msk.f32.gmra.mxu0 %vm388_vm1, %v258_v38  ;;  %2905 = vmatmul.msk.f32.gmra.mxu1 %vm388_vm1, %v274_v39  ;;  %v340_v38 = vld [vmem:[%s3507_s10 + $0x90] sm:$0xff] }
  0x59   : > { %2939 = vmatmul.msk.f32.gmra.mxu3 %vm388_vm1, %v308_v40  ;;  %2922 = vmatmul.msk.f32.gmra.mxu2 %vm388_vm1, %v291_v41 }
  0x60   : > { %2890 = vmatmul.msk.f32.gmra.mxu0 %vm388_vm1, %v259_v42  ;;  %2906 = vmatmul.msk.f32.gmra.mxu1 %vm388_vm1, %v275_v43 }
  0x61   : > { %2923 = vmatmul.msk.f32.gmra.mxu2 %vm388_vm1, %v292_v44  ;;  %2940 = vmatmul.msk.f32.gmra.mxu3 %vm388_vm1, %v309_v45 }
  0x68   : > { %2891 = vmatmul.msk.f32.gmra.mxu0 %vm388_vm1, %v260_v46  ;;  %2907 = vmatmul.msk.f32.gmra.mxu1 %vm388_vm1, %v276_v47 }
  0x69   : > { %2924 = vmatmul.msk.f32.gmra.mxu2 %vm388_vm1, %v293_v48  ;;  %2941 = vmatmul.msk.f32.gmra.mxu3 %vm388_vm1, %v310_v49 }
  0x70   : > { %2892 = vmatmul.msk.f32.gmra.mxu0 %vm388_vm1, %v261_v50  ;;  %2908 = vmatmul.msk.f32.gmra.mxu1 %vm388_vm1, %v277_v51 }
  0x71   : > { %2925 = vmatmul.msk.f32.gmra.mxu2 %vm388_vm1, %v294_v52  ;;  %2942 = vmatmul.msk.f32.gmra.mxu3 %vm388_vm1, %v311_v53 }
  0x78   : > { %2893 = vmatmul.msk.f32.gmra.mxu0 %vm388_vm1, %v262_v54  ;;  %2909 = vmatmul.msk.f32.gmra.mxu1 %vm388_vm1, %v278_v55 }
  0x79   : > { %2926 = vmatmul.msk.f32.gmra.mxu2 %vm388_vm1, %v295_v56  ;;  %2943 = vmatmul.msk.f32.gmra.mxu3 %vm388_vm1, %v312_v57 }
  0x80   : > { %2894 = vmatmul.msk.f32.gmra.mxu0 %vm388_vm1, %v263_v58  ;;  %2910 = vmatmul.msk.f32.gmra.mxu1 %vm388_vm1, %v279_v59 }
  0x81   : > { %2927 = vmatmul.msk.f32.gmra.mxu2 %vm388_vm1, %v296_v60  ;;  %2944 = vmatmul.msk.f32.gmra.mxu3 %vm388_vm1, %v313_v3 }
  0x88   : > { %2895 = vmatmul.msk.f32.gmra.mxu0 %vm388_vm1, %v264_v61  ;;  %2911 = vmatmul.msk.f32.gmra.mxu1 %vm388_vm1, %v280_v62  ;;  %v357_v61 = vld [vmem:[%s3507_s10 + $0x118] sm:$0xff]  ;;  %v374_v62 = vld [vmem:[%s3507_s10 + $0x1a0] sm:$0xff] }
  0x89   : > { %2928 = vmatmul.msk.f32.gmra.mxu2 %vm388_vm1, %v297_v63  ;;  %2945 = vmatmul.msk.f32.gmra.mxu3 %vm388_vm1, %v314_v11 }
  0x90   : > { %2896 = vmatmul.msk.f32.gmra.mxu0 %vm388_vm1, %v265_v0  ;;  %2912 = vmatmul.msk.f32.gmra.mxu1 %vm388_vm1, %v281_v1 }
  0x91   : > { %2929 = vmatmul.msk.f32.gmra.mxu2 %vm388_vm1, %v298_v2  ;;  %v282_v2 = vld [vmem:[%s3376_s5 + $0x100] sm:$0xff] }
  0x95   : > { %v608_v6 = vpop.f32.mrf.mxu0  ;;  %v656_v7 = vpop.f32.mrf.mxu1 }
  0x96   : > { %v609_v8 = vadd.f32 %v608_v6, %v322_v4  ;;  %v657_v9 = vadd.f32 %v656_v7, %v338_v5  ;;  %v325_v4 = vld [vmem:[%s3507_s10 + $0x18] sm:$0xff] }
  0x98   : > { %v2947_v13 = vmul.f32 -1.442695, %v609_v8  ;;  %v2963_v14 = vmul.f32 -1.442695, %v657_v9  ;;  %2913 = vmatmul.msk.f32.gmra.mxu1 %vm388_vm1, %v282_v2 }
  0x99   : > { %2930 = vmatmul.msk.f32.gmra.mxu2 %vm388_vm1, %v299_v10 }
  0x9a   : > { %3047 = vpow2.f32 %v2947_v13  ;;  %v341_v13 = vld [vmem:[%s3507_s10 + $0x98] sm:$0xff] }
  0x9b   : > { %3049 = vpow2.f32 %v2963_v14 }
  0x9c   : > { %v707_v19 = vpop.f32.mrf.mxu2  ;;  %v758_v20 = vpop.f32.mrf.mxu3 }
  0x9d   : > { %v708_v21 = vadd.f32 %v707_v19, %v355_v15  ;;  %v759_v22 = vadd.f32 %v758_v20, %v372_v16  ;;  %v611_v23 = vpop.f32.mrf.mxu0  ;;  %v659_v24 = vpop.f32.mrf.mxu1  ;;  %v315_v15 = vld [vmem:[%s3376_s5 + $0x208] sm:$0xff] }
  0x9e   : > { %v612_v25 = vadd.f32 %v611_v23, %v323_v17  ;;  %v660_v26 = vadd.f32 %v659_v24, %v339_v18  ;;  %2946 = vmatmul.msk.f32.gmra.mxu3 %vm388_vm1, %v315_v15 }
  0x9f   : > { %v2980_v27 = vmul.f32 -1.442695, %v708_v21  ;;  %v2997_v28 = vmul.f32 -1.442695, %v759_v22 }
  0xa0   : > { %v3048_v29 = vpop.eup %3047  ;;  %v2948_v32 = vmul.f32 -1.442695, %v612_v25  ;;  %v2964_v34 = vmul.f32 -1.442695, %v660_v26 }
  0xa1   : > { %v3050_v30 = vpop.eup %3049  ;;  %v3522_v31 = vadd.f32 1.0, %v3048_v29  ;;  %3051 = vpow2.f32 %v2980_v27 }
  0xa2   : > { %v3524_v33 = vadd.f32 1.0, %v3050_v30  ;;  %3053 = vpow2.f32 %v2997_v28 }
  0xa3   : > { %3055 = vrcp.f32 %v3522_v31  ;;  %v1081_v48 = vand.u32 2147483648, %v3522_v31  ;;  %vm1075_vm2 = vweird.f32 %v3522_v31  ;;  %v1079_v51 = vand.u32 2147483647, %v3522_v31 }
  0xa4   : > { %3057 = vrcp.f32 %v3524_v33  ;;  %v710_v39 = vpop.f32.mrf.mxu2  ;;  %v761_v40 = vpop.f32.mrf.mxu3  ;;  %v1321_v45 = vand.u32 2147483648, %v3524_v33  ;;  %vm1315_vm3 = vweird.f32 %v3524_v33  ;;  %v1319_v55 = vand.u32 2147483647, %v3524_v33 }
  0xa5   : > { %3059 = vpow2.f32 %v2948_v32  ;;  %v711_v41 = vadd.f32 %v710_v39, %v356_v35  ;;  %v762_v42 = vadd.f32 %v761_v40, %v373_v36  ;;  %v614_v43 = vpop.f32.mrf.mxu0  ;;  %v662_v44 = vpop.f32.mrf.mxu1  ;;  %v3553_v1 = vor.u32 1.1754944e-38, %v1081_v48 }
  0xa6   : > { %3061 = vpow2.f32 %v2964_v34  ;;  %v615_v46 = vadd.f32 %v614_v43, %v324_v37  ;;  %v663_v47 = vadd.f32 %v662_v44, %v340_v38  ;;  %v3544_v59 = vor.u32 1.1754944e-38, %v1321_v45  ;;  %v375_v38 = vld [vmem:[%s3507_s10 + $0x1a8] sm:$0xff] }
  0xa7   : > { %v3052_v49 = vpop.eup %3051  ;;  %v2981_v50 = vmul.f32 -1.442695, %v711_v41  ;;  %v2998_v54 = vmul.f32 -1.442695, %v762_v42  ;;  %vm3562_vm6 = vcmp.eq.f32.partialorder %v1079_v51, 8.507059e+37  ;;  %vm3569_vm7 = vcmp.eq.f32.partialorder %v1319_v55, 8.507059e+37 }
  0xa8   : > { %v3054_v52 = vpop.eup %3053  ;;  %v3536_v53 = vadd.f32 1.0, %v3052_v49  ;;  %v2949_v58 = vmul.f32 -1.442695, %v615_v46  ;;  %v2965_v63 = vmul.f32 -1.442695, %v663_v47  ;;  %v358_v41 = vld [vmem:[%s3507_s10 + $0x120] sm:$0xff] }
  0xa9   : > { %v3540_v56 = vpop.eup %3055  ;;  %v3542_v57 = vadd.f32 1.0, %v3054_v52  ;;  %3063 = vpow2.f32 %v2981_v50  ;;  %v326_v47 = vld [vmem:[%s3507_s10 + $0x20] sm:$0xff] }
  0xaa   : > { %v3546_v60 = vpop.eup %3057  ;;  %3065 = vrcp.f32 %v3536_v53  ;;  %v1071_v0 = vmul.f32 %v3540_v56, %v3522_v31  ;;  %vm1076_vm5 = vweird.f32 %v3540_v56  ;;  %vm1570_vm13 = vweird.f32 %v3536_v53 }
  0xab   : > { %v3060_v3 = vpop.eup %3059  ;;  %3067 = vrcp.f32 %v3542_v57  ;;  %v1311_v5 = vmul.f32 %v3546_v60, %v3524_v33  ;;  %vm1316_vm4 = vweird.f32 %v3546_v60  ;;  %v1829_v14 = vand.u32 2147483647, %v3542_v57  ;;  %vm3598_vm9 = vmor %vm1075_vm2, %vm1076_vm5 }
  0xac   : > { %v3062_v7 = vpop.eup %3061  ;;  %v3567_v8 = vadd.f32 1.0, %v3060_v3  ;;  %3069 = vpow2.f32 %v2998_v54  ;;  %v713_v9 = vpop.f32.mrf.mxu2  ;;  %v1072_v12 = vsub.f32 1.0, %v1071_v0  ;;  %vm1825_vm8 = vweird.f32 %v3542_v57  ;;  %vm3612_vm11 = vmor %vm1315_vm3, %vm1316_vm4 }
  0xad   : > { %v764_v10 = vpop.f32.mrf.mxu3  ;;  %v3576_v16 = vadd.f32 1.0, %v3062_v7  ;;  %3071 = vpow2.f32 %v2949_v58  ;;  %v714_v17 = vadd.f32 %v713_v9, %v357_v61  ;;  %v617_v19 = vpop.f32.mrf.mxu0  ;;  %v1312_v22 = vsub.f32 1.0, %v1311_v5 }
  0xae   : > { %v765_v18 = vadd.f32 %v764_v10, %v374_v62  ;;  %v665_v20 = vpop.f32.mrf.mxu1  ;;  %3073 = vrcp.f32 %v3567_v8  ;;  %v618_v21 = vadd.f32 %v617_v19, %v325_v4  ;;  %v1073_v23 = vmul.f32 %v3540_v56, %v1072_v12 }
  0xaf   : > { %v3064_v24 = vpop.eup %3063  ;;  %3075 = vrcp.f32 %v3576_v16  ;;  %v2982_v25 = vmul.f32 -1.442695, %v714_v17  ;;  %v666_v27 = vadd.f32 %v665_v20, %v341_v13  ;;  %v1313_v32 = vmul.f32 %v3546_v60, %v1312_v22  ;;  %v376_v22 = vld [vmem:[%s3507_s10 + $0x1b0] sm:$0xff] }
  0xb0   : > { %v2999_v26 = vmul.f32 -1.442695, %v765_v18  ;;  %v3582_v28 = vpop.eup %3065  ;;  %v3584_v29 = vadd.f32 1.0, %v3064_v24  ;;  %v2950_v30 = vmul.f32 -1.442695, %v618_v21  ;;  %3077 = vpow2.f32 %v2965_v63  ;;  %v359_v21 = vld [vmem:[%s3507_s10 + $0x128] sm:$0xff] }
  0xb1   : > { %v3587_v34 = vpop.eup %3067  ;;  %3079 = vpow2.f32 %v2982_v25  ;;  %v1074_v35 = vadd.f32 %v3540_v56, %v1073_v23  ;;  %v2966_v36 = vmul.f32 -1.442695, %v666_v27  ;;  %v1314_v39 = vadd.f32 %v3546_v60, %v1313_v32 }
  0xb2   : > { %v3070_v37 = vpop.eup %3069  ;;  %3081 = vrcp.f32 %v3584_v29  ;;  %v1821_v42 = vmul.f32 %v3587_v34, %v3542_v57  ;;  %vm1826_vm10 = vweird.f32 %v3587_v34  ;;  %v1831_v46 = vand.u32 2147483648, %v3542_v57 }
  0xb3   : > { %v3072_v43 = vpop.eup %3071  ;;  %v3606_v44 = vadd.f32 1.0, %v3070_v37  ;;  %3083 = vpow2.f32 %v2999_v26  ;;  %v1078_v45 = vsel %vm3598_vm9, %v3540_v56, %v1074_v35  ;;  %v1318_v33 = vsel %vm3612_vm11, %v3546_v60, %v1314_v39  ;;  %vm1827_vm15 = vmor %vm1825_vm8, %vm1826_vm10 }
  0xb4   : > { %v3621_v48 = vpop.eup %3073  ;;  %v3623_v49 = vadd.f32 1.0, %v3072_v43  ;;  %3085 = vpow2.f32 %v2950_v30  ;;  %v1083_v51 = vsel %vm3562_vm6, %v3553_v1, %v1078_v45  ;;  %v716_v52 = vpop.f32.mrf.mxu2  ;;  %vm3631_vm12 = vcmp.eq.f32.partialorder %v1829_v14, 8.507059e+37  ;;  %v342_v14 = vld [vmem:[%s3507_s10 + $0xa0] sm:$0xff] }
  0xb5   : > { %v767_v50 = vpop.f32.mrf.mxu3  ;;  %v3635_v55 = vpop.eup %3075  ;;  %3087 = vrcp.f32 %v3606_v44  ;;  %v1323_v58 = vsel %vm3569_vm7, %v3544_v59, %v1318_v33  ;;  %2194 = vperm.xlu0 %3044, %v1083_v51   ;;  %v717_v60 = vadd.f32 %v716_v52, %v358_v41  ;;  %v1822_v63 = vsub.f32 1.0, %v1821_v42 }
  0xb6   : > { %v768_v56 = vadd.f32 %v767_v50, %v375_v38  ;;  %v620_v61 = vpop.f32.mrf.mxu0  ;;  %v3078_v62 = vpop.eup %3077  ;;  %3089 = vrcp.f32 %v3623_v49  ;;  %2274 = vperm.xlu1 %3045, %v1323_v58   ;;  %v1832_v0 = vor.u32 1.1754944e-38, %v1831_v46  ;;  %v1566_v10 = vmul.f32 %v3582_v28, %v3536_v53 }
  0xb7   : > { %v621_v1 = vadd.f32 %v620_v61, %v326_v47  ;;  %v3080_v2 = vpop.eup %3079  ;;  %v3643_v3 = vadd.f32 1.0, %v3078_v62  ;;  %3091 = vpow2.f32 %v2966_v36  ;;  %v2983_v5 = vmul.f32 -1.442695, %v717_v60  ;;  %v668_v15 = vpop.f32.mrf.mxu1 }
  0xb8   : > { %v3000_v4 = vmul.f32 -1.442695, %v768_v56  ;;  %v3645_v59 = vpop.eup %3081  ;;  %v3647_v6 = vadd.f32 1.0, %v3080_v2  ;;  %v1823_v7 = vmul.f32 %v3587_v34, %v1822_v63  ;;  %vm1571_vm14 = vweird.f32 %v3582_v28 }
  0xb9   : > { %v2951_v9 = vmul.f32 -1.442695, %v621_v1  ;;  %v3084_v11 = vpop.eup %3083  ;;  %3093 = vrcp.f32 %v3643_v3  ;;  %v1574_v12 = vand.u32 2147483647, %v3536_v53  ;;  %v1576_v13 = vand.u32 2147483648, %v3536_v53  ;;  %vm1572_vm1 = vmor %vm1570_vm13, %vm1571_vm14 }
  0xba   : > { %v3086_v17 = vpop.eup %3085  ;;  %3095 = vrcp.f32 %v3647_v6  ;;  %v3658_v18 = vadd.f32 1.0, %v3084_v11  ;;  %v1824_v19 = vadd.f32 %v3587_v34, %v1823_v7  ;;  %v1567_v20 = vsub.f32 1.0, %v1566_v10 }
  0xbb   : > { %v3663_v23 = vpop.eup %3087  ;;  %v3665_v24 = vadd.f32 1.0, %v3086_v17  ;;  %3097 = vpow2.f32 %v3000_v4  ;;  %vm3671_vm0 = vcmp.eq.f32.partialorder %v1574_v12, 8.507059e+37  ;;  %v1577_v26 = vor.u32 1.1754944e-38, %v1576_v13 }
  0xbc   : > { %v3675_v27 = vpop.eup %3089  ;;  %3099 = vrcp.f32 %v3658_v18  ;;  %v1828_v30 = vsel %vm1827_vm15, %v3587_v34, %v1824_v19  ;;  %v1568_v32 = vmul.f32 %v3582_v28, %v1567_v20  ;;  %v669_v35 = vadd.f32 %v668_v15, %v342_v14  ;;  %v719_v36 = vpop.f32.mrf.mxu2 }
  0xbd   : > { %v770_v37 = vpop.f32.mrf.mxu3  ;;  %v3092_v38 = vpop.eup %3091  ;;  %3101 = vrcp.f32 %v3665_v24  ;;  %v1833_v57 = vsel %vm3631_vm12, %v1832_v0, %v1828_v30  ;;  %v720_v39 = vadd.f32 %v719_v36, %v359_v21  ;;  %v1326_v46 = vmul.f32 %v3635_v55, %v3576_v16  ;;  %v327_v36 = vld [vmem:[%s3507_s10 + $0x28] sm:$0xff] }
  0xbe   : > { %v771_v40 = vadd.f32 %v770_v37, %v376_v22  ;;  %v3683_v41 = vadd.f32 1.0, %v3092_v38  ;;  %3103 = vpow2.f32 %v2983_v5  ;;  %2444 = vperm.xlu2 %3046, %v1833_v57   ;;  %v1569_v42 = vadd.f32 %v3582_v28, %v1568_v32  ;;  %v623_v37 = vpop.f32.mrf.mxu0  ;;  %v343_v38 = vld [vmem:[%s3507_s10 + $0xa8] sm:$0xff] }
  0xbf   : > { %v2967_v34 = vmul.f32 -1.442695, %v669_v35  ;;  %v3686_v43 = vpop.eup %3093  ;;  %3105 = vpow2.f32 %v2951_v9  ;;  %v2984_v31 = vmul.f32 -1.442695, %v720_v39  ;;  %vm1330_vm2 = vweird.f32 %v3576_v16  ;;  %v671_v57 = vpop.f32.mrf.mxu1 }
  0xc0   : > { %v3001_v45 = vmul.f32 -1.442695, %v771_v40  ;;  %v3694_v47 = vpop.eup %3095  ;;  %3107 = vrcp.f32 %v3683_v41  ;;  %v1573_v50 = vsel %vm1572_vm1, %v3582_v28, %v1569_v42  ;;  %vm1331_vm3 = vweird.f32 %v3635_v55 }
  0xc1   : > { %v3098_v33 = vpop.eup %3097  ;;  %v1578_v53 = vsel %vm3671_vm0, %v1577_v26, %v1573_v50  ;;  %3109 = vpow2.f32 %v2967_v34  ;;  %v1327_v51 = vsub.f32 1.0, %v1326_v46  ;;  %v1334_v52 = vand.u32 2147483647, %v3576_v16  ;;  %vm3723_vm6 = vmor %vm1330_vm2, %vm1331_vm3  ;;  %v377_v34 = vld [vmem:[%s3507_s10 + $0x1b8] sm:$0xff] }
  0xc2   : > { %v3703_v54 = vpop.eup %3099  ;;  %v3705_v56 = vadd.f32 1.0, %v3098_v33  ;;  %2359 = vperm.xlu0 %3044, %v1578_v53   ;;  %3111 = vpow2.f32 %v2984_v31  ;;  %v1336_v28 = vand.u32 2147483648, %v3576_v16  ;;  %v1581_v58 = vmul.f32 %v3645_v59, %v3584_v29 }
  0xc3   : > { %v3710_v60 = vpop.eup %3101  ;;  %3113 = vpow2.f32 %v3001_v45  ;;  %v1328_v61 = vmul.f32 %v3635_v55, %v1327_v51  ;;  %vm3713_vm4 = vcmp.eq.f32.partialorder %v1334_v52, 8.507059e+37  ;;  %vm1585_vm5 = vweird.f32 %v3584_v29 }
  0xc4   : > { %v3104_v63 = vpop.eup %3103  ;;  %3115 = vrcp.f32 %v3705_v56  ;;  %v1337_v1 = vor.u32 1.1754944e-38, %v1336_v28  ;;  %v1582_v2 = vsub.f32 1.0, %v1581_v58  ;;  %vm1586_vm7 = vweird.f32 %v3645_v59 }
  0xc5   : > { %v3106_v4 = vpop.eup %3105  ;;  %v3728_v5 = vadd.f32 1.0, %v3104_v63  ;;  %v1329_v7 = vadd.f32 %v3635_v55, %v1328_v61  ;;  %v1589_v9 = vand.u32 2147483647, %v3584_v29  ;;  %v1591_v10 = vand.u32 2147483648, %v3584_v29  ;;  %vm3761_vm10 = vmor %vm1585_vm5, %vm1586_vm7  ;;  %v773_v31 = vpop.f32.mrf.mxu3 }
  0xc6   : > { %v3733_v11 = vpop.eup %3107  ;;  %v3735_v16 = vadd.f32 1.0, %v3106_v4  ;;  %v1583_v12 = vmul.f32 %v3645_v59, %v1582_v2  ;;  %v1086_v13 = vmul.f32 %v3621_v48, %v3567_v8  ;;  %vm1090_vm8 = vweird.f32 %v3567_v8 }
  0xc7   : > { %v3110_v14 = vpop.eup %3109  ;;  %3117 = vrcp.f32 %v3728_v5  ;;  %v1333_v15 = vsel %vm3723_vm6, %v3635_v55, %v1329_v7  ;;  %vm3745_vm9 = vcmp.eq.f32.partialorder %v1589_v9, 8.507059e+37  ;;  %v1592_v19 = vor.u32 1.1754944e-38, %v1591_v10  ;;  %v626_v55 = vpop.f32.mrf.mxu0 }
  0xc8   : > { %v3112_v20 = vpop.eup %3111  ;;  %3119 = vrcp.f32 %v3735_v16  ;;  %v3750_v21 = vadd.f32 1.0, %v3110_v14  ;;  %v1338_v22 = vsel %vm3713_vm4, %v1337_v1, %v1333_v15  ;;  %v1584_v25 = vadd.f32 %v3645_v59, %v1583_v12 }
  0xc9   : > { %v3114_v26 = vpop.eup %3113  ;;  %v3755_v30 = vadd.f32 1.0, %v3112_v20  ;;  %2279 = vperm.xlu2 %3046, %v1338_v22   ;;  %v1087_v32 = vsub.f32 1.0, %v1086_v13  ;;  %vm1091_vm11 = vweird.f32 %v3621_v48  ;;  %v1094_v35 = vand.u32 2147483647, %v3567_v8 }
  0xca   : > { %v3769_v39 = vpop.eup %3115  ;;  %3121 = vrcp.f32 %v3750_v21  ;;  %v3772_v40 = vadd.f32 1.0, %v3114_v26  ;;  %v1588_v29 = vsel %vm3761_vm10, %v3645_v59, %v1584_v25  ;;  %v1096_v42 = vand.u32 2147483648, %v3567_v8  ;;  %vm1092_vm14 = vmor %vm1090_vm8, %vm1091_vm11 }
  0xcb   : > { %3123 = vrcp.f32 %v3755_v30  ;;  %v1593_v45 = vsel %vm3745_vm9, %v1592_v19, %v1588_v29  ;;  %v1088_v46 = vmul.f32 %v3621_v48, %v1087_v32  ;;  %vm3783_vm12 = vcmp.eq.f32.partialorder %v1094_v35, 8.507059e+37 }
  0xcc   : > { %3125 = vrcp.f32 %v3772_v40  ;;  %2364 = vperm.xlu1 %3045, %v1593_v45   ;;  %v1097_v33 = vor.u32 1.1754944e-38, %v1096_v42  ;;  %v624_v59 = vadd.f32 %v623_v37, %v327_v36  ;;  %v672_v53 = vadd.f32 %v671_v57, %v343_v38  ;;  %v344_v37 = vld [vmem:[%s3507_s10 + $0xb0] sm:$0xff]  ;;  %v674_v38 = vpop.f32.mrf.mxu1  ;;  %v722_v45 = vpop.f32.mrf.mxu2 }
  0xcd   : > { %v3788_v51 = vpop.eup %3117  ;;  %v1089_v52 = vadd.f32 %v3621_v48, %v1088_v46  ;;  %v774_v28 = vadd.f32 %v773_v31, %v377_v34  ;;  %v1596_v58 = vmul.f32 %v3694_v47, %v3647_v6  ;;  %vm1600_vm13 = vweird.f32 %v3647_v6  ;;  %v360_v31 = vld [vmem:[%s3507_s10 + $0x130] sm:$0xff] }
  0xce   : > { %v3794_v61 = vpop.eup %3119  ;;  %v2952_v62 = vmul.f32 -1.442695, %v624_v59  ;;  %v2968_v63 = vmul.f32 -1.442695, %v672_v53  ;;  %vm1601_vm15 = vweird.f32 %v3694_v47  ;;  %v1604_v0 = vand.u32 2147483647, %v3647_v6 }
  0xcf   : > { %v1093_v1 = vsel %vm1092_vm14, %v3621_v48, %v1089_v52  ;;  %v3002_v2 = vmul.f32 -1.442695, %v774_v28  ;;  %v1597_v4 = vsub.f32 1.0, %v1596_v58  ;;  %v1606_v7 = vand.u32 2147483648, %v3647_v6  ;;  %vm3824_vm2 = vmor %vm1600_vm13, %vm1601_vm15  ;;  %v328_v6 = vld [vmem:[%s3507_s10 + $0x30] sm:$0xff] }
  0xd0   : > { %v3804_v9 = vpop.eup %3121  ;;  %v1098_v10 = vsel %vm3783_vm12, %v1097_v33, %v1093_v1  ;;  %3127 = vpow2.f32 %v2952_v62  ;;  %vm3808_vm0 = vcmp.eq.f32.partialorder %v1604_v0, 8.507059e+37  ;;  %v1101_v12 = vmul.f32 %v3675_v27, %v3623_v49 }
  0xd1   : > { %v3814_v13 = vpop.eup %3123  ;;  %2199 = vperm.xlu0 %3044, %v1098_v10   ;;  %3129 = vpow2.f32 %v2968_v63  ;;  %v1598_v48 = vmul.f32 %v3694_v47, %v1597_v4  ;;  %v1607_v14 = vor.u32 1.1754944e-38, %v1606_v7  ;;  %vm1105_vm1 = vweird.f32 %v3623_v49 }
  0xd2   : > { %v3818_v15 = vpop.eup %3125  ;;  %3131 = vpow2.f32 %v3002_v2  ;;  %v1102_v19 = vsub.f32 1.0, %v1101_v12  ;;  %vm1106_vm3 = vweird.f32 %v3675_v27  ;;  %v1109_v20 = vand.u32 2147483647, %v3623_v49 }
  0xd3   : > { %v1599_v22 = vadd.f32 %v3694_v47, %v1598_v48  ;;  %v1111_v25 = vand.u32 2147483648, %v3623_v49  ;;  %v1836_v26 = vmul.f32 %v3663_v23, %v3606_v44  ;;  %vm1840_vm4 = vweird.f32 %v3606_v44  ;;  %vm1107_vm8 = vmor %vm1105_vm1, %vm1106_vm3 }
  0xd4   : > { %v1103_v32 = vmul.f32 %v3675_v27, %v1102_v19  ;;  %vm3837_vm5 = vcmp.eq.f32.partialorder %v1109_v20, 8.507059e+37  ;;  %vm1841_vm6 = vweird.f32 %v3663_v23  ;;  %v1844_v36 = vand.u32 2147483647, %v3606_v44 }
  0xd5   : > { %v1603_v57 = vsel %vm3824_vm2, %v3694_v47, %v1599_v22  ;;  %v1112_v29 = vor.u32 1.1754944e-38, %v1111_v25  ;;  %v1837_v42 = vsub.f32 1.0, %v1836_v26  ;;  %v1846_v34 = vand.u32 2147483648, %v3606_v44  ;;  %vm1842_vm9 = vmor %vm1840_vm4, %vm1841_vm6 }
  0xd6   : > { %v3128_v46 = vpop.eup %3127  ;;  %v1608_v50 = vsel %vm3808_vm0, %v1607_v14, %v1603_v57  ;;  %v1104_v33 = vadd.f32 %v3675_v27, %v1103_v32  ;;  %vm3852_vm7 = vcmp.eq.f32.partialorder %v1844_v36, 8.507059e+37  ;;  %v627_v53 = vadd.f32 %v626_v55, %v328_v6  ;;  %v329_v36 = vld [vmem:[%s3507_s10 + $0x38] sm:$0xff] }
  0xd7   : > { %v3130_v52 = vpop.eup %3129  ;;  %v3856_v28 = vadd.f32 1.0, %v3128_v46  ;;  %2369 = vperm.xlu2 %3046, %v1608_v50   ;;  %v1838_v47 = vmul.f32 %v3663_v23, %v1837_v42  ;;  %v1847_v58 = vor.u32 1.1754944e-38, %v1846_v34  ;;  %v675_v62 = vadd.f32 %v674_v38, %v344_v37  ;;  %v629_v37 = vpop.f32.mrf.mxu0 }
  0xd8   : > { %v3132_v63 = vpop.eup %3131  ;;  %v3863_v0 = vadd.f32 1.0, %v3130_v52  ;;  %v1108_v1 = vsel %vm1107_vm8, %v3675_v27, %v1104_v33  ;;  %v2953_v2 = vmul.f32 -1.442695, %v627_v53  ;;  %v723_v4 = vadd.f32 %v722_v45, %v360_v31  ;;  %v361_v52 = vld [vmem:[%s3507_s10 + $0x138] sm:$0xff] }
  0xd9   : > { %3133 = vrcp.f32 %v3856_v28  ;;  %v3867_v7 = vadd.f32 1.0, %v3132_v63  ;;  %v1113_v10 = vsel %vm3837_vm5, %v1112_v29, %v1108_v1  ;;  %v1839_v49 = vadd.f32 %v3663_v23, %v1838_v47  ;;  %v725_v47 = vpop.f32.mrf.mxu2 }
  0xda   : > { %3135 = vrcp.f32 %v3863_v0  ;;  %2204 = vperm.xlu1 %3045, %v1113_v10   ;;  %v2969_v27 = vmul.f32 -1.442695, %v675_v62  ;;  %v2985_v8 = vmul.f32 -1.442695, %v723_v4  ;;  %v1866_v12 = vmul.f32 %v3769_v39, %v3705_v56  ;;  %v378_v4 = vld [vmem:[%s3507_s10 + $0x1c0] sm:$0xff] }
  0xdb   : > { %3137 = vrcp.f32 %v3867_v7  ;;  %v1843_v48 = vsel %vm1842_vm9, %v3663_v23, %v1839_v49  ;;  %vm1870_vm10 = vweird.f32 %v3705_v56  ;;  %vm1871_vm11 = vweird.f32 %v3769_v39 }
  0xdc   : > { %v1848_v14 = vsel %vm3852_vm7, %v1847_v58, %v1843_v48  ;;  %3139 = vpow2.f32 %v2953_v2  ;;  %v1867_v17 = vsub.f32 1.0, %v1866_v12  ;;  %v1874_v44 = vand.u32 2147483647, %v3705_v56  ;;  %vm3902_vm15 = vmor %vm1870_vm10, %vm1871_vm11 }
  0xdd   : > { %2449 = vperm.xlu0 %3044, %v1848_v14   ;;  %3141 = vpow2.f32 %v2969_v27  ;;  %v1876_v19 = vand.u32 2147483648, %v3705_v56  ;;  %v1851_v20 = vmul.f32 %v3703_v54, %v3658_v18  ;;  %vm1855_vm12 = vweird.f32 %v3658_v18 }
  0xde   : > { %3143 = vpow2.f32 %v2985_v8  ;;  %v1868_v23 = vmul.f32 %v3769_v39, %v1867_v17  ;;  %vm3891_vm13 = vcmp.eq.f32.partialorder %v1874_v44, 8.507059e+37  ;;  %vm1856_vm14 = vweird.f32 %v3703_v54 }
  0xdf   : > { %v3896_v25 = vpop.eup %3133  ;;  %v1877_v6 = vor.u32 1.1754944e-38, %v1876_v19  ;;  %v1852_v55 = vsub.f32 1.0, %v1851_v20  ;;  %v1859_v32 = vand.u32 2147483647, %v3658_v18  ;;  %v1861_v35 = vand.u32 2147483648, %v3658_v18  ;;  %vm1857_vm4 = vmor %vm1855_vm12, %vm1856_vm14 }
  0xe0   : > { %v3909_v38 = vpop.eup %3135  ;;  %v1869_v57 = vadd.f32 %v3769_v39, %v1868_v23  ;;  %v1341_v56 = vmul.f32 %v3686_v43, %v3643_v3  ;;  %vm1345_vm0 = vweird.f32 %v3643_v3  ;;  %vm1346_vm1 = vweird.f32 %v3686_v43 }
  0xe1   : > { %v3916_v29 = vpop.eup %3137  ;;  %v1853_v42 = vmul.f32 %v3703_v54, %v1852_v55  ;;  %vm3919_vm2 = vcmp.eq.f32.partialorder %v1859_v32, 8.507059e+37  ;;  %v1862_v31 = vor.u32 1.1754944e-38, %v1861_v35  ;;  %v1349_v45 = vand.u32 2147483647, %v3643_v3  ;;  %vm3954_vm5 = vmor %vm1345_vm0, %vm1346_vm1 }
  0xe2   : > { %v3140_v46 = vpop.eup %3139  ;;  %v1873_v50 = vsel %vm3902_vm15, %v3769_v39, %v1869_v57  ;;  %v1342_v33 = vsub.f32 1.0, %v1341_v56  ;;  %v1351_v59 = vand.u32 2147483648, %v3643_v3  ;;  %v630_v53 = vadd.f32 %v629_v37, %v329_v36  ;;  %v776_v39 = vpop.f32.mrf.mxu3 }
  0xe3   : > { %v3142_v58 = vpop.eup %3141  ;;  %v3929_v62 = vadd.f32 1.0, %v3140_v46  ;;  %v1878_v63 = vsel %vm3891_vm13, %v1877_v6, %v1873_v50  ;;  %v1854_v1 = vadd.f32 %v3703_v54, %v1853_v42  ;;  %vm3934_vm3 = vcmp.eq.f32.partialorder %v1349_v45, 8.507059e+37  ;;  %v345_v50 = vld [vmem:[%s3507_s10 + $0xb8] sm:$0xff] }
  0xe4   : > { %v3144_v10 = vpop.eup %3143  ;;  %v3939_v49 = vadd.f32 1.0, %v3142_v58  ;;  %2459 = vperm.xlu2 %3046, %v1878_v63   ;;  %v1343_v27 = vmul.f32 %v3686_v43, %v1342_v33  ;;  %v1352_v8 = vor.u32 1.1754944e-38, %v1351_v59  ;;  %v2954_v12 = vmul.f32 -1.442695, %v630_v53  ;;  %v677_v33 = vpop.f32.mrf.mxu1 }
  0xe5   : > { %3145 = vrcp.f32 %v3929_v62  ;;  %v3947_v48 = vadd.f32 1.0, %v3144_v10  ;;  %v1858_v14 = vsel %vm1857_vm4, %v3703_v54, %v1854_v1  ;;  %v726_v18 = vadd.f32 %v725_v47, %v361_v52 }
  0xe6   : > { %3147 = vrcp.f32 %v3939_v49  ;;  %v1863_v44 = vsel %vm3919_vm2, %v1862_v31, %v1858_v14  ;;  %v1344_v19 = vadd.f32 %v3686_v43, %v1343_v27  ;;  %v777_v20 = vadd.f32 %v776_v39, %v378_v4 }
  0xe7   : > { %3149 = vrcp.f32 %v3947_v48  ;;  %2454 = vperm.xlu1 %3045, %v1863_v44   ;;  %v2986_v54 = vmul.f32 -1.442695, %v726_v18  ;;  %v1131_v3 = vmul.f32 %v3794_v61, %v3735_v16  ;;  %vm1135_vm6 = vweird.f32 %v3735_v16  ;;  %v362_v44 = vld [vmem:[%s3507_s10 + $0x140] sm:$0xff] }
  0xe8   : > { %v1348_v23 = vsel %vm3954_vm5, %v3686_v43, %v1344_v19  ;;  %3151 = vpow2.f32 %v2954_v12  ;;  %v3003_v22 = vmul.f32 -1.442695, %v777_v20  ;;  %vm1136_vm7 = vweird.f32 %v3794_v61  ;;  %v728_v19 = vpop.f32.mrf.mxu2 }
  0xe9   : > { %v1353_v26 = vsel %vm3934_vm3, %v1352_v8, %v1348_v23  ;;  %3153 = vpow2.f32 %v2986_v54  ;;  %v1132_v6 = vsub.f32 1.0, %v1131_v3  ;;  %v1139_v55 = vand.u32 2147483647, %v3735_v16  ;;  %vm3992_vm11 = vmor %vm1135_vm6, %vm1136_vm7 }
  0xea   : > { %2284 = vperm.xlu0 %3044, %v1353_v26   ;;  %3155 = vpow2.f32 %v3003_v22  ;;  %v1141_v32 = vand.u32 2147483648, %v3735_v16  ;;  %v1116_v35 = vmul.f32 %v3710_v60, %v3665_v24  ;;  %vm1120_vm8 = vweird.f32 %v3665_v24  ;;  %v779_v20 = vpop.f32.mrf.mxu3 }
  0xeb   : > { %v3977_v43 = vpop.eup %3145  ;;  %v1133_v36 = vmul.f32 %v3794_v61, %v1132_v6  ;;  %vm3980_vm9 = vcmp.eq.f32.partialorder %v1139_v55, 8.507059e+37  ;;  %vm1121_vm10 = vweird.f32 %v3710_v60  ;;  %v1124_v57 = vand.u32 2147483647, %v3665_v24 }
  0xec   : > { %v3986_v56 = vpop.eup %3147  ;;  %v1142_v34 = vor.u32 1.1754944e-38, %v1141_v32  ;;  %v1117_v31 = vsub.f32 1.0, %v1116_v35  ;;  %v1126_v45 = vand.u32 2147483648, %v3665_v24  ;;  %v1611_v46 = vmul.f32 %v3788_v51, %v3728_v5  ;;  %vm4020_vm15 = vmor %vm1120_vm8, %vm1121_vm10  ;;  %v379_v24 = vld [vmem:[%s3507_s10 + $0x1c8] sm:$0xff] }
  0xed   : > { %v4000_v59 = vpop.eup %3149  ;;  %v1134_v53 = vadd.f32 %v3794_v61, %v1133_v36  ;;  %vm4003_vm12 = vcmp.eq.f32.partialorder %v1124_v57, 8.507059e+37  ;;  %vm1615_vm13 = vweird.f32 %v3728_v5  ;;  %vm1616_vm14 = vweird.f32 %v3788_v51 }
  0xee   : > { %v3152_v16 = vpop.eup %3151  ;;  %v1118_v47 = vmul.f32 %v3710_v60, %v1117_v31  ;;  %v1127_v58 = vor.u32 1.1754944e-38, %v1126_v45  ;;  %v1612_v63 = vsub.f32 1.0, %v1611_v46  ;;  %v1619_v1 = vand.u32 2147483647, %v3728_v5  ;;  %vm4040_vm0 = vmor %vm1615_vm13, %vm1616_vm14 }
  0xef   : > { %v3154_v2 = vpop.eup %3153  ;;  %v4011_v4 = vadd.f32 1.0, %v3152_v16  ;;  %v1138_v39 = vsel %vm3992_vm11, %v3794_v61, %v1134_v53  ;;  %v1621_v27 = vand.u32 2147483648, %v3728_v5  ;;  %v678_v8 = vadd.f32 %v677_v33, %v345_v50 }
  0xf0   : > { %v3156_v12 = vpop.eup %3155  ;;  %v4025_v14 = vadd.f32 1.0, %v3154_v2  ;;  %v1143_v17 = vsel %vm3980_vm9, %v1142_v34, %v1138_v39  ;;  %v1119_v18 = vadd.f32 %v3710_v60, %v1118_v47  ;;  %v1613_v61 = vmul.f32 %v3788_v51, %v1612_v63  ;;  %v632_v2 = vpop.f32.mrf.mxu0 }
  0xf1   : > { %3157 = vrcp.f32 %v4011_v4  ;;  %v4034_v54 = vadd.f32 1.0, %v3156_v12  ;;  %2214 = vperm.xlu2 %3046, %v1143_v17   ;;  %vm1620_vm1 = vcmp.eq.f32.partialorder %v1619_v1, 8.507059e+37  ;;  %v1622_v23 = vor.u32 1.1754944e-38, %v1621_v27  ;;  %v330_v1 = vld [vmem:[%s3507_s10 + $0x40] sm:$0xff] }
  0xf2   : > { %3159 = vrcp.f32 %v4025_v14  ;;  %v1123_v22 = vsel %vm4020_vm15, %v3710_v60, %v1119_v18  ;;  %v1614_v26 = vadd.f32 %v3788_v51, %v1613_v61  ;;  %v2970_v6 = vmul.f32 -1.442695, %v678_v8  ;;  %v346_v18 = vld [vmem:[%s3507_s10 + $0xc0] sm:$0xff]  ;;  %v680_v61 = vpop.f32.mrf.mxu1 }
  0xf3   : > { %3161 = vrcp.f32 %v4034_v54  ;;  %v1128_v5 = vsel %vm4003_vm12, %v1127_v58, %v1123_v22  ;;  %v729_v55 = vadd.f32 %v728_v19, %v362_v44  ;;  %v780_v32 = vadd.f32 %v779_v20, %v379_v24  ;;  %v782_v22 = vpop.f32.mrf.mxu3 }
  0xf4   : > { %2209 = vperm.xlu1 %3045, %v1128_v5   ;;  %v1618_v35 = vsel %vm4040_vm0, %v3788_v51, %v1614_v26  ;;  %3163 = vpow2.f32 %v2970_v6  ;;  %v1371_v36 = vmul.f32 %v3804_v9, %v3750_v21  ;;  %vm1375_vm2 = vweird.f32 %v3750_v21 }
  0xf5   : > { %v1623_v60 = vsel %vm1620_vm1, %v1622_v23, %v1618_v35  ;;  %v2987_v37 = vmul.f32 -1.442695, %v729_v55  ;;  %v3004_v57 = vmul.f32 -1.442695, %v780_v32  ;;  %vm1376_vm3 = vweird.f32 %v3804_v9  ;;  %v380_v23 = vld [vmem:[%s3507_s10 + $0x1d0] sm:$0xff] }
  0xf6   : > { %2374 = vperm.xlu0 %3044, %v1623_v60   ;;  %v1372_v42 = vsub.f32 1.0, %v1371_v36  ;;  %v1379_v34 = vand.u32 2147483647, %v3750_v21  ;;  %v1381_v31 = vand.u32 2147483648, %v3750_v21  ;;  %v1356_v51 = vmul.f32 %v3733_v11, %v3683_v41  ;;  %vm4077_vm6 = vmor %vm1375_vm2, %vm1376_vm3 }
  0xf7   : > { %v4063_v45 = vpop.eup %3157  ;;  %3165 = vpow2.f32 %v2987_v37  ;;  %vm1360_vm4 = vweird.f32 %v3683_v41  ;;  %vm1361_vm5 = vweird.f32 %v3733_v11  ;;  %v1364_v33 = vand.u32 2147483647, %v3683_v41 }
  0xf8   : > { %v4066_v46 = vpop.eup %3159  ;;  %3167 = vpow2.f32 %v3004_v57  ;;  %v1373_v50 = vmul.f32 %v3804_v9, %v1372_v42  ;;  %v1382_v16 = vor.u32 1.1754944e-38, %v1381_v31  ;;  %v1357_v47 = vsub.f32 1.0, %v1356_v51  ;;  %vm4104_vm10 = vmor %vm1360_vm4, %vm1361_vm5  ;;  %v635_v19 = vpop.f32.mrf.mxu0 }
  0xf9   : > { %v4071_v53 = vpop.eup %3161  ;;  %v1366_v58 = vand.u32 2147483648, %v3683_v41  ;;  %v1881_v63 = vmul.f32 %v3818_v15, %v3772_v40  ;;  %vm4086_vm7 = vcmp.eq.f32.partialorder %v1379_v34, 8.507059e+37  ;;  %vm1885_vm8 = vweird.f32 %v3772_v40 }
  0xfa   : > { %v3164_v39 = vpop.eup %3163  ;;  %v1374_v10 = vadd.f32 %v3804_v9, %v1373_v50  ;;  %vm1886_vm9 = vweird.f32 %v3818_v15  ;;  %v1358_v8 = vmul.f32 %v3733_v11, %v1357_v47  ;;  %v1889_v17 = vand.u32 2147483647, %v3772_v40 }
  0xfb   : > { %v4092_v27 = vadd.f32 1.0, %v3164_v39  ;;  %v1882_v12 = vsub.f32 1.0, %v1881_v63  ;;  %v1367_v24 = vor.u32 1.1754944e-38, %v1366_v58  ;;  %v1891_v20 = vand.u32 2147483648, %v3772_v40  ;;  %vm4120_vm12 = vmor %vm1885_vm8, %vm1886_vm9 }
  0xfc   : > { %v1378_v44 = vsel %vm4077_vm6, %v3804_v9, %v1374_v10  ;;  %v633_v3 = vadd.f32 %v632_v2, %v330_v1  ;;  %v1359_v9 = vadd.f32 %v3733_v11, %v1358_v8  ;;  %vm1365_vm11 = vcmp.eq.f32.partialorder %v1364_v33, 8.507059e+37 }
  0xfd   : > { %v3166_v26 = vpop.eup %3165  ;;  %v1383_v6 = vsel %vm4086_vm7, %v1382_v16, %v1378_v44  ;;  %v1883_v5 = vmul.f32 %v3818_v15, %v1882_v12  ;;  %v1892_v35 = vor.u32 1.1754944e-38, %v1891_v20  ;;  %v681_v60 = vadd.f32 %v680_v61, %v346_v18  ;;  %v331_v44 = vld [vmem:[%s3507_s10 + $0x48] sm:$0xff] }
  0xfe   : > { %v3168_v41 = vpop.eup %3167  ;;  %v4114_v55 = vadd.f32 1.0, %v3166_v26  ;;  %2294 = vperm.xlu2 %3046, %v1383_v6   ;;  %v2955_v36 = vmul.f32 -1.442695, %v633_v3  ;;  %v1363_v37 = vsel %vm4104_vm10, %v3733_v11, %v1359_v9  ;;  %vm1890_vm13 = vcmp.eq.f32.partialorder %v1889_v17, 8.507059e+37  ;;  %v347_v6 = vld [vmem:[%s3507_s10 + $0xc8] sm:$0xff]  ;;  %v683_v9 = vpop.f32.mrf.mxu1 }
  0xff   : > { %v1884_v57 = vadd.f32 %v3818_v15, %v1883_v5  ;;  %v783_v42 = vadd.f32 %v782_v22, %v380_v23  ;;  %3169 = vrcp.f32 %v4092_v27  ;;  %v1368_v34 = vsel %vm1365_vm11, %v1367_v24, %v1363_v37  ;;  %v363_v37 = vld [vmem:[%s3507_s10 + $0x148] sm:$0xff] }
 0x100   : > { %v2971_v31 = vmul.f32 -1.442695, %v681_v60  ;;  %v1146_v40 = vmul.f32 %v3896_v25, %v3856_v28  ;;  %3171 = vrcp.f32 %v4114_v55  ;;  %2289 = vperm.xlu1 %3045, %v1368_v34   ;;  %vm1150_vm14 = vweird.f32 %v3856_v28 }
 0x101   : > { %v1888_v51 = vsel %vm4120_vm12, %v3818_v15, %v1884_v57  ;;  %v3005_v50 = vmul.f32 -1.442695, %v783_v42  ;;  %3173 = vpow2.f32 %v2955_v36  ;;  %vm1151_vm15 = vweird.f32 %v3896_v25  ;;  %v731_v57 = vpop.f32.mrf.mxu2 }
 0x102   : > { %v1893_v11 = vsel %vm1890_vm13, %v1892_v35, %v1888_v51  ;;  %v1147_v33 = vsub.f32 1.0, %v1146_v40  ;;  %3175 = vpow2.f32 %v2971_v31  ;;  %v1154_v52 = vand.u32 2147483647, %v3856_v28  ;;  %vm4145_vm1 = vmor %vm1150_vm14, %vm1151_vm15 }
 0x103   : > { %2464 = vperm.xlu0 %3044, %v1893_v11   ;;  %v1156_v16 = vand.u32 2147483648, %v3856_v28  ;;  %v1626_v47 = vmul.f32 %v3814_v13, %v3755_v30  ;;  %v4141_v58 = vadd.f32 1.0, %v3168_v41  ;;  %3177 = vpow2.f32 %v3005_v50 }
 0x104   : > { %v1148_v15 = vmul.f32 %v3896_v25, %v1147_v33  ;;  %vm1630_vm0 = vweird.f32 %v3755_v30  ;;  %vm1631_vm2 = vweird.f32 %v3814_v13  ;;  %v1634_v28 = vand.u32 2147483647, %v3755_v30 }
 0x105   : > { %v1157_v1 = vor.u32 1.1754944e-38, %v1156_v16  ;;  %v1627_v2 = vsub.f32 1.0, %v1626_v47  ;;  %v4151_v39 = vpop.eup %3169  ;;  %vm4154_vm3 = vcmp.eq.f32.partialorder %v1154_v52, 8.507059e+37  ;;  %v1636_v8 = vand.u32 2147483648, %v3755_v30  ;;  %vm4175_vm6 = vmor %vm1630_vm0, %vm1631_vm2 }
 0x106   : > { %v1149_v10 = vadd.f32 %v3896_v25, %v1148_v15  ;;  %v1386_v12 = vmul.f32 %v3909_v38, %v3863_v0  ;;  %v4161_v17 = vpop.eup %3171  ;;  %vm1390_vm4 = vweird.f32 %v3863_v0  ;;  %vm1391_vm5 = vweird.f32 %v3909_v38 }
 0x107   : > { %v1628_v18 = vmul.f32 %v3814_v13, %v1627_v2  ;;  %v1394_v61 = vand.u32 2147483647, %v3863_v0  ;;  %v3174_v24 = vpop.eup %3173  ;;  %v1637_v23 = vor.u32 1.1754944e-38, %v1636_v8  ;;  %v1396_v26 = vand.u32 2147483648, %v3863_v0  ;;  %vm4202_vm9 = vmor %vm1390_vm4, %vm1391_vm5 }
 0x108   : > { %v1153_v20 = vsel %vm4145_vm1, %v3896_v25, %v1149_v10  ;;  %v1387_v22 = vsub.f32 1.0, %v1386_v12  ;;  %v3176_v5 = vpop.eup %3175  ;;  %v4181_v41 = vadd.f32 1.0, %v3174_v24  ;;  %vm1635_vm7 = vcmp.eq.f32.partialorder %v1634_v28, 8.507059e+37 }
 0x109   : > { %v1158_v25 = vsel %vm4154_vm3, %v1157_v1, %v1153_v20  ;;  %v1629_v32 = vadd.f32 %v3814_v13, %v1628_v18  ;;  %v3178_v30 = vpop.eup %3177  ;;  %3179 = vrcp.f32 %v4141_v58  ;;  %vm4188_vm8 = vcmp.eq.f32.partialorder %v1394_v61, 8.507059e+37 }
 0x10a   : > { %2219 = vperm.xlu2 %3046, %v1158_v25   ;;  %v1388_v35 = vmul.f32 %v3909_v38, %v1387_v22  ;;  %v636_v60 = vadd.f32 %v635_v19, %v331_v44  ;;  %v4193_v42 = vadd.f32 1.0, %v3176_v5  ;;  %v1397_v40 = vor.u32 1.1754944e-38, %v1396_v26 }
 0x10b   : > { %v1633_v34 = vsel %vm4175_vm6, %v3814_v13, %v1629_v32  ;;  %v684_v51 = vadd.f32 %v683_v9, %v347_v6  ;;  %3181 = vrcp.f32 %v4181_v41  ;;  %v4208_v52 = vadd.f32 1.0, %v3178_v30  ;;  %v332_v6 = vld [vmem:[%s3507_s10 + $0x50] sm:$0xff]  ;;  %v638_v9 = vpop.f32.mrf.mxu0 }
 0x10c   : > { %v1638_v50 = vsel %vm1635_vm7, %v1637_v23, %v1633_v34  ;;  %v1389_v11 = vadd.f32 %v3909_v38, %v1388_v35  ;;  %v2956_v33 = vmul.f32 -1.442695, %v636_v60  ;;  %v732_v16 = vadd.f32 %v731_v57, %v363_v37  ;;  %v364_v60 = vld [vmem:[%s3507_s10 + $0x150] sm:$0xff]  ;;  %v734_v37 = vpop.f32.mrf.mxu2 }
 0x10d   : > { %2379 = vperm.xlu1 %3045, %v1638_v50   ;;  %v2972_v13 = vmul.f32 -1.442695, %v684_v51  ;;  %v1641_v0 = vmul.f32 %v4000_v59, %v3947_v48  ;;  %vm1645_vm10 = vweird.f32 %v3947_v48  ;;  %vm1646_vm11 = vweird.f32 %v4000_v59 }
 0x10e   : > { %v1393_v47 = vsel %vm4202_vm9, %v3909_v38, %v1389_v11  ;;  %3183 = vpow2.f32 %v2956_v33  ;;  %v2988_v63 = vmul.f32 -1.442695, %v732_v16  ;;  %v1649_v28 = vand.u32 2147483647, %v3947_v48  ;;  %vm4235_vm14 = vmor %vm1645_vm10, %vm1646_vm11 }
 0x10f   : > { %v1398_v15 = vsel %vm4188_vm8, %v1397_v40, %v1393_v47  ;;  %3185 = vpow2.f32 %v2972_v13  ;;  %v1642_v1 = vsub.f32 1.0, %v1641_v0  ;;  %v4219_v2 = vpop.eup %3179  ;;  %v1651_v38 = vand.u32 2147483648, %v3947_v48  ;;  %v785_v40 = vpop.f32.mrf.mxu3 }
 0x110   : > { %3187 = vrcp.f32 %v4193_v42  ;;  %2299 = vperm.xlu0 %3044, %v1398_v15   ;;  %v1896_v10 = vmul.f32 %v3916_v29, %v3867_v7  ;;  %vm1900_vm12 = vweird.f32 %v3867_v7  ;;  %vm1901_vm13 = vweird.f32 %v3916_v29 }
 0x111   : > { %3189 = vpow2.f32 %v2988_v63  ;;  %v1643_v21 = vmul.f32 %v4000_v59, %v1642_v1  ;;  %v4229_v8 = vpop.eup %3181  ;;  %v1652_v18 = vor.u32 1.1754944e-38, %v1651_v38  ;;  %v1904_v44 = vand.u32 2147483647, %v3867_v7  ;;  %vm4262_vm2 = vmor %vm1900_vm12, %vm1901_vm13 }
 0x112   : > { %v1897_v61 = vsub.f32 1.0, %v1896_v10  ;;  %v1906_v19 = vand.u32 2147483648, %v3867_v7  ;;  %vm4242_vm15 = vcmp.eq.f32.partialorder %v1649_v28, 8.507059e+37  ;;  %v1161_v48 = vmul.f32 %v3977_v43, %v3929_v62  ;;  %v381_v7 = vld [vmem:[%s3507_s10 + $0x1d8] sm:$0xff] }
 0x113   : > { %v1644_v24 = vadd.f32 %v4000_v59, %v1643_v21  ;;  %vm1165_vm0 = vweird.f32 %v3929_v62  ;;  %vm1166_vm1 = vweird.f32 %v3977_v43  ;;  %v1169_v26 = vand.u32 2147483647, %v3929_v62 }
 0x114   : > { %v3184_v3 = vpop.eup %3183  ;;  %v1898_v23 = vmul.f32 %v3916_v29, %v1897_v61  ;;  %v1907_v22 = vor.u32 1.1754944e-38, %v1906_v19  ;;  %v1162_v35 = vsub.f32 1.0, %v1161_v48  ;;  %v1171_v36 = vand.u32 2147483648, %v3929_v62  ;;  %vm4290_vm5 = vmor %vm1165_vm0, %vm1166_vm1 }
 0x115   : > { %v3186_v5 = vpop.eup %3185  ;;  %v4253_v25 = vadd.f32 1.0, %v3184_v3  ;;  %v1648_v32 = vsel %vm4235_vm14, %v4000_v59, %v1644_v24  ;;  %vm1905_vm3 = vcmp.eq.f32.partialorder %v1904_v44, 8.507059e+37  ;;  %3191 = vrcp.f32 %v4208_v52 }
 0x116   : > { %v4268_v57 = vpop.eup %3187  ;;  %v4270_v34 = vadd.f32 1.0, %v3186_v5  ;;  %v1653_v59 = vsel %vm4242_vm15, %v1652_v18, %v1648_v32  ;;  %v1899_v31 = vadd.f32 %v3916_v29, %v1898_v23  ;;  %v1163_v50 = vmul.f32 %v3977_v43, %v1162_v35  ;;  %v686_v5 = vpop.f32.mrf.mxu1 }
 0x117   : > { %v3190_v51 = vpop.eup %3189  ;;  %2384 = vperm.xlu2 %3046, %v1653_v59   ;;  %vm4278_vm4 = vcmp.eq.f32.partialorder %v1169_v26, 8.507059e+37  ;;  %v639_v33 = vadd.f32 %v638_v9, %v332_v6  ;;  %3193 = vrcp.f32 %v4253_v25  ;;  %v1172_v0 = vor.u32 1.1754944e-38, %v1171_v36  ;;  %v348_v9 = vld [vmem:[%s3507_s10 + $0xd0] sm:$0xff] }
 0x118   : > { %v1903_v13 = vsel %vm4262_vm2, %v3916_v29, %v1899_v31  ;;  %v735_v47 = vadd.f32 %v734_v37, %v364_v60  ;;  %v1164_v63 = vadd.f32 %v3977_v43, %v1163_v50  ;;  %v786_v28 = vadd.f32 %v785_v40, %v381_v7 }
 0x119   : > { %v1908_v15 = vsel %vm1905_vm3, %v1907_v22, %v1903_v13  ;;  %v2957_v1 = vmul.f32 -1.442695, %v639_v33  ;;  %3195 = vrcp.f32 %v4270_v34  ;;  %v1911_v29 = vmul.f32 %v4071_v53, %v4034_v54 }
 0x11a   : > { %2469 = vperm.xlu1 %3045, %v1908_v15   ;;  %v2989_v38 = vmul.f32 -1.442695, %v735_v47  ;;  %vm1915_vm6 = vweird.f32 %v4034_v54  ;;  %v1168_v62 = vsel %vm4290_vm5, %v3977_v43, %v1164_v63  ;;  %v3006_v10 = vmul.f32 -1.442695, %v786_v28  ;;  %v382_v15 = vld [vmem:[%s3507_s10 + $0x1e0] sm:$0xff]  ;;  %v788_v63 = vpop.f32.mrf.mxu3 }
 0x11b   : > { %3197 = vpow2.f32 %v2957_v1  ;;  %vm1916_vm7 = vweird.f32 %v4071_v53  ;;  %v1173_v21 = vsel %vm4278_vm4, %v1172_v0, %v1168_v62  ;;  %v1912_v12 = vsub.f32 1.0, %v1911_v29  ;;  %v4306_v61 = vpop.eup %3191  ;;  %v365_v0 = vld [vmem:[%s3507_s10 + $0x158] sm:$0xff] }
 0x11c   : > { %3199 = vpow2.f32 %v2989_v38  ;;  %v1919_v18 = vand.u32 2147483647, %v4034_v54  ;;  %v4308_v44 = vadd.f32 1.0, %v3190_v51  ;;  %2224 = vperm.xlu0 %3044, %v1173_v21   ;;  %v1921_v43 = vand.u32 2147483648, %v4034_v54  ;;  %vm4323_vm10 = vmor %vm1915_vm6, %vm1916_vm7 }
 0x11d   : > { %3201 = vpow2.f32 %v3006_v10  ;;  %v1401_v19 = vmul.f32 %v3986_v56, %v3939_v49  ;;  %v4313_v24 = vpop.eup %3193  ;;  %v1913_v20 = vmul.f32 %v4071_v53, %v1912_v12  ;;  %vm1405_vm8 = vweird.f32 %v3939_v49 }
 0x11e   : > { %vm1406_vm9 = vweird.f32 %v3986_v56  ;;  %v1409_v48 = vand.u32 2147483647, %v3939_v49  ;;  %v1922_v23 = vor.u32 1.1754944e-38, %v1921_v43  ;;  %v1411_v26 = vand.u32 2147483648, %v3939_v49  ;;  %v366_v49 = vld [vmem:[%s3507_s10 + $0x160] sm:$0xff] }
 0x11f   : > { %v1402_v22 = vsub.f32 1.0, %v1401_v19  ;;  %v1656_v6 = vmul.f32 %v4066_v46, %v4025_v14  ;;  %v4331_v32 = vpop.eup %3195  ;;  %v1914_v30 = vadd.f32 %v4071_v53, %v1913_v20  ;;  %vm1920_vm11 = vcmp.eq.f32.partialorder %v1919_v18, 8.507059e+37  ;;  %vm4347_vm14 = vmor %vm1405_vm8, %vm1406_vm9 }
 0x120   : > { %vm1660_vm12 = vweird.f32 %v4025_v14  ;;  %vm1661_vm13 = vweird.f32 %v4066_v46  ;;  %v1412_v36 = vor.u32 1.1754944e-38, %v1411_v26  ;;  %v1664_v37 = vand.u32 2147483647, %v4025_v14 }
 0x121   : > { %v3198_v54 = vpop.eup %3197  ;;  %v1403_v35 = vmul.f32 %v3986_v56, %v1402_v22  ;;  %v1657_v60 = vsub.f32 1.0, %v1656_v6  ;;  %v1918_v7 = vsel %vm4323_vm10, %v4071_v53, %v1914_v30  ;;  %v1666_v51 = vand.u32 2147483648, %v4025_v14  ;;  %v737_v53 = vpop.f32.mrf.mxu2  ;;  %vm4360_vm0 = vmor %vm1660_vm12, %vm1661_vm13 }
 0x122   : > { %v3200_v59 = vpop.eup %3199  ;;  %v4338_v31 = vadd.f32 1.0, %v3198_v54  ;;  %v687_v50 = vadd.f32 %v686_v5, %v348_v9  ;;  %v1923_v33 = vsel %vm1920_vm11, %v1922_v23, %v1918_v7  ;;  %vm1410_vm15 = vcmp.eq.f32.partialorder %v1409_v48, 8.507059e+37 }
 0x123   : > { %v3202_v11 = vpop.eup %3201  ;;  %v1404_v13 = vadd.f32 %v3986_v56, %v1403_v35  ;;  %v1658_v16 = vmul.f32 %v4066_v46, %v1657_v60  ;;  %3203 = vrcp.f32 %v4308_v44  ;;  %2474 = vperm.xlu2 %3046, %v1923_v33   ;;  %v1667_v47 = vor.u32 1.1754944e-38, %v1666_v51  ;;  %v333_v35 = vld [vmem:[%s3507_s10 + $0x58] sm:$0xff] }
 0x124   : > { %vm1665_vm1 = vcmp.eq.f32.partialorder %v1664_v37, 8.507059e+37  ;;  %v2973_v38 = vmul.f32 -1.442695, %v687_v50  ;;  %3205 = vrcp.f32 %v4338_v31  ;;  %v738_v62 = vadd.f32 %v737_v53, %v365_v0  ;;  %v349_v50 = vld [vmem:[%s3507_s10 + $0xd8] sm:$0xff] }
 0x125   : > { %v1408_v1 = vsel %vm4347_vm14, %v3986_v56, %v1404_v13  ;;  %v1659_v28 = vadd.f32 %v4066_v46, %v1658_v16  ;;  %v789_v10 = vadd.f32 %v788_v63, %v382_v15  ;;  %v1416_v21 = vmul.f32 %v4151_v39, %v4092_v27 }
 0x126   : > { %v1413_v29 = vsel %vm1410_vm15, %v1412_v36, %v1408_v1  ;;  %3207 = vpow2.f32 %v2973_v38  ;;  %v2990_v56 = vmul.f32 -1.442695, %v738_v62  ;;  %vm1420_vm2 = vweird.f32 %v4092_v27  ;;  %v641_v36 = vpop.f32.mrf.mxu0 }
 0x127   : > { %2304 = vperm.xlu1 %3045, %v1413_v29   ;;  %v1663_v14 = vsel %vm4360_vm0, %v4066_v46, %v1659_v28  ;;  %vm1421_vm3 = vweird.f32 %v4151_v39  ;;  %v1417_v18 = vsub.f32 1.0, %v1416_v21  ;;  %v1424_v43 = vand.u32 2147483647, %v4092_v27 }
 0x128   : > { %v1668_v12 = vsel %vm1665_vm1, %v1667_v47, %v1663_v14  ;;  %v1426_v19 = vand.u32 2147483648, %v4092_v27  ;;  %v1176_v46 = vmul.f32 %v4063_v45, %v4011_v4  ;;  %v4383_v48 = vadd.f32 1.0, %v3200_v59  ;;  %vm4397_vm6 = vmor %vm1420_vm2, %vm1421_vm3 }
 0x129   : > { %2389 = vperm.xlu0 %3044, %v1668_v12   ;;  %v4381_v20 = vpop.eup %3203  ;;  %v4385_v3 = vadd.f32 1.0, %v3202_v11  ;;  %3209 = vpow2.f32 %v2990_v56  ;;  %v1418_v23 = vmul.f32 %v4151_v39, %v1417_v18  ;;  %vm1180_vm4 = vweird.f32 %v4011_v4  ;;  %v689_v11 = vpop.f32.mrf.mxu1  ;;  %v383_v56 = vld [vmem:[%s3507_s10 + $0x1e8] sm:$0xff] }
 0x12a   : > { %vm1181_vm5 = vweird.f32 %v4063_v45  ;;  %v1184_v22 = vand.u32 2147483647, %v4011_v4  ;;  %v4391_v26 = vpop.eup %3205  ;;  %v1427_v9 = vor.u32 1.1754944e-38, %v1426_v19  ;;  %v1177_v5 = vsub.f32 1.0, %v1176_v46  ;;  %v740_v47 = vpop.f32.mrf.mxu2 }
 0x12b   : > { %v1186_v30 = vand.u32 2147483648, %v4011_v4  ;;  %v1926_v54 = vmul.f32 %v4219_v2, %v4141_v58  ;;  %v3007_v37 = vmul.f32 -1.442695, %v789_v10  ;;  %v1419_v59 = vadd.f32 %v4151_v39, %v1418_v23  ;;  %vm4422_vm10 = vmor %vm1180_vm4, %vm1181_vm5  ;;  %v791_v18 = vpop.f32.mrf.mxu3 }
 0x12c   : > { %v3208_v60 = vpop.eup %3207  ;;  %vm4406_vm7 = vcmp.eq.f32.partialorder %v1424_v43, 8.507059e+37  ;;  %vm1930_vm8 = vweird.f32 %v4141_v58  ;;  %v1178_v7 = vmul.f32 %v4063_v45, %v1177_v5  ;;  %vm1931_vm9 = vweird.f32 %v4219_v2 }
 0x12d   : > { %v1927_v40 = vsub.f32 1.0, %v1926_v54  ;;  %v1934_v51 = vand.u32 2147483647, %v4141_v58  ;;  %v1423_v33 = vsel %vm4397_vm6, %v4151_v39, %v1419_v59  ;;  %v1187_v16 = vor.u32 1.1754944e-38, %v1186_v30  ;;  %vm4437_vm12 = vmor %vm1930_vm8, %vm1931_vm9 }
 0x12e   : > { %v1936_v0 = vand.u32 2147483648, %v4141_v58  ;;  %v642_v53 = vadd.f32 %v641_v36, %v333_v35  ;;  %v1428_v63 = vsel %vm4406_vm7, %v1427_v9, %v1423_v33  ;;  %v1179_v39 = vadd.f32 %v4063_v45, %v1178_v7 }
 0x12f   : > { %v3210_v15 = vpop.eup %3209  ;;  %vm1185_vm11 = vcmp.eq.f32.partialorder %v1184_v22, 8.507059e+37  ;;  %v1928_v1 = vmul.f32 %v4219_v2, %v1927_v40  ;;  %3211 = vrcp.f32 %v4383_v48  ;;  %2309 = vperm.xlu2 %3046, %v1428_v63   ;;  %v690_v38 = vadd.f32 %v689_v11, %v349_v50 }
 0x130   : > { %v1937_v28 = vor.u32 1.1754944e-38, %v1936_v0  ;;  %v1183_v29 = vsel %vm4422_vm10, %v4063_v45, %v1179_v39  ;;  %vm1935_vm13 = vcmp.eq.f32.partialorder %v1934_v51, 8.507059e+37  ;;  %v741_v14 = vadd.f32 %v740_v47, %v366_v49 }
 0x131   : > { %v1929_v62 = vadd.f32 %v4219_v2, %v1928_v1  ;;  %3213 = vrcp.f32 %v4385_v3  ;;  %v1188_v10 = vsel %vm1185_vm11, %v1187_v16, %v1183_v29  ;;  %v2958_v21 = vmul.f32 -1.442695, %v642_v53  ;;  %v335_v1 = vld [vmem:[%s3507_s10 + $0x68] sm:$0xff] }
 0x132   : > { %3215 = vpow2.f32 %v3007_v37  ;;  %2229 = vperm.xlu1 %3045, %v1188_v10   ;;  %v2974_v12 = vmul.f32 -1.442695, %v690_v38  ;;  %v1191_v45 = vmul.f32 %v4229_v8, %v4181_v41  ;;  %v4452_v43 = vadd.f32 1.0, %v3208_v60  ;;  %v644_v38 = vpop.f32.mrf.mxu0 }
 0x133   : > { %v1933_v58 = vsel %vm4437_vm12, %v4219_v2, %v1929_v62  ;;  %v4454_v19 = vadd.f32 1.0, %v3210_v15  ;;  %v2991_v23 = vmul.f32 -1.442695, %v741_v14  ;;  %vm1195_vm14 = vweird.f32 %v4181_v41 }
 0x134   : > { %v1938_v46 = vsel %vm1935_vm13, %v1937_v28, %v1933_v58  ;;  %v1192_v22 = vsub.f32 1.0, %v1191_v45  ;;  %vm1196_vm15 = vweird.f32 %v4229_v8  ;;  %v1199_v2 = vand.u32 2147483647, %v4181_v41  ;;  %v334_v28 = vld [vmem:[%s3507_s10 + $0x60] sm:$0xff] }
 0x135   : > { %2479 = vperm.xlu0 %3044, %v1938_v46   ;;  %v4459_v6 = vpop.eup %3211  ;;  %3217 = vpow2.f32 %v2958_v21  ;;  %v792_v9 = vadd.f32 %v791_v18, %v383_v56  ;;  %v1201_v5 = vand.u32 2147483648, %v4181_v41  ;;  %v1671_v30 = vmul.f32 %v4161_v17, %v4114_v55  ;;  %vm4469_vm2 = vmor %vm1195_vm14, %vm1196_vm15  ;;  %v692_v56 = vpop.f32.mrf.mxu1 }
 0x136   : > { %3219 = vpow2.f32 %v2974_v12  ;;  %v1193_v54 = vmul.f32 %v4229_v8, %v1192_v22  ;;  %vm1675_vm0 = vweird.f32 %v4114_v55  ;;  %vm1676_vm1 = vweird.f32 %v4161_v17  ;;  %v350_v12 = vld [vmem:[%s3507_s10 + $0xe0] sm:$0xff] }
 0x137   : > { %v4467_v35 = vpop.eup %3213  ;;  %v1202_v60 = vor.u32 1.1754944e-38, %v1201_v5  ;;  %v1672_v37 = vsub.f32 1.0, %v1671_v30  ;;  %v1679_v41 = vand.u32 2147483647, %v4114_v55  ;;  %v1681_v59 = vand.u32 2147483648, %v4114_v55  ;;  %vm4488_vm6 = vmor %vm1675_vm0, %vm1676_vm1  ;;  %v367_v30 = vld [vmem:[%s3507_s10 + $0x168] sm:$0xff] }
 0x138   : > { %v3216_v27 = vpop.eup %3215  ;;  %3221 = vpow2.f32 %v2991_v23  ;;  %v1194_v7 = vadd.f32 %v4229_v8, %v1193_v54  ;;  %vm1200_vm3 = vcmp.eq.f32.partialorder %v1199_v2, 8.507059e+37  ;;  %v1431_v40 = vmul.f32 %v4268_v57, %v4193_v42  ;;  %v743_v54 = vpop.f32.mrf.mxu2 }
 0x139   : > { %v1673_v51 = vmul.f32 %v4161_v17, %v1672_v37  ;;  %v1682_v50 = vor.u32 1.1754944e-38, %v1681_v59  ;;  %vm1435_vm4 = vweird.f32 %v4193_v42  ;;  %vm1436_vm5 = vweird.f32 %v4268_v57 }
 0x13a   : > { %v1198_v11 = vsel %vm4469_vm2, %v4229_v8, %v1194_v7  ;;  %v1432_v13 = vsub.f32 1.0, %v1431_v40  ;;  %v1439_v16 = vand.u32 2147483647, %v4193_v42  ;;  %v1441_v0 = vand.u32 2147483648, %v4193_v42  ;;  %vm4507_vm8 = vmor %vm1435_vm4, %vm1436_vm5 }
 0x13b   : > { %v3218_v53 = vpop.eup %3217  ;;  %v4494_v49 = vadd.f32 1.0, %v3216_v27  ;;  %v1203_v47 = vsel %vm1200_vm3, %v1202_v60, %v1198_v11  ;;  %v1674_v8 = vadd.f32 %v4161_v17, %v1673_v51  ;;  %vm1680_vm7 = vcmp.eq.f32.partialorder %v1679_v41, 8.507059e+37 }
 0x13c   : > { %v3220_v15 = vpop.eup %3219  ;;  %3223 = vrcp.f32 %v4452_v43  ;;  %v3008_v55 = vmul.f32 -1.442695, %v792_v9  ;;  %2234 = vperm.xlu2 %3046, %v1203_v47   ;;  %v1433_v63 = vmul.f32 %v4268_v57, %v1432_v13  ;;  %v1442_v4 = vor.u32 1.1754944e-38, %v1441_v0 }
 0x13d   : > { %3225 = vrcp.f32 %v4454_v19  ;;  %v1678_v39 = vsel %vm4488_vm6, %v4161_v17, %v1674_v8  ;;  %v4512_v62 = vadd.f32 1.0, %v3218_v53  ;;  %vm1440_vm9 = vcmp.eq.f32.partialorder %v1439_v16, 8.507059e+37 }
 0x13e   : > { %v3222_v29 = vpop.eup %3221  ;;  %v1683_v14 = vsel %vm1680_vm7, %v1682_v50, %v1678_v39  ;;  %v1434_v10 = vadd.f32 %v4268_v57, %v1433_v63  ;;  %3227 = vrcp.f32 %v4494_v49  ;;  %v1686_v17 = vmul.f32 %v4381_v20, %v4308_v44  ;;  %v4552_v50 = vpop.permute.xlu2 %2444 }
 0x13f   : > { %2394 = vperm.xlu1 %3045, %v1683_v14   ;;  %v4518_v42 = vadd.f32 1.0, %v3220_v15  ;;  %3229 = vpow2.f32 %v3008_v55  ;;  %v645_v58 = vadd.f32 %v644_v38, %v334_v28  ;;  %vm1690_vm10 = vweird.f32 %v4308_v44  ;;  %6386 = vst [vmem:[#allocation2_spill] sm:$0xff] %v4552_v50 }
 0x140   : > { %v1438_v21 = vsel %vm4507_vm8, %v4268_v57, %v1434_v10  ;;  %v1687_v45 = vsub.f32 1.0, %v1686_v17  ;;  %vm1691_vm11 = vweird.f32 %v4381_v20  ;;  %3231 = vrcp.f32 %v4512_v62 }
 0x141   : > { %v1443_v18 = vsel %vm1440_vm9, %v1442_v4, %v1438_v21  ;;  %v1694_v23 = vand.u32 2147483647, %v4308_v44  ;;  %v1696_v22 = vand.u32 2147483648, %v4308_v44  ;;  %v1941_v57 = vmul.f32 %v4306_v61, %v4208_v52  ;;  %vm4542_vm13 = vmor %vm1690_vm10, %vm1691_vm11  ;;  %v647_v4 = vpop.f32.mrf.mxu0 }
 0x142   : > { %v4526_v46 = vpop.eup %3223  ;;  %2314 = vperm.xlu0 %3044, %v1443_v18   ;;  %v4535_v9 = vadd.f32 1.0, %v3222_v29  ;;  %v693_v5 = vadd.f32 %v692_v56, %v350_v12  ;;  %v1688_v36 = vmul.f32 %v4381_v20, %v1687_v45  ;;  %vm1945_vm12 = vweird.f32 %v4208_v52  ;;  %v695_v12 = vpop.f32.mrf.mxu1 }
 0x143   : > { %v4533_v2 = vpop.eup %3225  ;;  %v1697_v37 = vor.u32 1.1754944e-38, %v1696_v22  ;;  %v1942_v41 = vsub.f32 1.0, %v1941_v57  ;;  %vm1946_vm14 = vweird.f32 %v4306_v61  ;;  %v1949_v59 = vand.u32 2147483647, %v4208_v52  ;;  %v368_v22 = vld [vmem:[%s3507_s10 + $0x170] sm:$0xff]  ;;  %v746_v57 = vpop.f32.mrf.mxu2 }
 0x144   : > { %v4548_v27 = vpop.eup %3227  ;;  %v2959_v7 = vmul.f32 -1.442695, %v645_v58  ;;  %v1689_v40 = vadd.f32 %v4381_v20, %v1688_v36  ;;  %vm1695_vm15 = vcmp.eq.f32.partialorder %v1694_v23, 8.507059e+37  ;;  %v1951_v51 = vand.u32 2147483648, %v4208_v52  ;;  %vm4566_vm1 = vmor %vm1945_vm12, %vm1946_vm14  ;;  %v351_v58 = vld [vmem:[%s3507_s10 + $0xe8] sm:$0xff] }
 0x145   : > { %v3230_v44 = vpop.eup %3229  ;;  %v744_v11 = vadd.f32 %v743_v54, %v367_v30  ;;  %v1943_v33 = vmul.f32 %v4306_v61, %v1942_v41  ;;  %vm4555_vm0 = vcmp.eq.f32.partialorder %v1949_v59, 8.507059e+37  ;;  %v1206_v16 = vmul.f32 %v4313_v24, %v4253_v25 }
 0x146   : > { %v1693_v0 = vsel %vm4542_vm13, %v4381_v20, %v1689_v40  ;;  %v1952_v47 = vor.u32 1.1754944e-38, %v1951_v51  ;;  %vm1210_vm2 = vweird.f32 %v4253_v25  ;;  %vm1211_vm3 = vweird.f32 %v4313_v24  ;;  %v4572_v8 = vpop.eup %3231  ;;  %v4610_v36 = vpop.permute.xlu2 %2279 }
 0x147   : > { %v1698_v15 = vsel %vm1695_vm15, %v1697_v37, %v1693_v0  ;;  %v1944_v55 = vadd.f32 %v4306_v61, %v1943_v33  ;;  %v1207_v63 = vsub.f32 1.0, %v1206_v16  ;;  %v1214_v39 = vand.u32 2147483647, %v4253_v25  ;;  %vm4590_vm4 = vmor %vm1210_vm2, %vm1211_vm3  ;;  %6393 = vst [vmem:[#allocation3_spill] sm:$0xff] %v4610_v36 }
 0x148   : > { %3233 = vrcp.f32 %v4518_v42  ;;  %v2975_v52 = vmul.f32 -1.442695, %v693_v5  ;;  %2399 = vperm.xlu2 %3046, %v1698_v15   ;;  %v1216_v20 = vand.u32 2147483648, %v4253_v25  ;;  %v2992_v17 = vmul.f32 -1.442695, %v744_v11 }
 0x149   : > { %3235 = vrcp.f32 %v4535_v9  ;;  %v1948_v28 = vsel %vm4566_vm1, %v4306_v61, %v1944_v55  ;;  %v1208_v38 = vmul.f32 %v4313_v24, %v1207_v63  ;;  %vm1215_vm5 = vcmp.eq.f32.partialorder %v1214_v39, 8.507059e+37  ;;  %v384_v39 = vld [vmem:[%s3507_s10 + $0x1f0] sm:$0xff] }
 0x14a   : > { %3237 = vpow2.f32 %v2959_v7  ;;  %v1953_v29 = vsel %vm4555_vm0, %v1952_v47, %v1948_v28  ;;  %v1217_v10 = vor.u32 1.1754944e-38, %v1216_v20  ;;  %v648_v21 = vadd.f32 %v647_v4, %v335_v1 }
 0x14b   : > { %2484 = vperm.xlu1 %3045, %v1953_v29   ;;  %v1209_v61 = vadd.f32 %v4313_v24, %v1208_v38  ;;  %3239 = vpow2.f32 %v2975_v52  ;;  %v1956_v56 = vmul.f32 %v4467_v35, %v4385_v3  ;;  %vm1960_vm6 = vweird.f32 %v4385_v3  ;;  %v794_v52 = vpop.f32.mrf.mxu3 }
 0x14c   : > { %vm1961_vm7 = vweird.f32 %v4467_v35  ;;  %v1964_v18 = vand.u32 2147483647, %v4385_v3  ;;  %v1966_v30 = vand.u32 2147483648, %v4385_v3  ;;  %v1446_v54 = vmul.f32 %v4331_v32, %v4270_v34 }
 0x14d   : > { %v1213_v25 = vsel %vm4590_vm4, %v4313_v24, %v1209_v61  ;;  %v1957_v5 = vsub.f32 1.0, %v1956_v56  ;;  %v4614_v60 = vadd.f32 1.0, %v3230_v44  ;;  %3241 = vpow2.f32 %v2992_v17  ;;  %vm4623_vm10 = vmor %vm1960_vm6, %vm1961_vm7 }
 0x14e   : > { %v4604_v45 = vpop.eup %3233  ;;  %v1218_v23 = vsel %vm1215_vm5, %v1217_v10, %v1213_v25  ;;  %v2960_v37 = vmul.f32 -1.442695, %v648_v21  ;;  %v696_v41 = vadd.f32 %v695_v12, %v351_v58  ;;  %v1447_v40 = vsub.f32 1.0, %v1446_v54  ;;  %v336_v21 = vld [vmem:[%s3507_s10 + $0x70] sm:$0xff]  ;;  %v650_v58 = vpop.f32.mrf.mxu0 }
 0x14f   : > { %v4612_v24 = vpop.eup %3235  ;;  %2239 = vperm.xlu0 %3044, %v1218_v23   ;;  %v1958_v7 = vmul.f32 %v4467_v35, %v1957_v5  ;;  %vm1450_vm8 = vweird.f32 %v4270_v34  ;;  %vm1451_vm9 = vweird.f32 %v4331_v32  ;;  %v747_v51 = vadd.f32 %v746_v57, %v368_v22  ;;  %v4674_v23 = vpop.permute.xlu2 %2369 }
 0x150   : > { %v3238_v59 = vpop.eup %3237  ;;  %v1967_v11 = vor.u32 1.1754944e-38, %v1966_v30  ;;  %v1454_v33 = vand.u32 2147483647, %v4270_v34  ;;  %v1456_v13 = vand.u32 2147483648, %v4270_v34  ;;  %vm4630_vm11 = vcmp.eq.f32.partialorder %v1964_v18, 8.507059e+37  ;;  %vm4639_vm12 = vmor %vm1450_vm8, %vm1451_vm9  ;;  %6404 = vst [vmem:[#allocation4_spill] sm:$0xff] %v4674_v23 }
 0x151   : > { %v3240_v16 = vpop.eup %3239  ;;  %v1959_v0 = vadd.f32 %v4467_v35, %v1958_v7  ;;  %v1448_v47 = vmul.f32 %v4331_v32, %v1447_v40  ;;  %v1701_v3 = vmul.f32 %v4459_v6, %v4383_v48  ;;  %v4637_v15 = vadd.f32 1.0, %v3238_v59  ;;  %v352_v30 = vld [vmem:[%s3507_s10 + $0xf0] sm:$0xff]  ;;  %v4684_v59 = vpop.permute.xlu0 %2194 }
 0x152   : > { %3243 = vpow2.f32 %v2960_v37  ;;  %vm4643_vm13 = vcmp.eq.f32.partialorder %v1454_v33, 8.507059e+37  ;;  %v1457_v63 = vor.u32 1.1754944e-38, %v1456_v13  ;;  %vm1705_vm14 = vweird.f32 %v4383_v48  ;;  %6405 = vst [vmem:[#allocation5_spill] sm:$0xff] %v4684_v59  ;;  %v749_v40 = vpop.f32.mrf.mxu2 }
 0x153   : > { %v1963_v20 = vsel %vm4623_vm10, %v4467_v35, %v1959_v0  ;;  %v1449_v1 = vadd.f32 %v4331_v32, %v1448_v47  ;;  %v1702_v4 = vsub.f32 1.0, %v1701_v3  ;;  %v3242_v28 = vpop.eup %3241  ;;  %v2976_v38 = vmul.f32 -1.442695, %v696_v41  ;;  %v369_v47 = vld [vmem:[%s3507_s10 + $0x178] sm:$0xff] }
 0x154   : > { %v1968_v29 = vsel %vm4630_vm11, %v1967_v11, %v1963_v20  ;;  %vm1706_vm15 = vweird.f32 %v4459_v6  ;;  %v1709_v14 = vand.u32 2147483647, %v4383_v48  ;;  %v2993_v10 = vmul.f32 -1.442695, %v747_v51 }
 0x155   : > { %2489 = vperm.xlu2 %3046, %v1968_v29   ;;  %v1453_v35 = vsel %vm4639_vm12, %v4331_v32, %v1449_v1  ;;  %v795_v17 = vadd.f32 %v794_v52, %v384_v39  ;;  %v1703_v61 = vmul.f32 %v4459_v6, %v1702_v4  ;;  %3245 = vrcp.f32 %v4614_v60  ;;  %vm4667_vm0 = vmor %vm1705_vm14, %vm1706_vm15  ;;  %v698_v32 = vpop.f32.mrf.mxu1 }
 0x156   : > { %v1458_v12 = vsel %vm4643_vm13, %v1457_v63, %v1453_v35  ;;  %v1711_v25 = vand.u32 2147483648, %v4383_v48  ;;  %3247 = vrcp.f32 %v4637_v15  ;;  %vm1710_vm1 = vcmp.eq.f32.partialorder %v1709_v14, 8.507059e+37 }
 0x157   : > { %2319 = vperm.xlu1 %3045, %v1458_v12   ;;  %v1704_v18 = vadd.f32 %v4459_v6, %v1703_v61  ;;  %3249 = vpow2.f32 %v2976_v38  ;;  %v651_v5 = vadd.f32 %v650_v58, %v336_v21  ;;  %v1461_v54 = vmul.f32 %v4526_v46, %v4452_v43  ;;  %v353_v61 = vld [vmem:[%s3507_s10 + $0xf8] sm:$0xff] }
 0x158   : > { %v3244_v22 = vpop.eup %3243  ;;  %v1712_v57 = vor.u32 1.1754944e-38, %v1711_v25  ;;  %v4679_v37 = vadd.f32 1.0, %v3240_v16  ;;  %3251 = vpow2.f32 %v2993_v10  ;;  %v3009_v48 = vmul.f32 -1.442695, %v795_v17 }
 0x159   : > { %v1708_v41 = vsel %vm4667_vm0, %v4459_v6, %v1704_v18  ;;  %v1462_v51 = vsub.f32 1.0, %v1461_v54  ;;  %vm1465_vm2 = vweird.f32 %v4452_v43  ;;  %vm1466_vm3 = vweird.f32 %v4526_v46  ;;  %v4743_v54 = vpop.permute.xlu0 %2359 }
 0x15a   : > { %v1713_v7 = vsel %vm1710_vm1, %v1712_v57, %v1708_v41  ;;  %v699_v44 = vadd.f32 %v698_v32, %v352_v30  ;;  %v1469_v11 = vand.u32 2147483647, %v4452_v43  ;;  %v1471_v33 = vand.u32 2147483648, %v4452_v43  ;;  %vm4704_vm4 = vmor %vm1465_vm2, %vm1466_vm3  ;;  %v4741_v30 = vpop.permute.xlu1 %2274  ;;  %6414 = vst [vmem:[#allocation8_spill] sm:$0xff] %v4743_v54 }
 0x15b   : > { %2404 = vperm.xlu0 %3044, %v1713_v7   ;;  %v1221_v13 = vmul.f32 %v4391_v26, %v4338_v31  ;;  %v4692_v6 = vpop.eup %3245  ;;  %v4694_v16 = vadd.f32 1.0, %v3242_v28  ;;  %v4696_v0 = vadd.f32 1.0, %v3244_v22  ;;  %v2961_v53 = vmul.f32 -1.442695, %v651_v5  ;;  %6413 = vst [vmem:[#allocation7_spill] sm:$0xff] %v4741_v30 }
 0x15c   : > { %v1463_v3 = vmul.f32 %v4526_v46, %v1462_v51  ;;  %v4700_v55 = vpop.eup %3247  ;;  %3253 = vpow2.f32 %v3009_v48  ;;  %v1472_v63 = vor.u32 1.1754944e-38, %v1471_v33  ;;  %vm1225_vm5 = vweird.f32 %v4338_v31  ;;  %v752_v51 = vpop.f32.mrf.mxu2 }
 0x15d   : > { %v1222_v39 = vsub.f32 1.0, %v1221_v13  ;;  %v3250_v52 = vpop.eup %3249  ;;  %vm1470_vm6 = vcmp.eq.f32.partialorder %v1469_v11, 8.507059e+37  ;;  %vm1226_vm7 = vweird.f32 %v4391_v26  ;;  %v1229_v1 = vand.u32 2147483647, %v4338_v31  ;;  %v701_v21 = vpop.f32.mrf.mxu1 }
 0x15e   : > { %v1464_v20 = vadd.f32 %v4526_v46, %v1463_v3  ;;  %v3252_v4 = vpop.eup %3251  ;;  %v2977_v28 = vmul.f32 -1.442695, %v699_v44  ;;  %v750_v43 = vadd.f32 %v749_v40, %v369_v47  ;;  %v1231_v29 = vand.u32 2147483648, %v4338_v31  ;;  %vm4717_vm8 = vmor %vm1225_vm5, %vm1226_vm7  ;;  %v370_v40 = vld [vmem:[%s3507_s10 + $0x180] sm:$0xff] }
 0x15f   : > { %v1223_v38 = vmul.f32 %v4391_v26, %v1222_v39  ;;  %3255 = vpow2.f32 %v2961_v53  ;;  %vm4721_vm9 = vcmp.eq.f32.partialorder %v1229_v1, 8.507059e+37  ;;  %v1971_v17 = vmul.f32 %v4548_v27, %v4494_v49  ;;  %v653_v1 = vpop.f32.mrf.mxu0 }
 0x160   : > { %v1468_v14 = vsel %vm4704_vm4, %v4526_v46, %v1464_v20  ;;  %v1232_v12 = vor.u32 1.1754944e-38, %v1231_v29  ;;  %vm1975_vm10 = vweird.f32 %v4494_v49  ;;  %v4730_v46 = vpop.permute.xlu2 %2459  ;;  %vm1976_vm11 = vweird.f32 %v4548_v27  ;;  %v337_v20 = vld [vmem:[%s3507_s10 + $0x78] sm:$0xff] }
 0x161   : > { %v1473_v58 = vsel %vm1470_vm6, %v1472_v63, %v1468_v14  ;;  %v1224_v31 = vadd.f32 %v4391_v26, %v1223_v38  ;;  %6412 = vst [vmem:[#allocation6_spill] sm:$0xff] %v4730_v46  ;;  %v1972_v56 = vsub.f32 1.0, %v1971_v17  ;;  %v1979_v25 = vand.u32 2147483647, %v4494_v49  ;;  %vm4756_vm12 = vmor %vm1975_vm10, %vm1976_vm11 }
 0x162   : > { %2324 = vperm.xlu2 %3046, %v1473_v58   ;;  %v1981_v32 = vand.u32 2147483648, %v4494_v49  ;;  %v3254_v18 = vpop.eup %3253  ;;  %3257 = vrcp.f32 %v4679_v37  ;;  %v4736_v22 = vadd.f32 1.0, %v3250_v52  ;;  %v702_v5 = vadd.f32 %v701_v21, %v353_v61  ;;  %v4786_v35 = vpop.permute.xlu1 %2364 }
 0x163   : > { %v1228_v57 = vsel %vm4717_vm8, %v4391_v26, %v1224_v31  ;;  %v4745_v48 = vadd.f32 1.0, %v3252_v4  ;;  %3259 = vpow2.f32 %v2977_v28  ;;  %v1973_v7 = vmul.f32 %v4548_v27, %v1972_v56  ;;  %6417 = vst [vmem:[#allocation9_spill] sm:$0xff] %v4786_v35 }
 0x164   : > { %v1233_v41 = vsel %vm4721_vm9, %v1232_v12, %v1228_v57  ;;  %3261 = vrcp.f32 %v4694_v16  ;;  %v2994_v44 = vmul.f32 -1.442695, %v750_v43  ;;  %v1982_v11 = vor.u32 1.1754944e-38, %v1981_v32  ;;  %v4815_v57 = vpop.permute.xlu0 %2199 }
 0x165   : > { %2244 = vperm.xlu1 %3045, %v1233_v41   ;;  %v3256_v33 = vpop.eup %3255  ;;  %3263 = vrcp.f32 %v4696_v0  ;;  %v1974_v13 = vadd.f32 %v4548_v27, %v1973_v7  ;;  %vm1980_vm13 = vcmp.eq.f32.partialorder %v1979_v25, 8.507059e+37  ;;  %v2978_v53 = vmul.f32 -1.442695, %v702_v5 }
 0x166   : > { %3265 = vrcp.f32 %v4736_v22  ;;  %v753_v47 = vadd.f32 %v752_v51, %v370_v40  ;;  %v4764_v49 = vadd.f32 1.0, %v3254_v18  ;;  %v1236_v34 = vmul.f32 %v4572_v8, %v4512_v62 }
 0x167   : > { %3267 = vrcp.f32 %v4745_v48  ;;  %v1978_v3 = vsel %vm4756_vm12, %v4548_v27, %v1974_v13  ;;  %vm1240_vm14 = vweird.f32 %v4512_v62  ;;  %vm1241_vm15 = vweird.f32 %v4572_v8 }
 0x168   : > { %v4771_v63 = vpop.eup %3257  ;;  %3269 = vpow2.f32 %v2994_v44  ;;  %v1983_v39 = vsel %vm1980_vm13, %v1982_v11, %v1978_v3  ;;  %v1237_v4 = vsub.f32 1.0, %v1236_v34  ;;  %v1244_v28 = vand.u32 2147483647, %v4512_v62  ;;  %v4788_v17 = vpop.permute.xlu2 %2214  ;;  %vm4810_vm2 = vmor %vm1240_vm14, %vm1241_vm15 }
 0x169   : > { %v3260_v52 = vpop.eup %3259  ;;  %2494 = vperm.xlu0 %3044, %v1983_v39   ;;  %v1246_v27 = vand.u32 2147483648, %v4512_v62  ;;  %v1716_v43 = vmul.f32 %v4533_v2, %v4454_v19  ;;  %v4783_v29 = vadd.f32 1.0, %v3256_v33  ;;  %3271 = vpow2.f32 %v2978_v53  ;;  %6418 = vst [vmem:[#allocation10_spill] sm:$0xff] %v4788_v17  ;;  %v2160_v33 = vld [vmem:[%s4802_s14 + $0x320] sm:$0xff] }
 0x16a   : > { %v4781_v38 = vpop.eup %3261  ;;  %v2995_v14 = vmul.f32 -1.442695, %v753_v47  ;;  %v1724_v10 = vand.u32 2147483647, %v4454_v19  ;;  %v1238_v21 = vmul.f32 %v4572_v8, %v1237_v4  ;;  %vm1720_vm0 = vweird.f32 %v4454_v19  ;;  %v755_v4 = vpop.f32.mrf.mxu2 }
 0x16b   : > { %v4790_v61 = vpop.eup %3263  ;;  %v1717_v58 = vsub.f32 1.0, %v1716_v43  ;;  %vm1721_vm1 = vweird.f32 %v4533_v2  ;;  %v4804_v12 = vadd.f32 1.0, %v3260_v52  ;;  %v654_v56 = vadd.f32 %v653_v1, %v337_v20  ;;  %v371_v1 = vld [vmem:[%s3507_s10 + $0x188] sm:$0xff] }
 0x16c   : > { %v4795_v31 = vpop.eup %3265  ;;  %v1247_v32 = vor.u32 1.1754944e-38, %v1246_v27  ;;  %v1726_v18 = vand.u32 2147483648, %v4454_v19  ;;  %v1239_v41 = vadd.f32 %v4572_v8, %v1238_v21  ;;  %vm4820_vm3 = vcmp.eq.f32.partialorder %v1244_v28, 8.507059e+37  ;;  %vm4831_vm4 = vmor %vm1720_vm0, %vm1721_vm1 }
 0x16d   : > { %v4817_v5 = vpop.eup %3267  ;;  %v1718_v62 = vmul.f32 %v4533_v2, %v1717_v58  ;;  %v1476_v40 = vmul.f32 %v4604_v45, %v4518_v42  ;;  %3273 = vpow2.f32 %v2995_v14  ;;  %vm4835_vm5 = vcmp.eq.f32.partialorder %v1724_v10, 8.507059e+37  ;;  %v385_v14 = vld [vmem:[%s3507_s10 + $0x1f8] sm:$0xff]  ;;  %v797_v10 = vpop.f32.mrf.mxu3 }
 0x16e   : > { %v3270_v51 = vpop.eup %3269  ;;  %v1727_v11 = vor.u32 1.1754944e-38, %v1726_v18  ;;  %vm1480_vm6 = vweird.f32 %v4518_v42  ;;  %v1243_v13 = vsel %vm4810_vm2, %v4572_v8, %v1239_v41  ;;  %vm1481_vm7 = vweird.f32 %v4604_v45  ;;  %v4881_v41 = vpop.permute.xlu1 %2204 }
 0x16f   : > { %v1719_v53 = vadd.f32 %v4533_v2, %v1718_v62  ;;  %v1477_v19 = vsub.f32 1.0, %v1476_v40  ;;  %v3272_v47 = vpop.eup %3271  ;;  %v2962_v3 = vmul.f32 -1.442695, %v654_v56  ;;  %v1248_v34 = vsel %vm4820_vm3, %v1247_v32, %v1243_v13  ;;  %vm4866_vm8 = vmor %vm1480_vm6, %vm1481_vm7  ;;  %6431 = vst [vmem:[#allocation13_spill] sm:$0xff] %v4881_v41  ;;  %v2094_v40 = vld [vmem:[%s4802_s14 + $0x110] sm:$0xff] }
 0x170   : > { %v1484_v39 = vand.u32 2147483647, %v4518_v42  ;;  %v1486_v52 = vand.u32 2147483648, %v4518_v42  ;;  %3275 = vrcp.f32 %v4764_v49  ;;  %2249 = vperm.xlu2 %3046, %v1248_v34   ;;  %v4857_v28 = vmul.f32 %v4552_v50, %v2160_v33  ;;  %v4879_v18 = vpop.permute.xlu2 %2294  ;;  %v4891_v33 = vpop.permute.xlu0 %2449  ;;  %v5075_v50 = vld [vmem:[%s4802_s14 + $0x8] sm:$0xff] }
 0x171   : > { %v1723_v8 = vsel %vm4831_vm4, %v4533_v2, %v1719_v53  ;;  %v1478_v20 = vmul.f32 %v4604_v45, %v1477_v19  ;;  %3277 = vrcp.f32 %v4783_v29  ;;  %v4872_v21 = vadd.f32 1.0, %v3270_v51  ;;  %6454 = vst [vmem:[#allocation22_spill] sm:$0xff] %v5075_v50  ;;  %v5115_v50 = vld [vmem:[%s4802_s14 + $0x28] sm:$0xff] }
 0x172   : > { %v1728_v27 = vsel %vm4835_vm5, %v1727_v11, %v1723_v8  ;;  %v1487_v2 = vor.u32 1.1754944e-38, %v1486_v52  ;;  %3279 = vrcp.f32 %v4804_v12  ;;  %vm1485_vm9 = vcmp.eq.f32.partialorder %v1484_v39, 8.507059e+37  ;;  %6463 = vst [vmem:[#allocation29_spill] sm:$0xff] %v5115_v50  ;;  %v5149_v50 = vld [vmem:[%s4802_s14 + $0x268] sm:$0xff] }
 0x173   : > { %6429 = vst [vmem:[#allocation11_spill] sm:$0xff] %v4872_v21  ;;  %2409 = vperm.xlu1 %3045, %v1728_v27   ;;  %v1479_v58 = vadd.f32 %v4604_v45, %v1478_v20  ;;  %v3274_v56 = vpop.eup %3273  ;;  %v4875_v25 = vadd.f32 1.0, %v3272_v47  ;;  %3281 = vpow2.f32 %v2962_v3  ;;  %v756_v42 = vadd.f32 %v755_v4, %v371_v1 }
 0x174   : > { %v1731_v32 = vmul.f32 %v4612_v24, %v4535_v9  ;;  %v798_v62 = vadd.f32 %v797_v10, %v385_v14  ;;  %vm1735_vm10 = vweird.f32 %v4535_v9  ;;  %vm1736_vm11 = vweird.f32 %v4612_v24  ;;  %6468 = vst [vmem:[#allocation34_spill] sm:$0xff] %v5149_v50  ;;  %v5170_v50 = vld [vmem:[%s4802_s14 + $0x130] sm:$0xff] }
 0x175   : > { %6430 = vst [vmem:[#allocation12_spill] sm:$0xff] %v4875_v25  ;;  %v1483_v7 = vsel %vm4866_vm8, %v4604_v45, %v1479_v58  ;;  %v1739_v26 = vand.u32 2147483647, %v4535_v9  ;;  %v1741_v11 = vand.u32 2147483648, %v4535_v9  ;;  %v4896_v53 = vmul.f32 %v4610_v36, %v2094_v40  ;;  %vm4915_vm12 = vmor %vm1735_vm10, %vm1736_vm11  ;;  %v2060_v40 = vld [vmem:[%s4802_s14] sm:$0xff]  ;;  %v5112_v36 = vld [vmem:[%s4802_s14 + $0x148] sm:$0xff] }
 0x176   : > { %v1488_v51 = vsel %vm1485_vm9, %v1487_v2, %v1483_v7  ;;  %v1732_v44 = vsub.f32 1.0, %v1731_v32  ;;  %v4893_v13 = vpop.eup %3275  ;;  %3283 = vrcp.f32 %v4872_v21  ;;  %v4899_v45 = vadd.f32 1.0, %v3274_v56  ;;  %v2130_v7 = vld [vmem:[%s4802_s14 + $0x230] sm:$0xff]  ;;  %v4959_v8 = vpop.permute.xlu1 %2454  ;;  %6462 = vst [vmem:[#allocation28_spill] sm:$0xff] %v5112_v36  ;;  %v5134_v36 = vld [vmem:[%s4802_s14 + $0x340] sm:$0xff] }
 0x177   : > { %2329 = vperm.xlu0 %3044, %v1488_v51   ;;  %v1986_v19 = vmul.f32 %v4692_v6, %v4614_v60  ;;  %v4903_v47 = vpop.eup %3277  ;;  %3285 = vrcp.f32 %v4875_v25  ;;  %v1994_v34 = vand.u32 2147483647, %v4614_v60  ;;  %v1996_v39 = vand.u32 2147483648, %v4614_v60  ;;  %6474 = vst [vmem:[#allocation40_spill] sm:$0xff] %v5170_v50  ;;  %v5173_v25 = vld [vmem:[%s4802_s14 + $0x138] sm:$0xff]  ;;  %v5386_v21 = vld [vmem:[%s4802_s14 + $0xd0] sm:$0xff] }
 0x178   : > { %6432 = vst [vmem:[#allocation14_spill] sm:$0xff] %v4899_v45  ;;  %v1733_v3 = vmul.f32 %v4612_v24, %v1732_v44  ;;  %v4909_v52 = vpop.eup %3279  ;;  %v1742_v20 = vor.u32 1.1754944e-38, %v1741_v11  ;;  %vm1990_vm13 = vweird.f32 %v4614_v60  ;;  %vm1991_vm14 = vweird.f32 %v4692_v6  ;;  %v5191_v50 = vld [vmem:[%s4802_s14 + $0x258] sm:$0xff] }
 0x179   : > { %v1987_v1 = vsub.f32 1.0, %v1986_v19  ;;  %v3282_v4 = vpop.eup %3281  ;;  %v2996_v27 = vmul.f32 -1.442695, %v756_v42  ;;  %v3010_v43 = vmul.f32 -1.442695, %v798_v62  ;;  %vm1740_vm15 = vcmp.eq.f32.partialorder %v1739_v26, 8.507059e+37  ;;  %vm4932_vm1 = vmor %vm1990_vm13, %vm1991_vm14 }
 0x17a   : > { %v1734_v2 = vadd.f32 %v4612_v24, %v1733_v3  ;;  %vm4923_vm0 = vcmp.eq.f32.partialorder %v1994_v34, 8.507059e+37  ;;  %v1997_v10 = vor.u32 1.1754944e-38, %v1996_v39  ;;  %v1251_v60 = vmul.f32 %v4700_v55, %v4637_v15  ;;  %v2092_v62 = vld [vmem:[%s4802_s14 + $0x100] sm:$0xff]  ;;  %v4957_v39 = vpop.permute.xlu2 %2219  ;;  %6475 = vst [vmem:[#allocation41_spill] sm:$0xff] %v5173_v25  ;;  %v5194_v25 = vld [vmem:[%s4802_s14 + $0x150] sm:$0xff] }
 0x17b   : > { %v1988_v9 = vmul.f32 %v4692_v6, %v1987_v1  ;;  %vm1255_vm2 = vweird.f32 %v4637_v15  ;;  %vm1256_vm3 = vweird.f32 %v4700_v55  ;;  %v1261_v42 = vand.u32 2147483648, %v4637_v15  ;;  %6481 = vst [vmem:[#allocation47_spill] sm:$0xff] %v5191_v50  ;;  %v5212_v50 = vld [vmem:[%s4802_s14 + $0x60] sm:$0xff] }
 0x17c   : > { %v1738_v58 = vsel %vm4915_vm12, %v4612_v24, %v1734_v2  ;;  %v4939_v32 = vpop.eup %3283  ;;  %v1252_v26 = vsub.f32 1.0, %v1251_v60  ;;  %v1259_v24 = vand.u32 2147483647, %v4637_v15  ;;  %v4949_v19 = vmul.f32 %v4674_v23, %v2130_v7  ;;  %vm4974_vm4 = vmor %vm1255_vm2, %vm1256_vm3  ;;  %v2166_v15 = vld [vmem:[%s4802_s14 + $0x350] sm:$0xff]  ;;  %v5084_v23 = vld [vmem:[%s4802_s14 + $0x228] sm:$0xff]  ;;  %6482 = vst [vmem:[#allocation48_spill] sm:$0xff] %v5194_v25 }
 0x17d   : > { %6439 = vst [vmem:[#allocation15_spill] sm:$0xff] %v4939_v32  ;;  %v1743_v51 = vsel %vm1740_vm15, %v1742_v20, %v1738_v58  ;;  %v1989_v44 = vadd.f32 %v4692_v6, %v1988_v9  ;;  %v4946_v11 = vpop.eup %3285  ;;  %v4952_v3 = vmul.f32 %v4741_v30, %v2092_v62  ;;  %v4955_v34 = vmul.f32 %v4684_v59, %v2060_v40  ;;  %v4980_v58 = vpop.permute.xlu0 %2284  ;;  %v2126_v40 = vld [vmem:[%s4802_s14 + $0x210] sm:$0xff]  ;;  %v5066_v59 = vld [vmem:[%s4802_s14 + $0x118] sm:$0xff]  ;;  %v5179_v32 = vld [vmem:[%s4802_s14 + $0x368] sm:$0xff] }
 0x17e   : > { %6440 = vst [vmem:[#allocation16_spill] sm:$0xff] %v4946_v11  ;;  %3287 = vpow2.f32 %v2996_v27  ;;  %2414 = vperm.xlu2 %3046, %v1743_v51   ;;  %v4962_v20 = vadd.f32 1.0, %v3282_v4  ;;  %v1253_v2 = vmul.f32 %v4700_v55, %v1252_v26  ;;  %v1262_v4 = vor.u32 1.1754944e-38, %v1261_v42  ;;  %v5128_v30 = vld [vmem:[%s4802_s14 + $0x50] sm:$0xff]  ;;  %v5167_v11 = vld [vmem:[%s4802_s14 + $0x388] sm:$0xff] }
 0x17f   : > { %3289 = vrcp.f32 %v4899_v45  ;;  %v1993_v1 = vsel %vm4932_vm1, %v4692_v6, %v1989_v44  ;;  %v2001_v60 = vmul.f32 %v4893_v13, %v4764_v49  ;;  %vm1260_vm5 = vcmp.eq.f32.partialorder %v1259_v24, 8.507059e+37  ;;  %6451 = vst [vmem:[#allocation19_spill] sm:$0xff] %v5066_v59  ;;  %v5125_v59 = vld [vmem:[%s4802_s14 + $0x338] sm:$0xff]  ;;  %v5161_v45 = vld [vmem:[%s4802_s14 + $0x248] sm:$0xff] }
 0x180   : > { %3291 = vpow2.f32 %v3010_v43  ;;  %v1998_v27 = vsel %vm4923_vm0, %v1997_v10, %v1993_v1  ;;  %v1254_v6 = vadd.f32 %v4700_v55, %v1253_v2  ;;  %vm2005_vm6 = vweird.f32 %v4764_v49  ;;  %v2128_v2 = vld [vmem:[%s4802_s14 + $0x220] sm:$0xff]  ;;  %6457 = vst [vmem:[#allocation25_spill] sm:$0xff] %v5084_v23  ;;  %v5106_v23 = vpop.f32.mrf.mxu1  ;;  %v5215_v25 = vld [vmem:[%s4802_s14 + $0x68] sm:$0xff] }
 0x181   : > { %2499 = vperm.xlu1 %3045, %v1998_v27   ;;  %vm2006_vm7 = vweird.f32 %v4893_v13  ;;  %v2002_v43 = vsub.f32 1.0, %v2001_v60  ;;  %v2009_v14 = vand.u32 2147483647, %v4764_v49  ;;  %v2011_v10 = vand.u32 2147483648, %v4764_v49  ;;  %v2068_v49 = vld [vmem:[%s4802_s14 + $0x40] sm:$0xff]  ;;  %6464 = vst [vmem:[#allocation30_spill] sm:$0xff] %v5125_v59 }
 0x182   : > { %v1491_v56 = vmul.f32 %v4771_v63, %v4679_v37  ;;  %3293 = vrcp.f32 %v4962_v20  ;;  %v4992_v42 = vmul.f32 %v4730_v46, %v2166_v15  ;;  %v1258_v7 = vsel %vm4974_vm4, %v4700_v55, %v1254_v6  ;;  %vm5011_vm10 = vmor %vm2005_vm6, %vm2006_vm7  ;;  %v5069_v46 = vld [vmem:[%s4802_s14 + $0x238] sm:$0xff]  ;;  %v5146_v59 = vld [vmem:[%s4802_s14 + $0x260] sm:$0xff]  ;;  %6471 = vst [vmem:[#allocation37_spill] sm:$0xff] %v5161_v45 }
 0x183   : > { %vm1495_vm8 = vweird.f32 %v4679_v37  ;;  %v1263_v51 = vsel %vm1260_vm5, %v1262_v4, %v1258_v7  ;;  %v2003_v44 = vmul.f32 %v4893_v13, %v2002_v43  ;;  %vm1496_vm9 = vweird.f32 %v4771_v63  ;;  %v5034_v7 = vpop.permute.xlu2 %2384  ;;  %6452 = vst [vmem:[#allocation20_spill] sm:$0xff] %v5069_v46  ;;  %v5093_v46 = vld [vmem:[%s4802_s14 + $0x18] sm:$0xff]  ;;  %v5182_v45 = vld [vmem:[%s4802_s14 + $0x170] sm:$0xff]  ;;  %v5471_v43 = vld [vmem:[%s4802_s14 + $0x400] sm:$0xff] }
 0x184   : > { %v3288_v62 = vpop.eup %3287  ;;  %v1492_v26 = vsub.f32 1.0, %v1491_v56  ;;  %v5004_v1 = vmul.f32 %v4743_v54, %v2126_v40  ;;  %2254 = vperm.xlu0 %3044, %v1263_v51   ;;  %v5015_v27 = vor.u32 1.1754944e-38, %v2011_v10  ;;  %v1499_v9 = vand.u32 2147483647, %v4679_v37  ;;  %v2064_v56 = vld [vmem:[%s4802_s14 + $0x20] sm:$0xff]  ;;  %v5036_v40 = vpop.permute.xlu1 %2209  ;;  %vm5050_vm12 = vmor %vm1495_vm8, %vm1496_vm9  ;;  %6459 = vst [vmem:[#allocation27_spill] sm:$0xff] %v5093_v46 }
 0x185   : > { %v5001_v24 = vpop.eup %3289  ;;  %v1501_v4 = vand.u32 2147483648, %v4679_v37  ;;  %v5022_v6 = vmul.f32 %v4786_v35, %v2128_v2  ;;  %v5026_v15 = vadd.f32 %v4893_v13, %v2003_v44  ;;  %vm5028_vm11 = vcmp.eq.f32.partialorder %v2009_v14, 8.507059e+37  ;;  %v5044_v44 = vld [vmem:[%s3507_s10 + $0x200] sm:$0xff]  ;;  %v5072_v37 = vld [vmem:[%s4802_s14 + $0x108] sm:$0xff]  ;;  %v5090_v35 = vld [vmem:[%s4802_s14 + $0x10] sm:$0xff]  ;;  %6473 = vst [vmem:[#allocation39_spill] sm:$0xff] %v5167_v11 }
 0x186   : > { %6443 = vst [vmem:[#allocation17_spill] sm:$0xff] %v5001_v24  ;;  %v5019_v60 = vpop.eup %3291  ;;  %v1493_v10 = vmul.f32 %v4771_v63, %v1492_v26  ;;  %v5038_v51 = vadd.f32 1.0, %v3288_v62  ;;  %v5041_v14 = vmul.f32 %v4788_v17, %v2068_v49  ;;  %v5057_v54 = vld [vmem:[%s3507_s10 + $0x100] sm:$0xff]  ;;  %v5060_v62 = vmul.f32 %v4881_v41, %v2064_v56  ;;  %v5063_v49 = vld [vmem:[%s4802_s14 + $0x328] sm:$0xff]  ;;  %v5081_v56 = vld [vmem:[%s4802_s14 + $0x218] sm:$0xff] }
 0x187   : > { %v5054_v2 = vor.u32 1.1754944e-38, %v1501_v4  ;;  %6450 = vst [vmem:[#allocation18_spill] sm:$0xff] %v5063_v49  ;;  %v5078_v4 = vld [vmem:[%s4802_s14 + $0x358] sm:$0xff]  ;;  %v5087_v49 = vld [vmem:[%s4802_s14 + $0x48] sm:$0xff]  ;;  %vm5102_vm13 = vcmp.eq.f32.partialorder %v1499_v9, 8.507059e+37  ;;  %v5109_v46 = vld [vmem:[%s4802_s14 + $0x140] sm:$0xff]  ;;  %vm1750_vm14 = vweird.f32 %v4694_v16  ;;  %vm1751_vm15 = vweird.f32 %v4781_v38 }
 0x188   : > { %6453 = vst [vmem:[#allocation21_spill] sm:$0xff] %v5072_v37  ;;  %v5122_v9 = vld [vmem:[%s4802_s14 + $0x330] sm:$0xff]  ;;  %v5131_v37 = vld [vmem:[%s4802_s14 + $0x58] sm:$0xff]  ;;  %v5137_v17 = vld [vmem:[%s4802_s14 + $0x348] sm:$0xff]  ;;  %v1754_v55 = vand.u32 2147483647, %v4694_v16  ;;  %3295 = vrcp.f32 %v5038_v51  ;;  %v2562_v26 = vmul.f32 %v4879_v18, %v5109_v46  ;;  %vm1510_vm2 = vweird.f32 %v4736_v22 }
 0x189   : > { %6455 = vst [vmem:[#allocation23_spill] sm:$0xff] %v5078_v4  ;;  %v5143_v41 = vld [vmem:[%s4802_s14 + $0x128] sm:$0xff]  ;;  %v5155_v24 = vld [vmem:[%s4802_s14 + $0x38] sm:$0xff]  ;;  %v5188_v11 = vld [vmem:[%s4802_s14 + $0x250] sm:$0xff]  ;;  %vm1511_vm3 = vweird.f32 %v4795_v31  ;;  %vm1270_vm4 = vweird.f32 %v4696_v0  ;;  %vm1271_vm5 = vweird.f32 %v4790_v61 }
 0x18a   : > { %6456 = vst [vmem:[#allocation24_spill] sm:$0xff] %v5081_v56  ;;  %v5100_v56 = vadd.f32 %v4771_v63, %v1493_v10  ;;  %v5119_v10 = vmul.f32 %v4781_v38, %v4694_v16  ;;  %vm5488_vm0 = vcmp.eq.f32.partialorder %v1754_v55, 8.507059e+37  ;;  %vm5500_vm1 = vmor %vm1750_vm14, %vm1751_vm15  ;;  %vm1286_vm14 = vweird.f32 %v4903_v47 }
 0x18b   : > { %6458 = vst [vmem:[#allocation26_spill] sm:$0xff] %v5087_v49  ;;  %v5140_v49 = vld [vmem:[%s4802_s14 + $0x120] sm:$0xff]  ;;  %v5525_v55 = vpop.permute.xlu2 %2474  ;;  %vm5539_vm6 = vmor %vm1510_vm2, %vm1511_vm3 }
 0x18c   : > { %6465 = vst [vmem:[#allocation31_spill] sm:$0xff] %v5131_v37  ;;  %v5152_v37 = vld [vmem:[%s4802_s14 + $0x30] sm:$0xff]  ;;  %vm5563_vm8 = vmor %vm1270_vm4, %vm1271_vm5 }
 0x18d   : > { %6466 = vst [vmem:[#allocation32_spill] sm:$0xff] %v5137_v17  ;;  %v5158_v17 = vld [vmem:[%s4802_s14 + $0x240] sm:$0xff] }
 0x18e   : > { %6467 = vst [vmem:[#allocation33_spill] sm:$0xff] %v5143_v41  ;;  %v5164_v41 = vld [vmem:[%s4802_s14 + $0x380] sm:$0xff] }
 0x18f   : > { %6469 = vst [vmem:[#allocation35_spill] sm:$0xff] %v5155_v24  ;;  %v5176_v24 = vld [vmem:[%s4802_s14 + $0x360] sm:$0xff] }
 0x190   : > { %6470 = vst [vmem:[#allocation36_spill] sm:$0xff] %v5158_v17  ;;  %v5395_v17 = vld [vmem:[%s4802_s14 + $0x1e8] sm:$0xff] }
 0x191   : > { %6472 = vst [vmem:[#allocation38_spill] sm:$0xff] %v5164_v41  ;;  %v5185_v41 = vld [vmem:[%s4802_s14 + $0x178] sm:$0xff] }
 0x192   : > { %6476 = vst [vmem:[#allocation42_spill] sm:$0xff] %v5176_v24  ;;  %v5197_v24 = vld [vmem:[%s4802_s14 + $0x158] sm:$0xff] }
 0x193   : > { %6477 = vst [vmem:[#allocation43_spill] sm:$0xff] %v5179_v32  ;;  %v5200_v32 = vld [vmem:[%s4802_s14 + $0x80] sm:$0xff] }
 0x194   : > { %6478 = vst [vmem:[#allocation44_spill] sm:$0xff] %v5182_v45  ;;  %v5203_v45 = vld [vmem:[%s4802_s14 + $0x88] sm:$0xff] }
 0x195   : > { %6479 = vst [vmem:[#allocation45_spill] sm:$0xff] %v5185_v41  ;;  %v5206_v41 = vld [vmem:[%s4802_s14 + $0x370] sm:$0xff] }
 0x196   : > { %6480 = vst [vmem:[#allocation46_spill] sm:$0xff] %v5188_v11  ;;  %v5209_v11 = vld [vmem:[%s4802_s14 + $0x378] sm:$0xff] }
 0x197   : > { %6483 = vst [vmem:[#allocation49_spill] sm:$0xff] %v5197_v24  ;;  %v5218_v24 = vld [vmem:[%s4802_s14 + $0x290] sm:$0xff] }
 0x198   : > { %6484 = vst [vmem:[#allocation50_spill] sm:$0xff] %v5200_v32  ;;  %v5221_v32 = vld [vmem:[%s4802_s14 + $0x298] sm:$0xff] }
 0x199   : > { %6485 = vst [vmem:[#allocation51_spill] sm:$0xff] %v5203_v45  ;;  %v5224_v45 = vld [vmem:[%s4802_s14 + $0x160] sm:$0xff] }
 0x19a   : > { %6486 = vst [vmem:[#allocation52_spill] sm:$0xff] %v5206_v41  ;;  %v5227_v41 = vld [vmem:[%s4802_s14 + $0x168] sm:$0xff] }
 0x19b   : > { %6487 = vst [vmem:[#allocation53_spill] sm:$0xff] %v5209_v11  ;;  %v5230_v11 = vld [vmem:[%s4802_s14 + $0x270] sm:$0xff] }
 0x19c   : > { %6488 = vst [vmem:[#allocation54_spill] sm:$0xff] %v5212_v50  ;;  %v5233_v50 = vld [vmem:[%s4802_s14 + $0x278] sm:$0xff] }
 0x19d   : > { %6489 = vst [vmem:[#allocation55_spill] sm:$0xff] %v5215_v25  ;;  %v5236_v25 = vld [vmem:[%s4802_s14 + $0x3b0] sm:$0xff] }
 0x19e   : > { %6490 = vst [vmem:[#allocation56_spill] sm:$0xff] %v5218_v24  ;;  %v5239_v24 = vld [vmem:[%s4802_s14 + $0x3b8] sm:$0xff] }
 0x19f   : > { %6491 = vst [vmem:[#allocation57_spill] sm:$0xff] %v5221_v32  ;;  %v5242_v32 = vld [vmem:[%s4802_s14 + $0x70] sm:$0xff] }
 0x1a0   : > { %6492 = vst [vmem:[#allocation58_spill] sm:$0xff] %v5224_v45  ;;  %v5245_v45 = vld [vmem:[%s4802_s14 + $0x78] sm:$0xff] }
 0x1a1   : > { %6493 = vst [vmem:[#allocation59_spill] sm:$0xff] %v5227_v41  ;;  %v5248_v41 = vld [vmem:[%s4802_s14 + $0x390] sm:$0xff] }
 0x1a2   : > { %6494 = vst [vmem:[#allocation60_spill] sm:$0xff] %v5230_v11  ;;  %v5251_v11 = vld [vmem:[%s4802_s14 + $0x398] sm:$0xff] }
 0x1a3   : > { %6495 = vst [vmem:[#allocation61_spill] sm:$0xff] %v5233_v50  ;;  %v5254_v50 = vld [vmem:[%s4802_s14 + $0x1a0] sm:$0xff] }
 0x1a4   : > { %6496 = vst [vmem:[#allocation62_spill] sm:$0xff] %v5236_v25  ;;  %v5257_v25 = vld [vmem:[%s4802_s14 + $0x1a8] sm:$0xff] }
 0x1a5   : > { %6497 = vst [vmem:[#allocation63_spill] sm:$0xff] %v5239_v24  ;;  %v5260_v24 = vld [vmem:[%s4802_s14 + $0x280] sm:$0xff] }
 0x1a6   : > { %6498 = vst [vmem:[#allocation64_spill] sm:$0xff] %v5242_v32  ;;  %v5263_v32 = vld [vmem:[%s4802_s14 + $0x288] sm:$0xff] }
 0x1a7   : > { %6499 = vst [vmem:[#allocation65_spill] sm:$0xff] %v5245_v45  ;;  %v5266_v45 = vld [vmem:[%s4802_s14 + $0x180] sm:$0xff] }
 0x1a8   : > { %6500 = vst [vmem:[#allocation66_spill] sm:$0xff] %v5248_v41  ;;  %v5269_v41 = vld [vmem:[%s4802_s14 + $0x188] sm:$0xff] }
 0x1a9   : > { %6501 = vst [vmem:[#allocation67_spill] sm:$0xff] %v5251_v11  ;;  %v5272_v11 = vld [vmem:[%s4802_s14 + $0xb0] sm:$0xff] }
 0x1aa   : > { %6502 = vst [vmem:[#allocation68_spill] sm:$0xff] %v5254_v50  ;;  %v5275_v50 = vld [vmem:[%s4802_s14 + $0xb8] sm:$0xff] }
 0x1ab   : > { %6503 = vst [vmem:[#allocation69_spill] sm:$0xff] %v5257_v25  ;;  %v5278_v25 = vld [vmem:[%s4802_s14 + $0x3a0] sm:$0xff] }
 0x1ac   : > { %6504 = vst [vmem:[#allocation70_spill] sm:$0xff] %v5260_v24  ;;  %v5281_v24 = vld [vmem:[%s4802_s14 + $0x3a8] sm:$0xff] }
 0x1ad   : > { %6505 = vst [vmem:[#allocation71_spill] sm:$0xff] %v5263_v32  ;;  %v5284_v32 = vld [vmem:[%s4802_s14 + $0x90] sm:$0xff] }
 0x1ae   : > { %6506 = vst [vmem:[#allocation72_spill] sm:$0xff] %v5266_v45  ;;  %v5287_v45 = vld [vmem:[%s4802_s14 + $0x98] sm:$0xff] }
 0x1af   : > { %6507 = vst [vmem:[#allocation73_spill] sm:$0xff] %v5269_v41  ;;  %v5290_v41 = vld [vmem:[%s4802_s14 + $0x2c0] sm:$0xff] }
 0x1b0   : > { %6508 = vst [vmem:[#allocation74_spill] sm:$0xff] %v5272_v11  ;;  %v5293_v11 = vld [vmem:[%s4802_s14 + $0x2c8] sm:$0xff] }
 0x1b1   : > { %6509 = vst [vmem:[#allocation75_spill] sm:$0xff] %v5275_v50  ;;  %v5296_v50 = vld [vmem:[%s4802_s14 + $0x190] sm:$0xff] }
 0x1b2   : > { %6510 = vst [vmem:[#allocation76_spill] sm:$0xff] %v5278_v25  ;;  %v5299_v25 = vld [vmem:[%s4802_s14 + $0x198] sm:$0xff] }
 0x1b3   : > { %6511 = vst [vmem:[#allocation77_spill] sm:$0xff] %v5281_v24  ;;  %v5302_v24 = vld [vmem:[%s4802_s14 + $0x2a0] sm:$0xff] }
 0x1b4   : > { %6512 = vst [vmem:[#allocation78_spill] sm:$0xff] %v5284_v32  ;;  %v5305_v32 = vld [vmem:[%s4802_s14 + $0x2a8] sm:$0xff] }
 0x1b5   : > { %6513 = vst [vmem:[#allocation79_spill] sm:$0xff] %v5287_v45  ;;  %v5308_v45 = vld [vmem:[%s4802_s14 + $0x3e0] sm:$0xff] }
 0x1b6   : > { %6514 = vst [vmem:[#allocation80_spill] sm:$0xff] %v5290_v41  ;;  %v5311_v41 = vld [vmem:[%s4802_s14 + $0x3e8] sm:$0xff] }
 0x1b7   : > { %6515 = vst [vmem:[#allocation81_spill] sm:$0xff] %v5293_v11  ;;  %v5314_v11 = vld [vmem:[%s4802_s14 + $0xa0] sm:$0xff] }
 0x1b8   : > { %6516 = vst [vmem:[#allocation82_spill] sm:$0xff] %v5296_v50  ;;  %v5317_v50 = vld [vmem:[%s4802_s14 + $0xa8] sm:$0xff] }
 0x1b9   : > { %6517 = vst [vmem:[#allocation83_spill] sm:$0xff] %v5299_v25  ;;  %v5320_v25 = vld [vmem:[%s4802_s14 + $0x3c0] sm:$0xff] }
 0x1ba   : > { %6518 = vst [vmem:[#allocation84_spill] sm:$0xff] %v5302_v24  ;;  %v5323_v24 = vld [vmem:[%s4802_s14 + $0x3c8] sm:$0xff] }
 0x1bb   : > { %6519 = vst [vmem:[#allocation85_spill] sm:$0xff] %v5305_v32  ;;  %v5326_v32 = vld [vmem:[%s4802_s14 + $0x1d0] sm:$0xff] }
 0x1bc   : > { %6520 = vst [vmem:[#allocation86_spill] sm:$0xff] %v5308_v45  ;;  %v5329_v45 = vld [vmem:[%s4802_s14 + $0x1d8] sm:$0xff] }
 0x1bd   : > { %6521 = vst [vmem:[#allocation87_spill] sm:$0xff] %v5311_v41  ;;  %v5332_v41 = vld [vmem:[%s4802_s14 + $0x2b0] sm:$0xff] }
 0x1be   : > { %6522 = vst [vmem:[#allocation88_spill] sm:$0xff] %v5314_v11  ;;  %v5335_v11 = vld [vmem:[%s4802_s14 + $0x2b8] sm:$0xff] }
 0x1bf   : > { %6523 = vst [vmem:[#allocation89_spill] sm:$0xff] %v5317_v50  ;;  %v5338_v50 = vld [vmem:[%s4802_s14 + $0x1b0] sm:$0xff] }
 0x1c0   : > { %6524 = vst [vmem:[#allocation90_spill] sm:$0xff] %v5320_v25  ;;  %v5341_v25 = vld [vmem:[%s4802_s14 + $0x1b8] sm:$0xff] }
 0x1c1   : > { %6525 = vst [vmem:[#allocation91_spill] sm:$0xff] %v5323_v24  ;;  %v5344_v24 = vld [vmem:[%s4802_s14 + $0xe0] sm:$0xff] }
 0x1c2   : > { %6526 = vst [vmem:[#allocation92_spill] sm:$0xff] %v5326_v32  ;;  %v5347_v32 = vld [vmem:[%s4802_s14 + $0xe8] sm:$0xff] }
 0x1c3   : > { %6527 = vst [vmem:[#allocation93_spill] sm:$0xff] %v5329_v45  ;;  %v5350_v45 = vld [vmem:[%s4802_s14 + $0x3d0] sm:$0xff] }
 0x1c4   : > { %6528 = vst [vmem:[#allocation94_spill] sm:$0xff] %v5332_v41  ;;  %v5353_v41 = vld [vmem:[%s4802_s14 + $0x3d8] sm:$0xff] }
 0x1c5   : > { %6529 = vst [vmem:[#allocation95_spill] sm:$0xff] %v5335_v11  ;;  %v5356_v11 = vld [vmem:[%s4802_s14 + $0xc0] sm:$0xff] }
 0x1c6   : > { %6530 = vst [vmem:[#allocation96_spill] sm:$0xff] %v5338_v50  ;;  %v5359_v50 = vld [vmem:[%s4802_s14 + $0xc8] sm:$0xff] }
 0x1c7   : > { %6531 = vst [vmem:[#allocation97_spill] sm:$0xff] %v5341_v25  ;;  %v5362_v25 = vld [vmem:[%s4802_s14 + $0x2f0] sm:$0xff] }
 0x1c8   : > { %6532 = vst [vmem:[#allocation98_spill] sm:$0xff] %v5344_v24  ;;  %v5365_v24 = vld [vmem:[%s4802_s14 + $0x2f8] sm:$0xff] }
 0x1c9   : > { %6533 = vst [vmem:[#allocation99_spill] sm:$0xff] %v5347_v32  ;;  %v5368_v32 = vld [vmem:[%s4802_s14 + $0x1c0] sm:$0xff] }
 0x1ca   : > { %6534 = vst [vmem:[#allocation100_spill] sm:$0xff] %v5350_v45  ;;  %v5371_v45 = vld [vmem:[%s4802_s14 + $0x1c8] sm:$0xff] }
 0x1cb   : > { %6535 = vst [vmem:[#allocation101_spill] sm:$0xff] %v5353_v41  ;;  %v5374_v41 = vld [vmem:[%s4802_s14 + $0x2d0] sm:$0xff] }
 0x1cc   : > { %6536 = vst [vmem:[#allocation102_spill] sm:$0xff] %v5356_v11  ;;  %v5377_v11 = vld [vmem:[%s4802_s14 + $0x2d8] sm:$0xff] }
 0x1cd   : > { %6537 = vst [vmem:[#allocation103_spill] sm:$0xff] %v5359_v50  ;;  %v5380_v50 = vld [vmem:[%s4802_s14 + $0x200] sm:$0xff] }
 0x1ce   : > { %6538 = vst [vmem:[#allocation104_spill] sm:$0xff] %v5362_v25  ;;  %v5383_v25 = vld [vmem:[%s4802_s14 + $0x208] sm:$0xff] }
 0x1cf   : > { %6539 = vst [vmem:[#allocation105_spill] sm:$0xff] %v5365_v24  ;;  %v5389_v24 = vld [vmem:[%s4802_s14 + $0xd8] sm:$0xff] }
 0x1d0   : > { %6540 = vst [vmem:[#allocation106_spill] sm:$0xff] %v5368_v32  ;;  %v5392_v32 = vld [vmem:[%s4802_s14 + $0x1e0] sm:$0xff] }
 0x1d1   : > { %6541 = vst [vmem:[#allocation107_spill] sm:$0xff] %v5371_v45  ;;  %v5398_v45 = vld [vmem:[%s4802_s14 + $0x410] sm:$0xff] }
 0x1d2   : > { %6542 = vst [vmem:[#allocation108_spill] sm:$0xff] %v5374_v41  ;;  %v5401_v41 = vld [vmem:[%s4802_s14 + $0x418] sm:$0xff] }
 0x1d3   : > { %6543 = vst [vmem:[#allocation109_spill] sm:$0xff] %v5377_v11  ;;  %v5404_v11 = vld [vmem:[%s4802_s14 + $0x2e0] sm:$0xff] }
 0x1d4   : > { %6544 = vst [vmem:[#allocation110_spill] sm:$0xff] %v5380_v50  ;;  %v5407_v50 = vld [vmem:[%s4802_s14 + $0x2e8] sm:$0xff] }
 0x1d5   : > { %6545 = vst [vmem:[#allocation111_spill] sm:$0xff] %v5383_v25  ;;  %v5410_v25 = vld [vmem:[%s4802_s14 + $0xf0] sm:$0xff] }
 0x1d6   : > { %6546 = vst [vmem:[#allocation112_spill] sm:$0xff] %v5386_v21  ;;  %v5413_v21 = vld [vmem:[%s4802_s14 + $0xf8] sm:$0xff] }
 0x1d7   : > { %6547 = vst [vmem:[#allocation113_spill] sm:$0xff] %v5389_v24  ;;  %v5416_v24 = vld [vmem:[%s4802_s14 + $0x1f0] sm:$0xff] }
 0x1d8   : > { %6548 = vst [vmem:[#allocation114_spill] sm:$0xff] %v5392_v32  ;;  %v5419_v32 = vld [vmem:[%s4802_s14 + $0x1f8] sm:$0xff] }
 0x1d9   : > { %6549 = vst [vmem:[#allocation115_spill] sm:$0xff] %v5395_v17  ;;  %v5422_v17 = vld [vmem:[%s4802_s14 + $0x300] sm:$0xff] }
 0x1da   : > { %6550 = vst [vmem:[#allocation116_spill] sm:$0xff] %v5398_v45  ;;  %v5425_v45 = vld [vmem:[%s4802_s14 + $0x308] sm:$0xff] }
 0x1db   : > { %6551 = vst [vmem:[#allocation117_spill] sm:$0xff] %v5401_v41  ;;  %v5428_v41 = vld [vmem:[%s4802_s14 + $0x310] sm:$0xff] }
 0x1dc   : > { %6552 = vst [vmem:[#allocation118_spill] sm:$0xff] %v5404_v11  ;;  %v5430_v11 = vpop.eup %3293 }
 0x1dd   : > { %6553 = vst [vmem:[#allocation119_spill] sm:$0xff] %v5407_v50  ;;  %v5433_v50 = vadd.f32 1.0, %v5019_v60  ;;  %v5452_v60 = vld [vmem:[%s4802_s14 + $0x3f8] sm:$0xff] }
 0x1de   : > { %6554 = vst [vmem:[#allocation120_spill] sm:$0xff] %v5410_v25  ;;  %v800_v25 = vpop.f32.mrf.mxu3 }
 0x1df   : > { %6555 = vst [vmem:[#allocation121_spill] sm:$0xff] %v5416_v24  ;;  %v6559_v24 = vsel %vm5011_vm10, %v4893_v13, %v5026_v15  ;;  %v1498_v13 = vsel %vm5050_vm12, %v4771_v63, %v5100_v56  ;;  %v5468_v15 = vpop.permute.xlu0 %2374  ;;  %v801_v56 = vadd.f32 %v800_v25, %v5044_v44  ;;  %v1266_v44 = vmul.f32 %v4790_v61, %v4696_v0 }
 0x1e0   : > { %6556 = vst [vmem:[#allocation122_spill] sm:$0xff] %v5422_v17  ;;  %v2013_v17 = vsel %vm5028_vm11, %v5015_v27, %v6559_v24  ;;  %v1747_v24 = vsub.f32 1.0, %v5119_v10  ;;  %v1756_v27 = vand.u32 2147483648, %v4694_v16  ;;  %v1503_v63 = vsel %vm5102_vm13, %v5054_v2, %v1498_v13 }
 0x1e1   : > { %6557 = vst [vmem:[#allocation123_spill] sm:$0xff] %v5425_v45  ;;  %v5449_v45 = vld [vmem:[%s4802_s14 + $0x3f0] sm:$0xff]  ;;  %2504 = vperm.xlu2 %3046, %v2013_v17   ;;  %v705_v17 = vadd.f32 %v5106_v23, %v5057_v54  ;;  %2334 = vperm.xlu1 %3045, %v1503_v63   ;;  %v1506_v2 = vmul.f32 %v4795_v31, %v4736_v22  ;;  %v1516_v54 = vand.u32 2147483648, %v4736_v22  ;;  %v1514_v16 = vand.u32 2147483647, %v4736_v22  ;;  %v387_v22 = vld [vmem:[%s3507_s10 + $0x208] sm:$0xff] }
 0x1e2   : > { %6558 = vst [vmem:[#allocation124_spill] sm:$0xff] %v5428_v41  ;;  %v5446_v41 = vld [vmem:[%s4802_s14 + $0x318] sm:$0xff]  ;;  %v1748_v10 = vmul.f32 %v4781_v38, %v1747_v24  ;;  %v1757_v46 = vor.u32 1.1754944e-38, %v1756_v27  ;;  %v1267_v24 = vsub.f32 1.0, %v1266_v44  ;;  %v5531_v27 = vpop.eup %3295  ;;  %v3011_v63 = vmul.f32 -1.442695, %v801_v56 }
 0x1e3   : > { %6560 = vst [vmem:[#allocation125_spill] sm:$0xff] %v5452_v60  ;;  %v5474_v60 = vld [vmem:[%s4802_s14 + $0x408] sm:$0xff]  ;;  %v2979_v4 = vmul.f32 -1.442695, %v705_v17  ;;  %vm5547_vm7 = vcmp.eq.f32.partialorder %v1514_v16, 8.507059e+37  ;;  %v2532_v23 = vmul.f32 %v4957_v39, %v5128_v30  ;;  %vm1525_vm10 = vweird.f32 %v4804_v12 }
 0x1e4   : > { %6561 = vst [vmem:[#allocation126_spill] sm:$0xff] %v5474_v60  ;;  %v1749_v25 = vadd.f32 %v4781_v38, %v1748_v10  ;;  %v1276_v10 = vand.u32 2147483648, %v4696_v0  ;;  %v1268_v56 = vmul.f32 %v4790_v61, %v1267_v24  ;;  %vm1526_vm11 = vweird.f32 %v4909_v52 }
 0x1e5   : > { %2659 = vst [vmem:[%s5459_s18 + $0x20] sm:$0xff] %v5060_v62  ;;  %v2524_v62 = vmul.f32 %v4815_v57, %v5090_v35  ;;  %v5527_v35 = vpop.permute.xlu1 %2289  ;;  %3297 = vpow2.f32 %v2979_v4  ;;  %v1529_v44 = vand.u32 2147483647, %v4804_v12  ;;  %v1531_v4 = vand.u32 2147483648, %v4804_v12  ;;  %vm5612_vm13 = vmor %vm1525_vm10, %vm1526_vm11 }
 0x1e6   : > { %2663 = vst [vmem:[%s5459_s18 + $0x40] sm:$0xff] %v5041_v14  ;;  %v1507_v14 = vsub.f32 1.0, %v1506_v2  ;;  %v803_v2 = vpop.f32.mrf.mxu3  ;;  %3299 = vrcp.f32 %v5433_v50  ;;  %v1281_v24 = vmul.f32 %v4903_v47, %v4783_v29  ;;  %vm1285_vm12 = vweird.f32 %v4783_v29 }
 0x1e7   : > { %2687 = vst [vmem:[%s5459_s18 + $0x100] sm:$0xff] %v4952_v3  ;;  %v1753_v3 = vsel %vm5500_vm1, %v4781_v38, %v1749_v25  ;;  %v2626_v25 = vmul.f32 %v4959_v8, %v5134_v36  ;;  %3301 = vpow2.f32 %v3011_v63  ;;  %v1289_v63 = vand.u32 2147483647, %v4783_v29  ;;  %vm5639_vm2 = vmor %vm1285_vm12, %vm1286_vm14 }
 0x1e8   : > { %2689 = vst [vmem:[%s5459_s18 + $0x110] sm:$0xff] %v4896_v53  ;;  %v1508_v13 = vmul.f32 %v4795_v31, %v1507_v14  ;;  %v1274_v53 = vand.u32 2147483647, %v4696_v0  ;;  %v1758_v17 = vsel %vm5488_vm0, %v1757_v46, %v1753_v3  ;;  %v1521_v0 = vmul.f32 %v4909_v52, %v4804_v12  ;;  %v5581_v14 = vpop.permute.xlu0 %2464  ;;  %v5623_v12 = vpop.permute.xlu2 %2309 }
 0x1e9   : > { %2695 = vst [vmem:[%s5459_s18 + $0x140] sm:$0xff] %v2562_v26  ;;  %v1517_v26 = vor.u32 1.1754944e-38, %v1516_v54  ;;  %2419 = vperm.xlu0 %3044, %v1758_v17   ;;  %v1277_v54 = vor.u32 1.1754944e-38, %v1276_v10  ;;  %v1291_v17 = vand.u32 2147483648, %v4783_v29  ;;  %vm1530_vm15 = vcmp.eq.f32.partialorder %v1529_v44, 8.507059e+37 }
 0x1ea   : > { %2723 = vst [vmem:[%s5459_s18 + $0x220] sm:$0xff] %v5022_v6  ;;  %v1509_v6 = vadd.f32 %v4795_v31, %v1508_v13  ;;  %vm5575_vm9 = vcmp.eq.f32.partialorder %v1274_v53, 8.507059e+37  ;;  %v1522_v16 = vsub.f32 1.0, %v1521_v0  ;;  %v2558_v13 = vmul.f32 %v4980_v58, %v5140_v49 }
 0x1eb   : > { %2725 = vst [vmem:[%s5459_s18 + $0x230] sm:$0xff] %v4949_v19  ;;  %v2624_v19 = vmul.f32 %v4891_v33, %v5122_v9  ;;  %v1532_v53 = vor.u32 1.1754944e-38, %v1531_v4  ;;  %vm1765_vm0 = vweird.f32 %v4745_v48  ;;  %vm1766_vm1 = vweird.f32 %v4817_v5 }
 0x1ec   : > { %2755 = vst [vmem:[%s5459_s18 + $0x320] sm:$0xff] %v4857_v28  ;;  %v1513_v30 = vsel %vm5539_vm6, %v4795_v31, %v1509_v6  ;;  %v1269_v28 = vadd.f32 %v4790_v61, %v1268_v56  ;;  %v1769_v60 = vand.u32 2147483647, %v4745_v48  ;;  %vm1290_vm3 = vcmp.eq.f32.partialorder %v1289_v63, 8.507059e+37  ;;  %vm5665_vm5 = vmor %vm1765_vm0, %vm1766_vm1 }
 0x1ed   : > { %2761 = vst [vmem:[%s5459_s18 + $0x350] sm:$0xff] %v4992_v42  ;;  %v1518_v36 = vsel %vm5547_vm7, %v1517_v26, %v1513_v30  ;;  %v804_v42 = vadd.f32 %v803_v2, %v387_v22  ;;  %v1761_v26 = vmul.f32 %v4817_v5, %v4745_v48  ;;  %v5625_v10 = vpop.permute.xlu1 %2379  ;;  %v1292_v2 = vor.u32 1.1754944e-38, %v1291_v17 }
 0x1ee   : > { %2665 = vst [vmem:[%s5459_s18 + $0x50] sm:$0xff] %v2532_v23  ;;  %2339 = vperm.xlu2 %3046, %v1518_v36   ;;  %v1273_v31 = vsel %vm5563_vm8, %v4790_v61, %v1269_v28  ;;  %v1523_v61 = vmul.f32 %v4909_v52, %v1522_v16  ;;  %vm5652_vm4 = vcmp.eq.f32.partialorder %v1769_v60, 8.507059e+37  ;;  %v1296_v16 = vmul.f32 %v5430_v11, %v4962_v20 }
 0x1ef   : > { %2759 = vst [vmem:[%s5459_s18 + $0x340] sm:$0xff] %v2626_v25  ;;  %v1278_v3 = vsel %vm5575_vm9, %v1277_v54, %v1273_v31  ;;  %v3012_v38 = vmul.f32 -1.442695, %v804_v42  ;;  %v1762_v23 = vsub.f32 1.0, %v1761_v26  ;;  %v2528_v31 = vmul.f32 %v5036_v40, %v5152_v37 }
 0x1f0   : > { %2654 = vst [vmem:[%s5459_s18] sm:$0xff] %v4955_v34  ;;  %2259 = vperm.xlu1 %3045, %v1278_v3   ;;  %v3298_v34 = vpop.eup %3297  ;;  %v5656_v0 = vpop.permute.xlu0 %2299  ;;  %vm1300_vm6 = vweird.f32 %v4962_v20  ;;  %vm1301_vm7 = vweird.f32 %v5430_v11  ;;  %v1306_v3 = vand.u32 2147483648, %v4962_v20 }
 0x1f1   : > { %2657 = vst [vmem:[%s5459_s18 + $0x10] sm:$0xff] %v2524_v62  ;;  %v1282_v62 = vsub.f32 1.0, %v1281_v24  ;;  %v5644_v46 = vpop.eup %3299  ;;  %v5649_v29 = vadd.f32 1.0, %v3298_v34  ;;  %3303 = vpow2.f32 %v3012_v38  ;;  %v1763_v28 = vmul.f32 %v4817_v5, %v1762_v23  ;;  %v6584_v34 = vld [vmem:[#allocation15_spill] sm:$0xff]  ;;  %vm5699_vm9 = vmor %vm1300_vm6, %vm1301_vm7  ;;  %v5706_v60 = vpop.permute.xlu2 %2234 }
 0x1f2   : > { %2721 = vst [vmem:[%s5459_s18 + $0x210] sm:$0xff] %v5004_v1  ;;  %v1524_v1 = vadd.f32 %v4909_v52, %v1523_v61  ;;  %v3302_v30 = vpop.eup %3301  ;;  %v1307_v17 = vor.u32 1.1754944e-38, %v1306_v3  ;;  %vm1781_vm10 = vweird.f32 %v6584_v34 }
 0x1f3   : > { %2691 = vst [vmem:[%s5459_s18 + $0x120] sm:$0xff] %v2558_v13  ;;  %v1283_v6 = vmul.f32 %v4903_v47, %v1282_v62  ;;  %v1764_v4 = vadd.f32 %v4817_v5, %v1763_v28  ;;  %v6582_v13 = vld [vmem:[#allocation36_spill] sm:$0xff]  ;;  %v5682_v24 = vadd.f32 1.0, %v3302_v30  ;;  %3305 = vrcp.f32 %v5649_v29 }
 0x1f4   : > { %2757 = vst [vmem:[%s5459_s18 + $0x330] sm:$0xff] %v2624_v19  ;;  %v1528_v56 = vsel %vm5612_vm13, %v4909_v52, %v1524_v1  ;;  %v1771_v19 = vand.u32 2147483648, %v4745_v48  ;;  %v2598_v52 = vmul.f32 %v5034_v7, %v5146_v59  ;;  %v1297_v48 = vsub.f32 1.0, %v1296_v16 }
 0x1f5   : > { %v1533_v54 = vsel %vm1530_vm15, %v1532_v53, %v1528_v56  ;;  %v1284_v25 = vadd.f32 %v4903_v47, %v1283_v6  ;;  %v2594_v37 = vmul.f32 %v5468_v15, %v6582_v13  ;;  %2661 = vst [vmem:[%s5459_s18 + $0x30] sm:$0xff] %v2528_v31  ;;  %v1768_v61 = vsel %vm5665_vm5, %v4817_v5, %v1764_v4  ;;  %v6583_v53 = vld [vmem:[#allocation11_spill] sm:$0xff]  ;;  %v5708_v56 = vpop.permute.xlu1 %2469 }
 0x1f6   : > { %2344 = vperm.xlu0 %3044, %v1533_v54   ;;  %v1772_v42 = vor.u32 1.1754944e-38, %v1771_v19  ;;  %2731 = vst [vmem:[%s5459_s18 + $0x260] sm:$0xff] %v2598_v52  ;;  %v1776_v49 = vmul.f32 %v6584_v34, %v6583_v53  ;;  %v1298_v63 = vmul.f32 %v5430_v11, %v1297_v48  ;;  %vm1780_vm8 = vweird.f32 %v6583_v53 }
 0x1f7   : > { %v1288_v36 = vsel %vm5639_vm2, %v4903_v47, %v1284_v25  ;;  %v1304_v47 = vand.u32 2147483647, %v4962_v20  ;;  %2727 = vst [vmem:[%s5459_s18 + $0x240] sm:$0xff] %v2594_v37  ;;  %v3304_v38 = vpop.eup %3303  ;;  %v1784_v26 = vand.u32 2147483647, %v6583_v53  ;;  %v1786_v6 = vand.u32 2147483648, %v6583_v53  ;;  %vm5722_vm14 = vmor %vm1780_vm8, %vm1781_vm10 }
 0x1f8   : > { %v1293_v44 = vsel %vm1290_vm3, %v1292_v2, %v1288_v36  ;;  %v1773_v62 = vsel %vm5652_vm4, %v1772_v42, %v1768_v61  ;;  %v1777_v1 = vsub.f32 1.0, %v1776_v49  ;;  %v1299_v22 = vadd.f32 %v5430_v11, %v1298_v63  ;;  %v6587_v2 = vld [vmem:[#allocation12_spill] sm:$0xff]  ;;  %v6591_v36 = vld [vmem:[#allocation38_spill] sm:$0xff]  ;;  %v5729_v42 = vpop.permute.xlu0 %2224  ;;  %v6598_v49 = vld [vmem:[#allocation17_spill] sm:$0xff] }
 0x1f9   : > { %2264 = vperm.xlu2 %3046, %v1293_v44   ;;  %2424 = vperm.xlu1 %3045, %v1773_v62   ;;  %vm1305_vm11 = vcmp.eq.f32.partialorder %v1304_v47, 8.507059e+37  ;;  %v6588_v20 = vld [vmem:[#allocation16_spill] sm:$0xff]  ;;  %vm1540_vm12 = vweird.f32 %v6587_v2  ;;  %v1787_v54 = vor.u32 1.1754944e-38, %v1786_v6  ;;  %v1544_v25 = vand.u32 2147483647, %v6587_v2  ;;  %v5731_v31 = vpop.eup %3305  ;;  %v6597_v53 = vld [vmem:[#allocation14_spill] sm:$0xff] }
 0x1fa   : > { %v1536_v23 = vmul.f32 %v6588_v20, %v6587_v2  ;;  %v1778_v19 = vmul.f32 %v6584_v34, %v1777_v1  ;;  %vm1541_vm13 = vweird.f32 %v6588_v20  ;;  %v1303_v52 = vsel %vm5699_vm9, %v5430_v11, %v1299_v22  ;;  %v6594_v47 = vld [vmem:[#allocation40_spill] sm:$0xff]  ;;  %v6599_v1 = vld [vmem:[#allocation42_spill] sm:$0xff] }
 0x1fb   : > { %v1546_v9 = vand.u32 2147483648, %v6587_v2  ;;  %v2634_v59 = vmul.f32 %v5525_v55, %v6591_v36  ;;  %3307 = vrcp.f32 %v5682_v24  ;;  %v1308_v11 = vsel %vm1305_vm11, %v1307_v17, %v1303_v52  ;;  %vm5752_vm1 = vmor %vm1540_vm12, %vm1541_vm13 }
 0x1fc   : > { %v1537_v28 = vsub.f32 1.0, %v1536_v23  ;;  %v1779_v16 = vadd.f32 %v6584_v34, %v1778_v19  ;;  %vm1785_vm15 = vcmp.eq.f32.partialorder %v1784_v26, 8.507059e+37  ;;  %v5735_v44 = vadd.f32 1.0, %v3304_v38  ;;  %v5779_v19 = vpop.permute.xlu2 %2399 }
 0x1fd   : > { %vm5738_vm0 = vcmp.eq.f32.partialorder %v1544_v25, 8.507059e+37  ;;  %v2560_v3 = vmul.f32 %v5527_v35, %v6594_v47  ;;  %2767 = vst [vmem:[%s5459_s18 + $0x380] sm:$0xff] %v2634_v59  ;;  %v1547_v61 = vor.u32 1.1754944e-38, %v1546_v9  ;;  %v1791_v62 = vmul.f32 %v6598_v49, %v6597_v53  ;;  %v5768_v22 = vpop.permute.xlu1 %2304 }
 0x1fe   : > { %2269 = vperm.xlu0 %3044, %v1308_v11   ;;  %v1538_v4 = vmul.f32 %v6588_v20, %v1537_v28  ;;  %v1783_v13 = vsel %vm5722_vm14, %v6584_v34, %v1779_v16  ;;  %vm1795_vm2 = vweird.f32 %v6597_v53  ;;  %v1799_v38 = vand.u32 2147483647, %v6597_v53 }
 0x1ff   : > { %v1788_v63 = vsel %vm1785_vm15, %v1787_v54, %v1783_v13  ;;  %v1801_v34 = vand.u32 2147483648, %v6597_v53  ;;  %2693 = vst [vmem:[%s5459_s18 + $0x130] sm:$0xff] %v2560_v3  ;;  %v1792_v5 = vsub.f32 1.0, %v1791_v62  ;;  %vm1796_vm3 = vweird.f32 %v6598_v49 }
 0x200   : > { %v1539_v17 = vadd.f32 %v6588_v20, %v1538_v4  ;;  %v2630_v26 = vmul.f32 %v5581_v14, %v6599_v1  ;;  %v1551_v6 = vmul.f32 %v5731_v31, %v5649_v29  ;;  %3309 = vrcp.f32 %v5735_v44  ;;  %vm5792_vm7 = vmor %vm1795_vm2, %vm1796_vm3  ;;  %v5812_v37 = vpop.permute.xlu0 %2389 }
 0x201   : > { %2429 = vperm.xlu2 %3046, %v1788_v63   ;;  %vm5774_vm4 = vcmp.eq.f32.partialorder %v1799_v38, 8.507059e+37  ;;  %vm1555_vm5 = vweird.f32 %v5649_v29  ;;  %v5781_v54 = vpop.eup %3307  ;;  %v1793_v52 = vmul.f32 %v6598_v49, %v1792_v5  ;;  %vm1556_vm6 = vweird.f32 %v5731_v31  ;;  %v6617_v5 = vld [vmem:[#allocation50_spill] sm:$0xff] }
 0x202   : > { %v1543_v2 = vsel %vm5752_vm1, %v6588_v20, %v1539_v17  ;;  %v1552_v30 = vsub.f32 1.0, %v1551_v6  ;;  %2763 = vst [vmem:[%s5459_s18 + $0x360] sm:$0xff] %v2630_v26  ;;  %v1802_v28 = vor.u32 1.1754944e-38, %v1801_v34  ;;  %v1559_v9 = vand.u32 2147483647, %v5649_v29  ;;  %vm5806_vm9 = vmor %vm1555_vm5, %vm1556_vm6  ;;  %v6611_v26 = vld [vmem:[#allocation46_spill] sm:$0xff] }
 0x203   : > { %v1548_v25 = vsel %vm5738_vm0, %v1547_v61, %v1543_v2  ;;  %v1561_v36 = vand.u32 2147483648, %v5649_v29  ;;  %v1806_v59 = vmul.f32 %v5531_v27, %v5038_v51  ;;  %v1794_v11 = vadd.f32 %v6598_v49, %v1793_v52  ;;  %v6606_v29 = vld [vmem:[#allocation44_spill] sm:$0xff] }
 0x204   : > { %2349 = vperm.xlu1 %3045, %v1548_v25   ;;  %v1553_v16 = vmul.f32 %v5731_v31, %v1552_v30  ;;  %vm1810_vm8 = vweird.f32 %v5038_v51  ;;  %v1814_v4 = vand.u32 2147483647, %v5038_v51  ;;  %vm1811_vm10 = vweird.f32 %v5531_v27  ;;  %v6612_v20 = vld [vmem:[#allocation48_spill] sm:$0xff] }
 0x205   : > { %v1562_v47 = vor.u32 1.1754944e-38, %v1561_v36  ;;  %v1807_v3 = vsub.f32 1.0, %v1806_v59  ;;  %v1816_v13 = vand.u32 2147483648, %v5038_v51  ;;  %v1798_v61 = vsel %vm5792_vm7, %v6598_v49, %v1794_v11  ;;  %vm5834_vm13 = vmor %vm1810_vm8, %vm1811_vm10  ;;  %v5842_v23 = vpop.permute.xlu1 %2229  ;;  %v5858_v59 = vpop.permute.xlu2 %2489 }
 0x206   : > { %v1554_v53 = vadd.f32 %v5731_v31, %v1553_v16  ;;  %vm1560_vm11 = vcmp.eq.f32.partialorder %v1559_v9, 8.507059e+37  ;;  %v2568_v62 = vmul.f32 %v5623_v12, %v6606_v29  ;;  %v5820_v63 = vpop.eup %3309  ;;  %v1803_v17 = vsel %vm5774_vm4, %v1802_v28, %v1798_v61 }
 0x207   : > { %v1808_v38 = vmul.f32 %v5531_v27, %v1807_v3  ;;  %vm5825_vm12 = vcmp.eq.f32.partialorder %v1814_v4, 8.507059e+37  ;;  %2434 = vperm.xlu0 %3044, %v1803_v17   ;;  %v1817_v1 = vor.u32 1.1754944e-38, %v1816_v13  ;;  %v2596_v6 = vmul.f32 %v5625_v10, %v6611_v26 }
 0x208   : > { %v1558_v49 = vsel %vm5806_vm9, %v5731_v31, %v1554_v53  ;;  %v2016_v2 = vmul.f32 %v5644_v46, %v5433_v50  ;;  %vm2020_vm14 = vweird.f32 %v5433_v50  ;;  %vm2021_vm15 = vweird.f32 %v5644_v46  ;;  %2701 = vst [vmem:[%s5459_s18 + $0x170] sm:$0xff] %v2568_v62  ;;  %v5883_v62 = vpop.permute.xlu0 %2479 }
 0x209   : > { %v1563_v25 = vsel %vm1560_vm11, %v1562_v47, %v1558_v49  ;;  %v1809_v52 = vadd.f32 %v5531_v27, %v1808_v38  ;;  %v2024_v31 = vand.u32 2147483647, %v5433_v50  ;;  %v2026_v30 = vand.u32 2147483648, %v5433_v50  ;;  %2729 = vst [vmem:[%s5459_s18 + $0x250] sm:$0xff] %v2596_v6  ;;  %vm5869_vm1 = vmor %vm2020_vm14, %vm2021_vm15 }
 0x20a   : > { %2354 = vperm.xlu2 %3046, %v1563_v25   ;;  %v2017_v51 = vsub.f32 1.0, %v2016_v2  ;;  %v2564_v28 = vmul.f32 %v5656_v0, %v6612_v20  ;;  %v2046_v36 = vmul.f32 %v5820_v63, %v5735_v44  ;;  %vm2050_vm0 = vweird.f32 %v5735_v44 }
 0x20b   : > { %v1813_v9 = vsel %vm5834_vm13, %v5531_v27, %v1809_v52  ;;  %v2027_v4 = vor.u32 1.1754944e-38, %v2026_v30  ;;  %vm2051_vm2 = vweird.f32 %v5820_v63  ;;  %v2054_v47 = vand.u32 2147483647, %v5735_v44  ;;  %v6621_v30 = vld [vmem:[#allocation56_spill] sm:$0xff] }
 0x20c   : > { %v1818_v11 = vsel %vm5825_vm12, %v1817_v1, %v1813_v9  ;;  %v2018_v16 = vmul.f32 %v5644_v46, %v2017_v51  ;;  %2697 = vst [vmem:[%s5459_s18 + $0x150] sm:$0xff] %v2564_v28  ;;  %v2047_v48 = vsub.f32 1.0, %v2046_v36  ;;  %v2056_v3 = vand.u32 2147483648, %v5735_v44  ;;  %vm5890_vm6 = vmor %vm2050_vm0, %vm2051_vm2  ;;  %v6618_v44 = vld [vmem:[#allocation52_spill] sm:$0xff]  ;;  %v6622_v36 = vld [vmem:[#allocation58_spill] sm:$0xff] }
 0x20d   : > { %2439 = vperm.xlu1 %3045, %v1818_v11   ;;  %vm2025_vm3 = vcmp.eq.f32.partialorder %v2024_v31, 8.507059e+37  ;;  %v2031_v61 = vmul.f32 %v5781_v54, %v5682_v24  ;;  %vm2035_vm4 = vweird.f32 %v5682_v24  ;;  %vm2036_vm5 = vweird.f32 %v5781_v54  ;;  %v5897_v26 = vpop.permute.xlu1 %2394  ;;  %v6623_v11 = vld [vmem:[#allocation29_spill] sm:$0xff]  ;;  %v6637_v51 = vld [vmem:[#allocation74_spill] sm:$0xff] }
 0x20e   : > { %v2019_v13 = vadd.f32 %v5644_v46, %v2018_v16  ;;  %v2048_v50 = vmul.f32 %v5820_v63, %v2047_v48  ;;  %v2057_v53 = vor.u32 1.1754944e-38, %v2056_v3  ;;  %v2039_v29 = vand.u32 2147483647, %v5682_v24  ;;  %vm5911_vm8 = vmor %vm2035_vm4, %vm2036_vm5  ;;  %v6624_v16 = vld [vmem:[#allocation13_spill] sm:$0xff]  ;;  %v6625_v48 = vld [vmem:[#allocation64_spill] sm:$0xff] }
 0x20f   : > { %v2032_v34 = vsub.f32 1.0, %v2031_v61  ;;  %v2041_v49 = vand.u32 2147483648, %v5682_v24  ;;  %v2538_v1 = vmul.f32 %v5706_v60, %v6617_v5  ;;  %vm2055_vm7 = vcmp.eq.f32.partialorder %v2054_v47, 8.507059e+37  ;;  %v2325_v24 = vpop.permute.xlu2 %2324  ;;  %v6626_v3 = vld [vmem:[#allocation35_spill] sm:$0xff] }
 0x210   : > { %v2023_v17 = vsel %vm5869_vm1, %v5644_v46, %v2019_v13  ;;  %v2049_v2 = vadd.f32 %v5820_v63, %v2048_v50  ;;  %v2632_v25 = vmul.f32 %v5708_v56, %v6618_v44  ;;  %v2604_v20 = vmul.f32 %v5779_v19, %v6621_v30  ;;  %v6627_v50 = vld [vmem:[#allocation26_spill] sm:$0xff]  ;;  %v6631_v5 = vld [vmem:[#allocation51_spill] sm:$0xff] }
 0x211   : > { %v2028_v6 = vsel %vm2025_vm3, %v2027_v4, %v2023_v17  ;;  %v2033_v46 = vmul.f32 %v5781_v54, %v2032_v34  ;;  %2671 = vst [vmem:[%s5459_s18 + $0x80] sm:$0xff] %v2538_v1  ;;  %v2042_v31 = vor.u32 1.1754944e-38, %v2041_v49  ;;  %vm2040_vm9 = vcmp.eq.f32.partialorder %v2039_v29, 8.507059e+37  ;;  %v5938_v34 = vpop.permute.xlu0 %2314  ;;  %v6630_v49 = vld [vmem:[#allocation65_spill] sm:$0xff]  ;;  %v6635_v44 = vld [vmem:[#allocation3_spill] sm:$0xff] }
 0x212   : > { %2509 = vperm.xlu0 %3044, %v2028_v6   ;;  %v2053_v52 = vsel %vm5890_vm6, %v5820_v63, %v2049_v2  ;;  %v2566_v63 = vmul.f32 %v5768_v22, %v6622_v36  ;;  %2765 = vst [vmem:[%s5459_s18 + $0x370] sm:$0xff] %v2632_v25  ;;  %v2527_v4 = vmul.f32 %v6624_v16, %v6623_v11  ;;  %vm2655_vm10 = vcmask 556032   ;;  %v6632_v6 = vld [vmem:[#allocation21_spill] sm:$0xff]  ;;  %v6633_v2 = vld [vmem:[#allocation7_spill] sm:$0xff] }
 0x213   : > { %v2058_v28 = vsel %vm2055_vm7, %v2057_v53, %v2053_v52  ;;  %v2034_v9 = vadd.f32 %v5781_v54, %v2033_v46  ;;  %v2536_v47 = vmul.f32 %v5842_v23, %v6625_v48  ;;  %v2529_v13 = vmul.f32 %v5036_v40, %v6626_v3  ;;  %2737 = vst [vmem:[%s5459_s18 + $0x290] sm:$0xff] %v2604_v20  ;;  %v6628_v53 = vld [vmem:[#allocation10_spill] sm:$0xff]  ;;  %v6634_v46 = vld [vmem:[#allocation19_spill] sm:$0xff] }
 0x214   : > { %2519 = vperm.xlu2 %3046, %v2058_v28   ;;  %2699 = vst [vmem:[%s5459_s18 + $0x160] sm:$0xff] %v2566_v63  ;;  %v2531_v29 = vmul.f32 %v6628_v53, %v6627_v50  ;;  %v2537_v40 = vmul.f32 %v5842_v23, %v6630_v49  ;;  %v2539_v1 = vmul.f32 %v5706_v60, %v6631_v5  ;;  %v6636_v60 = vld [vmem:[#allocation41_spill] sm:$0xff]  ;;  %v6638_v30 = vld [vmem:[#allocation75_spill] sm:$0xff] }
 0x215   : > { %v2038_v27 = vsel %vm5911_vm8, %v5781_v54, %v2034_v9  ;;  %v5934_v17 = vpop.permute.xlu1 %2484  ;;  %v6629_v54 = vld [vmem:[#allocation31_spill] sm:$0xff]  ;;  %2669 = vst [vmem:[%s5459_s18 + $0x70] sm:$0xff] %v2536_v47  ;;  %v2557_v25 = vmul.f32 %v6635_v44, %v6634_v46  ;;  %v2561_v52 = vmul.f32 %v5527_v35, %v6636_v60  ;;  %v6639_v9 = vld [vmem:[#allocation28_spill] sm:$0xff]  ;;  %v6641_v35 = vld [vmem:[#allocation45_spill] sm:$0xff] }
 0x216   : > { %v2043_v61 = vsel %vm2040_vm9, %v2042_v31, %v2038_v27  ;;  %v2533_v38 = vmul.f32 %v4957_v39, %v6629_v54  ;;  %2660 = vst.msk [vmem:[%s5459_s18 + $0x28] sm:$0xff] %vm2655_vm10, %v2527_v4  ;;  %v2555_v39 = vmul.f32 %v6633_v2, %v6632_v6  ;;  %v2563_v36 = vmul.f32 %v4879_v18, %v6639_v9  ;;  %v6640_v63 = vld [vmem:[#allocation59_spill] sm:$0xff]  ;;  %v6642_v27 = vld [vmem:[#allocation82_spill] sm:$0xff]  ;;  %v6647_v50 = vld [vmem:[#allocation9_spill] sm:$0xff] }
 0x217   : > { %2514 = vperm.xlu1 %3045, %v2043_v61   ;;  %2662 = vst.msk [vmem:[%s5459_s18 + $0x38] sm:$0xff] %vm2655_vm10, %v2529_v13  ;;  %v2250_v23 = vpop.permute.xlu2 %2249  ;;  %v2567_v11 = vmul.f32 %v5768_v22, %v6640_v63  ;;  %v2569_v16 = vmul.f32 %v5623_v12, %v6641_v35  ;;  %v6643_v18 = vld [vmem:[#allocation83_spill] sm:$0xff]  ;;  %v6644_v22 = vld [vmem:[#allocation68_spill] sm:$0xff]  ;;  %v6645_v13 = vld [vmem:[#allocation69_spill] sm:$0xff] }
 0x218   : > { %2664 = vst.msk [vmem:[%s5459_s18 + $0x48] sm:$0xff] %vm2655_vm10, %v2531_v29  ;;  %v2544_v31 = vmul.f32 %v2250_v23, %v6637_v51  ;;  %v2545_v20 = vmul.f32 %v2250_v23, %v6638_v30  ;;  %v2574_v3 = vmul.f32 %v2325_v24, %v6644_v22  ;;  %v2575_v12 = vmul.f32 %v2325_v24, %v6645_v13  ;;  %v6646_v61 = vld [vmem:[#allocation25_spill] sm:$0xff]  ;;  %v6648_v54 = vld [vmem:[#allocation20_spill] sm:$0xff]  ;;  %v6652_v6 = vld [vmem:[#allocation47_spill] sm:$0xff] }
 0x219   : > { %2666 = vst.msk [vmem:[%s5459_s18 + $0x58] sm:$0xff] %vm2655_vm10, %v2533_v38  ;;  %v5976_v4 = vpop.permute.xlu0 %2239  ;;  %v2591_v53 = vmul.f32 %v6647_v50, %v6646_v61  ;;  %v6649_v38 = vld [vmem:[#allocation4_spill] sm:$0xff]  ;;  %v2597_v2 = vmul.f32 %v5625_v10, %v6652_v6  ;;  %v6656_v51 = vld [vmem:[#allocation57_spill] sm:$0xff]  ;;  %v6659_v9 = vld [vmem:[#allocation18_spill] sm:$0xff] }
 0x21a   : > { %2670 = vst.msk [vmem:[%s5459_s18 + $0x78] sm:$0xff] %vm2655_vm10, %v2537_v40  ;;  %v2593_v49 = vmul.f32 %v6649_v38, %v6648_v54  ;;  %v6650_v40 = vld [vmem:[#allocation88_spill] sm:$0xff]  ;;  %v6663_v35 = vld [vmem:[#allocation6_spill] sm:$0xff] }
 0x21b   : > { %2672 = vst.msk [vmem:[%s5459_s18 + $0x88] sm:$0xff] %vm2655_vm10, %v2539_v1  ;;  %v6651_v1 = vld [vmem:[#allocation89_spill] sm:$0xff]  ;;  %v6661_v63 = vld [vmem:[#allocation32_spill] sm:$0xff]  ;;  %v6670_v54 = vld [vmem:[#allocation62_spill] sm:$0xff] }
 0x21c   : > { %2688 = vst.msk [vmem:[%s5459_s18 + $0x108] sm:$0xff] %vm2655_vm10, %v2555_v39  ;;  %v6653_v39 = vld [vmem:[#allocation34_spill] sm:$0xff]  ;;  %v2640_v38 = vmul.f32 %v5858_v59, %v6670_v54 }
 0x21d   : > { %v2320_v28 = vpop.permute.xlu1 %2319  ;;  %2690 = vst.msk [vmem:[%s5459_s18 + $0x118] sm:$0xff] %vm2655_vm10, %v2557_v25  ;;  %v2599_v46 = vmul.f32 %v5034_v7, %v6653_v39  ;;  %v6654_v25 = vld [vmem:[#allocation70_spill] sm:$0xff]  ;;  %v2605_v7 = vmul.f32 %v5779_v19, %v6656_v51  ;;  %v2627_v19 = vmul.f32 %v4959_v8, %v6661_v63  ;;  %v6683_v63 = vld [vmem:[#allocation101_spill] sm:$0xff] }
 0x21e   : > { %2677 = vst [vmem:[%s5459_s18 + $0xb0] sm:$0xff] %v2544_v31  ;;  %v2572_v48 = vmul.f32 %v2320_v28, %v6642_v27  ;;  %v2573_v47 = vmul.f32 %v2320_v28, %v6643_v18  ;;  %v2602_v23 = vmul.f32 %v5897_v26, %v6654_v25  ;;  %v6657_v31 = vld [vmem:[#allocation80_spill] sm:$0xff]  ;;  %v6664_v27 = vld [vmem:[#allocation53_spill] sm:$0xff]  ;;  %v6665_v18 = vld [vmem:[#allocation39_spill] sm:$0xff] }
 0x21f   : > { %2678 = vst.msk [vmem:[%s5459_s18 + $0xb8] sm:$0xff] %vm2655_vm10, %v2545_v20  ;;  %v2415_v60 = vpop.permute.xlu2 %2414  ;;  %v6658_v20 = vld [vmem:[#allocation81_spill] sm:$0xff]  ;;  %v6674_v6 = vld [vmem:[#allocation22_spill] sm:$0xff] }
 0x220   : > { %2694 = vst.msk [vmem:[%s5459_s18 + $0x138] sm:$0xff] %vm2655_vm10, %v2561_v52  ;;  %v6655_v52 = vld [vmem:[#allocation71_spill] sm:$0xff]  ;;  %v2610_v30 = vmul.f32 %v2415_v60, %v6657_v31  ;;  %v2611_v28 = vmul.f32 %v2415_v60, %v6658_v20  ;;  %v6680_v31 = vld [vmem:[#allocation93_spill] sm:$0xff]  ;;  %v6693_v54 = vld [vmem:[#allocation106_spill] sm:$0xff] }
 0x221   : > { %2696 = vst.msk [vmem:[%s5459_s18 + $0x148] sm:$0xff] %vm2655_vm10, %v2563_v36  ;;  %v6010_v44 = vpop.permute.xlu0 %2404  ;;  %v2603_v10 = vmul.f32 %v5897_v26, %v6655_v52  ;;  %v6660_v36 = vld [vmem:[#allocation2_spill] sm:$0xff] }
 0x222   : > { %2700 = vst.msk [vmem:[%s5459_s18 + $0x168] sm:$0xff] %vm2655_vm10, %v2567_v11  ;;  %v2623_v26 = vmul.f32 %v6660_v36, %v6659_v9  ;;  %v6662_v11 = vld [vmem:[#allocation23_spill] sm:$0xff]  ;;  %v6682_v36 = vld [vmem:[#allocation100_spill] sm:$0xff] }
 0x223   : > { %2702 = vst.msk [vmem:[%s5459_s18 + $0x178] sm:$0xff] %vm2655_vm10, %v2569_v16  ;;  %v2629_v16 = vmul.f32 %v6663_v35, %v6662_v11 }
 0x224   : > { %2705 = vst [vmem:[%s5459_s18 + $0x190] sm:$0xff] %v2572_v48  ;;  %v2633_v48 = vmul.f32 %v5708_v56, %v6664_v27 }
 0x225   : > { %2706 = vst.msk [vmem:[%s5459_s18 + $0x198] sm:$0xff] %vm2655_vm10, %v2573_v47  ;;  %v2245_v29 = vpop.permute.xlu1 %2244  ;;  %v2635_v47 = vmul.f32 %v5525_v55, %v6665_v18  ;;  %v6668_v55 = vld [vmem:[#allocation95_spill] sm:$0xff] }
 0x226   : > { %2707 = vst [vmem:[%s5459_s18 + $0x1a0] sm:$0xff] %v2574_v3  ;;  %v2542_v5 = vmul.f32 %v2245_v29, %v6650_v40  ;;  %v2543_v24 = vmul.f32 %v2245_v29, %v6651_v1  ;;  %v6666_v3 = vld [vmem:[#allocation76_spill] sm:$0xff] }
 0x227   : > { %2708 = vst.msk [vmem:[%s5459_s18 + $0x1a8] sm:$0xff] %vm2655_vm10, %v2575_v12  ;;  %v2638_v56 = vmul.f32 %v5934_v17, %v6666_v3  ;;  %v6667_v12 = vld [vmem:[#allocation94_spill] sm:$0xff]  ;;  %v6688_v3 = vld [vmem:[#allocation49_spill] sm:$0xff] }
 0x228   : > { %2724 = vst.msk [vmem:[%s5459_s18 + $0x228] sm:$0xff] %vm2655_vm10, %v2591_v53  ;;  %v6669_v53 = vld [vmem:[#allocation77_spill] sm:$0xff] }
 0x229   : > { %2675 = vst [vmem:[%s5459_s18 + $0xa0] sm:$0xff] %v2542_v5  ;;  %v6047_v22 = vpop.permute.xlu0 %2494  ;;  %v2639_v29 = vmul.f32 %v5934_v17, %v6669_v53  ;;  %v6672_v5 = vld [vmem:[#allocation86_spill] sm:$0xff]  ;;  %v6692_v53 = vld [vmem:[#allocation73_spill] sm:$0xff] }
 0x22a   : > { %2676 = vst.msk [vmem:[%s5459_s18 + $0xa8] sm:$0xff] %vm2655_vm10, %v2543_v24  ;;  %v6673_v24 = vld [vmem:[#allocation87_spill] sm:$0xff] }
 0x22b   : > { %2726 = vst.msk [vmem:[%s5459_s18 + $0x238] sm:$0xff] %vm2655_vm10, %v2593_v49  ;;  %v6671_v49 = vld [vmem:[#allocation63_spill] sm:$0xff] }
 0x22c   : > { %2730 = vst.msk [vmem:[%s5459_s18 + $0x258] sm:$0xff] %vm2655_vm10, %v2597_v2  ;;  %v2641_v40 = vmul.f32 %v5858_v59, %v6671_v49  ;;  %v6675_v2 = vld [vmem:[#allocation5_spill] sm:$0xff]  ;;  %v6694_v49 = vld [vmem:[#allocation107_spill] sm:$0xff] }
 0x22d   : > { %2732 = vst.msk [vmem:[%s5459_s18 + $0x268] sm:$0xff] %vm2655_vm10, %v2599_v46  ;;  %v2410_v8 = vpop.permute.xlu1 %2409  ;;  %v2523_v39 = vmul.f32 %v6675_v2, %v6674_v6  ;;  %v6676_v46 = vld [vmem:[#allocation27_spill] sm:$0xff]  ;;  %v6697_v6 = vld [vmem:[#allocation24_spill] sm:$0xff] }
 0x22e   : > { %2735 = vst [vmem:[%s5459_s18 + $0x280] sm:$0xff] %v2602_v23  ;;  %v2608_v61 = vmul.f32 %v2410_v8, %v6667_v12  ;;  %v2609_v50 = vmul.f32 %v2410_v8, %v6668_v55  ;;  %v2525_v25 = vmul.f32 %v4815_v57, %v6676_v46  ;;  %v6677_v23 = vld [vmem:[#allocation54_spill] sm:$0xff]  ;;  %v6679_v57 = vld [vmem:[#allocation92_spill] sm:$0xff]  ;;  %v6691_v55 = vld [vmem:[#allocation99_spill] sm:$0xff] }
 0x22f   : > { %2736 = vst.msk [vmem:[%s5459_s18 + $0x288] sm:$0xff] %vm2655_vm10, %v2603_v10  ;;  %v2534_v60 = vmul.f32 %v5729_v42, %v6677_v23  ;;  %v6678_v10 = vld [vmem:[#allocation55_spill] sm:$0xff]  ;;  %v6690_v12 = vld [vmem:[#allocation98_spill] sm:$0xff]  ;;  %v6698_v2 = vld [vmem:[#allocation8_spill] sm:$0xff] }
 0x230   : > { %2738 = vst.msk [vmem:[%s5459_s18 + $0x298] sm:$0xff] %vm2655_vm10, %v2605_v7  ;;  %v2535_v51 = vmul.f32 %v5729_v42, %v6678_v10 }
 0x231   : > { %2743 = vst [vmem:[%s5459_s18 + $0x2c0] sm:$0xff] %v2610_v30  ;;  %v2330_v59 = vpop.permute.xlu0 %2329 }
 0x232   : > { %2744 = vst.msk [vmem:[%s5459_s18 + $0x2c8] sm:$0xff] %vm2655_vm10, %v2611_v28  ;;  %v6681_v28 = vld [vmem:[#allocation78_spill] sm:$0xff] }
 0x233   : > { %2756 = vst.msk [vmem:[%s5459_s18 + $0x328] sm:$0xff] %vm2655_vm10, %v2623_v26  ;;  %v2540_v9 = vmul.f32 %v5976_v4, %v6681_v28  ;;  %v6705_v28 = vld [vmem:[#allocation85_spill] sm:$0xff] }
 0x234   : > { %2760 = vst.msk [vmem:[%s5459_s18 + $0x348] sm:$0xff] %vm2655_vm10, %v2627_v19  ;;  %v6684_v19 = vld [vmem:[#allocation79_spill] sm:$0xff] }
 0x235   : > { %2762 = vst.msk [vmem:[%s5459_s18 + $0x358] sm:$0xff] %vm2655_vm10, %v2629_v16  ;;  %v2500_v20 = vpop.permute.xlu1 %2499  ;;  %v2541_v11 = vmul.f32 %v5976_v4, %v6684_v19  ;;  %v6685_v16 = vld [vmem:[#allocation33_spill] sm:$0xff]  ;;  %v2565_v4 = vmul.f32 %v5656_v0, %v6688_v3 }
 0x236   : > { %2766 = vst.msk [vmem:[%s5459_s18 + $0x378] sm:$0xff] %vm2655_vm10, %v2633_v48  ;;  %v2644_v26 = vmul.f32 %v2500_v20, %v6682_v36  ;;  %v2645_v42 = vmul.f32 %v2500_v20, %v6683_v63  ;;  %v2559_v27 = vmul.f32 %v4980_v58, %v6685_v16  ;;  %v6686_v48 = vld [vmem:[#allocation102_spill] sm:$0xff] }
 0x237   : > { %2768 = vst.msk [vmem:[%s5459_s18 + $0x388] sm:$0xff] %vm2655_vm10, %v2635_v47  ;;  %v6687_v47 = vld [vmem:[#allocation103_spill] sm:$0xff]  ;;  %v6710_v16 = vld [vmem:[#allocation30_spill] sm:$0xff] }
 0x238   : > { %2741 = vst [vmem:[%s5459_s18 + $0x2b0] sm:$0xff] %v2608_v61 }
 0x239   : > { %2742 = vst.msk [vmem:[%s5459_s18 + $0x2b8] sm:$0xff] %vm2655_vm10, %v2609_v50  ;;  %v2255_v35 = vpop.permute.xlu0 %2254 }
 0x23a   : > { %2771 = vst [vmem:[%s5459_s18 + $0x3a0] sm:$0xff] %v2638_v56  ;;  %v2546_v18 = vmul.f32 %v2255_v35, %v6686_v48  ;;  %v2547_v8 = vmul.f32 %v2255_v35, %v6687_v47 }
 0x23b   : > { %v2505_v13 = vpop.permute.xlu2 %2504  ;;  %2772 = vst.msk [vmem:[%s5459_s18 + $0x3a8] sm:$0xff] %vm2655_vm10, %v2639_v29  ;;  %v2571_v29 = vmul.f32 %v5938_v34, %v6692_v53 }
 0x23c   : > { %v2646_v1 = vmul.f32 %v2505_v13, %v6672_v5  ;;  %v2647_v17 = vmul.f32 %v2505_v13, %v6673_v24  ;;  %2773 = vst [vmem:[%s5459_s18 + $0x3b0] sm:$0xff] %v2640_v38  ;;  %v6689_v13 = vld [vmem:[#allocation72_spill] sm:$0xff]  ;;  %v6696_v24 = vld [vmem:[#allocation97_spill] sm:$0xff] }
 0x23d   : > { %2774 = vst.msk [vmem:[%s5459_s18 + $0x3b8] sm:$0xff] %vm2655_vm10, %v2641_v40  ;;  %v2570_v58 = vmul.f32 %v5938_v34, %v6689_v13  ;;  %v6695_v5 = vld [vmem:[#allocation96_spill] sm:$0xff]  ;;  %v6699_v34 = vld [vmem:[#allocation37_spill] sm:$0xff] }
 0x23e   : > { %2779 = vst [vmem:[%s5459_s18 + $0x3e0] sm:$0xff] %v2646_v1  ;;  %v2576_v1 = vmul.f32 %v2330_v59, %v6695_v5  ;;  %v2595_v46 = vmul.f32 %v5468_v15, %v6699_v34  ;;  %v6721_v5 = vld [vmem:[#allocation91_spill] sm:$0xff]  ;;  %v6724_v34 = vld [vmem:[#allocation120_spill] sm:$0xff] }
 0x23f   : > { %2780 = vst.msk [vmem:[%s5459_s18 + $0x3e8] sm:$0xff] %vm2655_vm10, %v2647_v17  ;;  %v2577_v17 = vmul.f32 %v2330_v59, %v6696_v24 }
 0x240   : > { %2656 = vst.msk [vmem:[%s5459_s18 + $0x8] sm:$0xff] %vm2655_vm10, %v2523_v39  ;;  %v2589_v39 = vmul.f32 %v6698_v2, %v6697_v6  ;;  %v6723_v2 = vld [vmem:[#allocation117_spill] sm:$0xff] }
 0x241   : > { %2658 = vst.msk [vmem:[%s5459_s18 + $0x18] sm:$0xff] %vm2655_vm10, %v2525_v25  ;;  %v6700_v25 = vld [vmem:[#allocation60_spill] sm:$0xff] }
 0x242   : > { %2667 = vst [vmem:[%s5459_s18 + $0x60] sm:$0xff] %v2534_v60  ;;  %v2600_v23 = vmul.f32 %v5812_v37, %v6700_v25 }
 0x243   : > { %2668 = vst.msk [vmem:[%s5459_s18 + $0x68] sm:$0xff] %vm2655_vm10, %v2535_v51  ;;  %v6702_v51 = vld [vmem:[#allocation104_spill] sm:$0xff] }
 0x244   : > { %2777 = vst [vmem:[%s5459_s18 + $0x3d0] sm:$0xff] %v2644_v26  ;;  %v6707_v26 = vld [vmem:[#allocation113_spill] sm:$0xff] }
 0x245   : > { %2778 = vst.msk [vmem:[%s5459_s18 + $0x3d8] sm:$0xff] %vm2655_vm10, %v2645_v42  ;;  %v6708_v42 = vld [vmem:[#allocation108_spill] sm:$0xff] }
 0x246   : > { %2673 = vst [vmem:[%s5459_s18 + $0x90] sm:$0xff] %v2540_v9  ;;  %v6706_v9 = vld [vmem:[#allocation112_spill] sm:$0xff] }
 0x247   : > { %2674 = vst.msk [vmem:[%s5459_s18 + $0x98] sm:$0xff] %vm2655_vm10, %v2541_v11  ;;  %v6709_v11 = vld [vmem:[#allocation109_spill] sm:$0xff] }
 0x248   : > { %v2340_v52 = vpop.permute.xlu2 %2339  ;;  %2679 = vst [vmem:[%s5459_s18 + $0xc0] sm:$0xff] %v2546_v18  ;;  %v6711_v18 = vld [vmem:[#allocation110_spill] sm:$0xff] }
 0x249   : > { %v2580_v7 = vmul.f32 %v2340_v52, %v6679_v57  ;;  %v2581_v30 = vmul.f32 %v2340_v52, %v6680_v31  ;;  %2680 = vst.msk [vmem:[%s5459_s18 + $0xc8] sm:$0xff] %vm2655_vm10, %v2547_v8  ;;  %v6701_v52 = vld [vmem:[#allocation61_spill] sm:$0xff]  ;;  %v6704_v31 = vld [vmem:[#allocation84_spill] sm:$0xff]  ;;  %v6712_v8 = vld [vmem:[#allocation111_spill] sm:$0xff] }
 0x24a   : > { %2692 = vst.msk [vmem:[%s5459_s18 + $0x128] sm:$0xff] %vm2655_vm10, %v2559_v27  ;;  %v2601_v10 = vmul.f32 %v5812_v37, %v6701_v52  ;;  %v6703_v57 = vld [vmem:[#allocation105_spill] sm:$0xff]  ;;  %v2607_v37 = vmul.f32 %v6010_v44, %v6705_v28  ;;  %v2625_v27 = vmul.f32 %v4891_v33, %v6710_v16  ;;  %v6714_v33 = vld [vmem:[#allocation115_spill] sm:$0xff]  ;;  %v6726_v52 = vld [vmem:[#allocation122_spill] sm:$0xff] }
 0x24b   : > { %2713 = vst [vmem:[%s5459_s18 + $0x1d0] sm:$0xff] %v2580_v7  ;;  %v6729_v28 = vld [vmem:[#allocation125_spill] sm:$0xff] }
 0x24c   : > { %2714 = vst.msk [vmem:[%s5459_s18 + $0x1d8] sm:$0xff] %vm2655_vm10, %v2581_v30  ;;  %v2606_v30 = vmul.f32 %v6010_v44, %v6704_v31 }
 0x24d   : > { %2698 = vst.msk [vmem:[%s5459_s18 + $0x158] sm:$0xff] %vm2655_vm10, %v2565_v4  ;;  %v6713_v4 = vld [vmem:[#allocation114_spill] sm:$0xff] }
 0x24e   : > { %2703 = vst [vmem:[%s5459_s18 + $0x180] sm:$0xff] %v2570_v58  ;;  %v6715_v58 = vld [vmem:[#allocation43_spill] sm:$0xff] }
 0x24f   : > { %2704 = vst.msk [vmem:[%s5459_s18 + $0x188] sm:$0xff] %vm2655_vm10, %v2571_v29  ;;  %v6718_v29 = vld [vmem:[#allocation118_spill] sm:$0xff] }
 0x250   : > { %2709 = vst [vmem:[%s5459_s18 + $0x1b0] sm:$0xff] %v2576_v1  ;;  %v2643_v1 = vmul.f32 %v6047_v22, %v6721_v5 }
 0x251   : > { %2710 = vst.msk [vmem:[%s5459_s18 + $0x1b8] sm:$0xff] %vm2655_vm10, %v2577_v17  ;;  %v6722_v17 = vld [vmem:[#allocation116_spill] sm:$0xff] }
 0x252   : > { %2722 = vst.msk [vmem:[%s5459_s18 + $0x218] sm:$0xff] %vm2655_vm10, %v2589_v39 }
 0x253   : > { %v2265_v56 = vpop.permute.xlu2 %2264  ;;  %v2335_v0 = vpop.permute.xlu1 %2334  ;;  %2728 = vst.msk [vmem:[%s5459_s18 + $0x248] sm:$0xff] %vm2655_vm10, %v2595_v46 }
 0x254   : > { %v2550_v61 = vmul.f32 %v2265_v56, %v6690_v12  ;;  %v2551_v50 = vmul.f32 %v2265_v56, %v6691_v55  ;;  %v2578_v38 = vmul.f32 %v2335_v0, %v6693_v54  ;;  %v2579_v40 = vmul.f32 %v2335_v0, %v6694_v49  ;;  %2733 = vst [vmem:[%s5459_s18 + $0x270] sm:$0xff] %v2600_v23  ;;  %v6717_v0 = vld [vmem:[#allocation67_spill] sm:$0xff]  ;;  %v6720_v49 = vld [vmem:[#allocation90_spill] sm:$0xff]  ;;  %v6725_v23 = vld [vmem:[#allocation121_spill] sm:$0xff] }
 0x255   : > { %2734 = vst.msk [vmem:[%s5459_s18 + $0x278] sm:$0xff] %vm2655_vm10, %v2601_v10  ;;  %v2631_v12 = vmul.f32 %v5581_v14, %v6715_v58  ;;  %v2637_v53 = vmul.f32 %v5883_v62, %v6717_v0 }
 0x256   : > { %2683 = vst [vmem:[%s5459_s18 + $0xe0] sm:$0xff] %v2550_v61  ;;  %v6716_v61 = vld [vmem:[#allocation66_spill] sm:$0xff] }
 0x257   : > { %2684 = vst.msk [vmem:[%s5459_s18 + $0xe8] sm:$0xff] %vm2655_vm10, %v2551_v50  ;;  %v2636_v55 = vmul.f32 %v5883_v62, %v6716_v61 }
 0x258   : > { %2711 = vst [vmem:[%s5459_s18 + $0x1c0] sm:$0xff] %v2578_v38  ;;  %v6719_v38 = vld [vmem:[#allocation119_spill] sm:$0xff] }
 0x259   : > { %2712 = vst.msk [vmem:[%s5459_s18 + $0x1c8] sm:$0xff] %vm2655_vm10, %v2579_v40  ;;  %v2642_v40 = vmul.f32 %v6047_v22, %v6720_v49 }
 0x25a   : > { %2739 = vst [vmem:[%s5459_s18 + $0x2a0] sm:$0xff] %v2606_v30 }
 0x25b   : > { %v2430_v59 = vpop.permute.xlu2 %2429  ;;  %v2420_v60 = vpop.permute.xlu0 %2419  ;;  %2740 = vst.msk [vmem:[%s5459_s18 + $0x2a8] sm:$0xff] %vm2655_vm10, %v2607_v37 }
 0x25c   : > { %v2616_v15 = vmul.f32 %v2430_v59, %v6702_v51  ;;  %v2617_v7 = vmul.f32 %v2430_v59, %v6703_v57  ;;  %v2612_v19 = vmul.f32 %v2420_v60, %v6708_v42  ;;  %v2613_v35 = vmul.f32 %v2420_v60, %v6709_v11  ;;  %2758 = vst.msk [vmem:[%s5459_s18 + $0x338] sm:$0xff] %vm2655_vm10, %v2625_v27  ;;  %v6727_v51 = vld [vmem:[#allocation123_spill] sm:$0xff] }
 0x25d   : > { %2764 = vst.msk [vmem:[%s5459_s18 + $0x368] sm:$0xff] %vm2655_vm10, %v2631_v12 }
 0x25e   : > { %2749 = vst [vmem:[%s5459_s18 + $0x2f0] sm:$0xff] %v2616_v15 }
 0x25f   : > { %2750 = vst.msk [vmem:[%s5459_s18 + $0x2f8] sm:$0xff] %vm2655_vm10, %v2617_v7  ;;  %v6728_v7 = vld [vmem:[#allocation124_spill] sm:$0xff] }
 0x260   : > { %2745 = vst [vmem:[%s5459_s18 + $0x2d0] sm:$0xff] %v2612_v19 }
 0x261   : > { %2746 = vst.msk [vmem:[%s5459_s18 + $0x2d8] sm:$0xff] %vm2655_vm10, %v2613_v35 }
 0x262   : > { %v2260_v20 = vpop.permute.xlu1 %2259  ;;  %2769 = vst [vmem:[%s5459_s18 + $0x390] sm:$0xff] %v2636_v55 }
 0x263   : > { %v2548_v36 = vmul.f32 %v2260_v20, %v6706_v9  ;;  %v2549_v63 = vmul.f32 %v2260_v20, %v6707_v26  ;;  %2770 = vst.msk [vmem:[%s5459_s18 + $0x398] sm:$0xff] %vm2655_vm10, %v2637_v53  ;;  %v6730_v26 = vld [vmem:[#allocation126_spill] sm:$0xff] }
 0x264   : > { %v2355_v44 = vpop.permute.xlu2 %2354  ;;  %2775 = vst [vmem:[%s5459_s18 + $0x3c0] sm:$0xff] %v2642_v40 }
 0x265   : > { %2681 = vst [vmem:[%s5459_s18 + $0xd0] sm:$0xff] %v2548_v36  ;;  %v2586_v47 = vmul.f32 %v2355_v44, %v6711_v18  ;;  %v2587_v3 = vmul.f32 %v2355_v44, %v6712_v8 }
 0x266   : > { %2682 = vst.msk [vmem:[%s5459_s18 + $0xd8] sm:$0xff] %vm2655_vm10, %v2549_v63 }
 0x267   : > { %2719 = vst [vmem:[%s5459_s18 + $0x200] sm:$0xff] %v2586_v47 }
 0x268   : > { %v2345_v48 = vpop.permute.xlu0 %2344  ;;  %2720 = vst.msk [vmem:[%s5459_s18 + $0x208] sm:$0xff] %vm2655_vm10, %v2587_v3 }
 0x269   : > { %v2582_v56 = vmul.f32 %v2345_v48, %v6713_v4  ;;  %v2583_v13 = vmul.f32 %v2345_v48, %v6714_v33  ;;  %2776 = vst.msk [vmem:[%s5459_s18 + $0x3c8] sm:$0xff] %vm2655_vm10, %v2643_v1 }
 0x26b   : > { %2715 = vst [vmem:[%s5459_s18 + $0x1e0] sm:$0xff] %v2582_v56  ;;  %v2425_v50 = vpop.permute.xlu1 %2424 }
 0x26c   : > { %2716 = vst.msk [vmem:[%s5459_s18 + $0x1e8] sm:$0xff] %vm2655_vm10, %v2583_v13  ;;  %v2614_v54 = vmul.f32 %v2425_v50, %v6718_v29  ;;  %v2615_v14 = vmul.f32 %v2425_v50, %v6719_v38 }
 0x26e   : > { %2747 = vst [vmem:[%s5459_s18 + $0x2e0] sm:$0xff] %v2614_v54  ;;  %v2520_v62 = vpop.permute.xlu2 %2519 }
 0x26f   : > { %2748 = vst.msk [vmem:[%s5459_s18 + $0x2e8] sm:$0xff] %vm2655_vm10, %v2615_v14  ;;  %v2652_v6 = vmul.f32 %v2520_v62, %v6722_v17  ;;  %v2653_v39 = vmul.f32 %v2520_v62, %v6723_v2 }
 0x270   : > { %v2270_v24 = vpop.permute.xlu0 %2269 }
 0x271   : > { %v2552_v46 = vmul.f32 %v2270_v24, %v6724_v34  ;;  %v2553_v22 = vmul.f32 %v2270_v24, %v5413_v21  ;;  %2785 = vst [vmem:[%s5459_s18 + $0x410] sm:$0xff] %v2652_v6 }
 0x272   : > { %2786 = vst.msk [vmem:[%s5459_s18 + $0x418] sm:$0xff] %vm2655_vm10, %v2653_v39 }
 0x273   : > { %2685 = vst [vmem:[%s5459_s18 + $0xf0] sm:$0xff] %v2552_v46 }
 0x274   : > { %2686 = vst.msk [vmem:[%s5459_s18 + $0xf8] sm:$0xff] %vm2655_vm10, %v2553_v22 }
 0x276   : > { %v2350_v25 = vpop.permute.xlu1 %2349 }
 0x277   : > { %v2584_v59 = vmul.f32 %v2350_v25, %v6725_v23  ;;  %v2585_v60 = vmul.f32 %v2350_v25, %v5419_v32 }
 0x279   : > { %2717 = vst [vmem:[%s5459_s18 + $0x1f0] sm:$0xff] %v2584_v59  ;;  %v2435_v21 = vpop.permute.xlu0 %2434 }
 0x27a   : > { %2718 = vst.msk [vmem:[%s5459_s18 + $0x1f8] sm:$0xff] %vm2655_vm10, %v2585_v60  ;;  %v2618_v10 = vmul.f32 %v2435_v21, %v6726_v52  ;;  %v2619_v15 = vmul.f32 %v2435_v21, %v6727_v51 }
 0x27c   : > { %2751 = vst [vmem:[%s5459_s18 + $0x300] sm:$0xff] %v2618_v10 }
 0x27d   : > { %2752 = vst.msk [vmem:[%s5459_s18 + $0x308] sm:$0xff] %vm2655_vm10, %v2619_v15 }
 0x27f   : > { %v2440_v57 = vpop.permute.xlu1 %2439 }
 0x280   : > { %v2620_v31 = vmul.f32 %v2440_v57, %v6728_v7  ;;  %v2621_v32 = vmul.f32 %v2440_v57, %v5446_v41 }
 0x282   : > { %2753 = vst [vmem:[%s5459_s18 + $0x310] sm:$0xff] %v2620_v31 }
 0x283   : > { %2754 = vst.msk [vmem:[%s5459_s18 + $0x318] sm:$0xff] %vm2655_vm10, %v2621_v32 }
 0x284   : > { %v2510_v30 = vpop.permute.xlu0 %2509 }
 0x285   : > { %v2648_v20 = vmul.f32 %v2510_v30, %v5449_v45  ;;  %v2649_v37 = vmul.f32 %v2510_v30, %v6729_v28 }
 0x287   : > { %2781 = vst [vmem:[%s5459_s18 + $0x3f0] sm:$0xff] %v2648_v20 }
 0x288   : > { %2782 = vst.msk [vmem:[%s5459_s18 + $0x3f8] sm:$0xff] %vm2655_vm10, %v2649_v37 }
 0x289   : > { %v2515_v9 = vpop.permute.xlu1 %2514 }
 0x28a   : > { %v2650_v36 = vmul.f32 %v2515_v9, %v5471_v43  ;;  %v2651_v63 = vmul.f32 %v2515_v9, %v6730_v26 }
 0x28c   : > { %2783 = vst [vmem:[%s5459_s18 + $0x400] sm:$0xff] %v2650_v36 }
 0x28d   : > { %2784 = vst.msk [vmem:[%s5459_s18 + $0x408] sm:$0xff] %vm2655_vm10, %v2651_v63 }
 0x28e PF: > { %s14_s15 = sadd.s32 1, %s3317_s15  }
 0x28f   : > { %p11_p4 = scmp.ge.s32.totalorder %s14_s15, 4  }
 0x291   :  { %13 = sbr.rel (!%p11_p4) target bundleno = 1 (0x1), region = 72 }

</bundles_post_ra>
